<compile_context>
chip_gen: v5e
topology: v5e:2x2
jax: 0.10.0
libtpu: 0.0.40
codegen_flags: <defaults>
</compile_context>

<pallas_src>
import jax
import jax.numpy as jnp
from jax import lax
from jax.experimental import pallas as pl
from jax.experimental.pallas import tpu as pltpu   # noqa: F401 (TPU backend)

# ----------------------------- model hyper-params ---------------------------
FUSION_DIM = 128          # self.fusion_output_size
NUM_HEADS = 8             # attention heads (inert at S == 1, kept for parity)
HIDDEN_STATE = 64         # GRU hidden size
HIDDEN_LAYER = 64         # policy / value hidden size
ACTION_DIM = 3
VECTOR_DIM = 8            # small vector obs (<= 50)  -> VectorEncoder passthrough
LIDAR_DIM = 64            # lidar obs (> 50)          -> LidarFeatureExtractor
IMG_SHAPE = (3, 36, 36)   # vision obs (C, H, W)      -> VisualEncoder

BP = 8                    # padded batch-row count used by the trunk kernel

# conv geometry implied by IMG_SHAPE
C_IN, IMG_H, IMG_W = IMG_SHAPE
OH1 = (IMG_H - 8) // 4 + 1        # 8
OH2 = (OH1 - 4) // 2 + 1          # 3
OH3 = (OH2 - 3) // 1 + 1          # 1
assert OH1 == 8 and OH2 == 3 and OH3 == 1   # conv3 covers its whole input
CONV_OUT = 64 * OH3 * OH3         # 64
K1 = C_IN * 8 * 8                 # 192  conv1 patch width
K2 = 32 * 4 * 4                   # 512  conv2 patch width
K3 = 64 * OH2 * OH2               # 576  conv3 (dense) input width

# ---- packed-weight stack indices (square 128x128 weights / 128-wide biases) --
(W_L1, W_L2, W_CV, W_CO, W_MSV, W_MSL, W_RESV, W_RESL,
 W_LH, W_P1, W_P2, W_V1, W_V2, W_VFC1, W_VFC2) = range(15)

(B_L1, B_L2, B_CV, B_CO, B_CF2, B_BETA, B_GAMMA, B_MS, B_FUS2, B_RES,
 B_LH, B_P1, B_P2, B_V1, B_V2, B_C3, B_VFC1, B_VFC2) = range(18)


def _ceil(x, m):
    return ((x + m - 1) // m) * m


def _padm(w, rows, cols):
    w = jnp.asarray(w, jnp.float32)
    return jnp.zeros((rows, cols), jnp.float32).at[: w.shape[0], : w.shape[1]].set(w)


def _padv(b, cols):
    b = jnp.asarray(b, jnp.float32)
    return jnp.zeros((1, cols), jnp.float32).at[0, : b.shape[0]].set(b)


# ============================ Pallas kernels =================================
def _matmul_bias_relu_kernel(x_ref, w_ref, b_ref, o_ref):
    y = jnp.dot(x_ref[...], w_ref[...], preferred_element_type=jnp.float32)
    o_ref[...] = jnp.maximum(y + b_ref[...], 0.0)


def _matmul_bias_relu(x, w, b):
    """relu(x @ w + b) on pre-padded, lane-aligned operands (whole-array VMEM)."""
    return pl.pallas_call(
        _matmul_bias_relu_kernel,
        out_shape=jax.ShapeDtypeStruct((x.shape[0], w.shape[1]), jnp.float32),
    )(x, w, b)


def _sigmoid(x):
    return 1.0 / (1.0 + jnp.exp(-x))


def _trunk_kernel(c2f_ref, ld_ref, vec_ref, h0_ref,
                  w3f_ref, wsq_ref, bsm_ref,
                  wf1_ref, bf1_ref, wf2_ref,
                  wc1_ref, bc1_ref, wc2_ref,
                  wg_ref, bg_ref,
                  mean_ref, val_ref, hn_ref):
    f32 = jnp.float32

    def mm(a, b):
        return jnp.dot(a, b, preferred_element_type=f32)

    def lin(x, wi, bi, relu=False):
        y = mm(x, wsq_ref[wi]) + bsm_ref[bi]
        return jnp.maximum(y, 0.0) if relu else y

    # ---- visual tail: conv3 (dense over flattened 3x3x64) + fc1 + fc2 ------
    y3 = jnp.maximum(mm(c2f_ref[...], w3f_ref[...]) + bsm_ref[B_C3], 0.0)
    fv = lin(lin(y3, W_VFC1, B_VFC1, relu=True), W_VFC2, B_VFC2, relu=True)

    # ---- lidar encoder (eval BatchNorm1d folded into second linear) --------
    fl = lin(lin(ld_ref[...], W_L1, B_L1, relu=True), W_L2, B_L2)

    # ---- CrossFeatureEnhancement x3 (shared weights) ------------------------
    # S == 1  =>  per-head softmax over a single key is exactly 1, so the
    # attention output equals V_L and Q/K projections are inert.  Each stream
    # therefore evolves independently; process [T_L ; T_V] stacked on rows.
    # alpha is folded into (W_o, b_o), delta into (W_ffn2, b_ffn2).
    beta = bsm_ref[B_BETA]
    gamma = bsm_ref[B_GAMMA]
    wv = wsq_ref[W_CV]
    bv = bsm_ref[B_CV]
    wo = wsq_ref[W_CO]
    bo = bsm_ref[B_CO]
    wc1 = wc1_ref[...]
    bc1 = bc1_ref[...]
    wc2 = wc2_ref[...]
    bc2 = bsm_ref[B_CF2]
    t = jnp.concatenate([fl, fv], axis=0)              # (2*BP, 128): [T_L ; T_V]
    for _ in range(3):
        z = mm(mm(t, wv) + bv, wo) + bo
        tp = z + beta * t
        ffn = mm(jnp.maximum(mm(tp, wc1) + bc1, 0.0), wc2) + bc2
        t = gamma * tp + ffn
    tl = t[0:BP, :]
    tv = t[BP:2 * BP, :]

    # ---- FeatureFusion (L == 1: conv1d == centre tap; fus1 BN folded) ------
    s12 = mm(tv, wsq_ref[W_MSV]) + mm(tl, wsq_ref[W_MSL]) + bsm_ref[B_MS]
    pre = (mm(s12, wf1_ref[0]) + mm(tv, wf1_ref[1]) + mm(tl, wf1_ref[2])
           + bf1_ref[...])
    fus = mm(jnp.maximum(pre, 0.0), wf2_ref[...]) + bsm_ref[B_FUS2]
    res = mm(tv, wsq_ref[W_RESV]) + mm(tl, wsq_ref[W_RESL]) + bsm_ref[B_RES]
    fused = jnp.maximum(fus + res, 0.0)
    # TODO(synk): training-mode Dropout(0.5) / batch-stat BatchNorm not
    # implemented; eval-mode semantics (identity / running stats) are used.

    # ---- GRU single step, gates fused into 384-wide matmuls (r|z|n) --------
    h0 = h0_ref[...]
    gi = mm(fused, wg_ref[0]) + mm(vec_ref[...], wg_ref[1]) + bg_ref[0]
    gh = mm(h0, wg_ref[2]) + bg_ref[1]
    r = _sigmoid(gi[:, 0:128] + gh[:, 0:128])
    zg = _sigmoid(gi[:, 128:256] + gh[:, 128:256])
    n = jnp.tanh(gi[:, 256:384] + r * gh[:, 256:384])     # r * (W_hn h + b_hn)
    hn = (1.0 - zg) * n + zg * h0
    hn_ref[...] = hn

    # ---- policy / value heads ------------------------------------------------
    h2 = lin(hn, W_LH, B_LH, relu=True)
    ph = lin(h2, W_P1, B_P1, relu=True)
    mean_ref[...] = jnp.tanh(lin(ph, W_P2, B_P2))
    vh = lin(h2, W_V1, B_V1, relu=True)
    val_ref[...] = lin(vh, W_V2, B_V2)


def _trunk(pk, c2f, ld, vec, h0):
    return pl.pallas_call(
        _trunk_kernel,
        out_shape=(
            jax.ShapeDtypeStruct((BP, 128), jnp.float32),   # mean (padded)
            jax.ShapeDtypeStruct((BP, 128), jnp.float32),   # value (padded)
            jax.ShapeDtypeStruct((BP, 128), jnp.float32),   # new hidden (padded)
        ),
    )(c2f, ld, vec, h0,
      pk["w3f"], pk["w_sq"], pk["b_sm"],
      pk["w_f1"], pk["b_f1"], pk["w_f2"],
      pk["w_c1"], pk["b_c1"], pk["w_c2"],
      pk["w_g"], pk["b_g"])


# ================================ forward ====================================
def forward(pk, vision, lidar, vector, h0):
    f32 = jnp.float32
    B = vision.shape[0]
    vision = vision.astype(f32)

    # ---- conv1: single-op patch extraction + one Pallas matmul --------------
    p1 = lax.conv_general_dilated_patches(
        vision, (8, 8), (4, 4), "VALID",
        dimension_numbers=("NCHW", "OIHW", "NCHW"))         # (B, 192, 8, 8)
    p1 = p1.transpose(0, 2, 3, 1).reshape(B * OH1 * OH1, K1)
    r1 = _ceil(B * OH1 * OH1, 8)
    p1 = _padm(p1, r1, _ceil(K1, 128))
    y1 = _matmul_bias_relu(p1, pk["c1_w"], pk["c1_b"])       # (r1, 128)
    y1 = y1[: B * OH1 * OH1, :32].reshape(B, OH1, OH1, 32).transpose(0, 3, 1, 2)

    # ---- conv2: single-op patch extraction + one Pallas matmul --------------
    p2 = lax.conv_general_dilated_patches(
        y1, (4, 4), (2, 2), "VALID",
        dimension_numbers=("NCHW", "OIHW", "NCHW"))          # (B, 512, 3, 3)
    p2 = p2.transpose(0, 2, 3, 1).reshape(B * OH2 * OH2, K2)
    r2 = _ceil(B * OH2 * OH2, 8)
    p2 = _padm(p2, r2, K2)
    y2 = _matmul_bias_relu(p2, pk["c2_w"], pk["c2_b"])       # (r2, 128)
    c2f = y2[: B * OH2 * OH2, :64].reshape(B, K3)            # (B, 576)

    # ---- trunk megakernel (everything else) ----------------------------------
    c2fp = _padm(c2f, BP, _ceil(K3, 128))                    # (8, 640)
    ldp = _padm(lidar.astype(f32), BP, 128)
    vecp = _padm(vector.astype(f32), BP, 128)
    h0p = _padm(h0[0].astype(f32), BP, 128)
    mean_p, val_p, hn_p = _trunk(pk, c2fp, ldp, vecp, h0p)

    mean = mean_p[:B, :ACTION_DIM]
    value = val_p[:B, 0]
    h_new = hn_p[:B, :HIDDEN_STATE]
    std = jnp.broadcast_to(jnp.clip(jnp.exp(pk["log_std"]), 1e-5, 10.0), mean.shape)
    return mean, std, value, h_new[None]


# ============================ parameter init =================================
def init_params(key):
    keys = iter(jax.random.split(key, 64))
    p = {}

    def lin(name, fi, fo):
        k1, k2 = jax.random.split(next(keys))
        p[name + "_w"] = jax.random.normal(k1, (fi, fo), jnp.float32) / jnp.sqrt(float(fi))
        p[name + "_b"] = jax.random.normal(k2, (fo,), jnp.float32) * 0.01

    # VisualEncoder (conv weights stored matmul-ready: (patch_features, out))
    lin("conv1", K1, 32)
    lin("conv2", K2, 64)
    lin("conv3", K3, 64)
    lin("vfc1", CONV_OUT, 128)
    lin("vfc2", 128, FUSION_DIM)
    # LidarFeatureExtractor
    lin("lfc1", LIDAR_DIM, FUSION_DIM)
    lin("lfc2", FUSION_DIM, FUSION_DIM)
    p["lbn_g"] = jnp.ones((FUSION_DIM,), jnp.float32)
    p["lbn_b"] = jnp.zeros((FUSION_DIM,), jnp.float32)
    p["lbn_rm"] = jnp.zeros((FUSION_DIM,), jnp.float32)
    p["lbn_rv"] = jnp.ones((FUSION_DIM,), jnp.float32)
    # CrossFeatureEnhancement (shared module).  W_q / W_k are inert at S == 1
    # (kept only for parameter parity with the PyTorch module).
    for n in ("cfe_q", "cfe_k", "cfe_v", "cfe_o"):
        lin(n, FUSION_DIM, FUSION_DIM)
    lin("cfe_ffn1", FUSION_DIM, FUSION_DIM * 4)
    lin("cfe_ffn2", FUSION_DIM * 4, FUSION_DIM)
    for n in ("cfe_alpha", "cfe_beta", "cfe_gamma", "cfe_delta"):
        p[n] = jnp.array(1.0, jnp.float32)
    # FeatureFusion (conv1d weights kept in torch (out, in, k) layout)
    k1, k2, k3, k4 = jax.random.split(next(keys), 4)
    p["ms1_w"] = jax.random.normal(k1, (64, FUSION_DIM * 2, 3), jnp.float32) * 0.05
    p["ms1_b"] = jax.random.normal(k2, (64,), jnp.float32) * 0.01
    p["ms2_w"] = jax.random.normal(k3, (64, FUSION_DIM * 2, 5), jnp.float32) * 0.05
    p["ms2_b"] = jax.random.normal(k4, (64,), jnp.float32) * 0.01
    lin("fus1", FUSION_DIM * 3, 256)
    p["fbn_g"] = jnp.ones((256,), jnp.float32)
    p["fbn_b"] = jnp.zeros((256,), jnp.float32)
    p["fbn_rm"] = jnp.zeros((256,), jnp.float32)
    p["fbn_rv"] = jnp.ones((256,), jnp.float32)
    lin("fus2", 256, FUSION_DIM)
    lin("res", FUSION_DIM * 2, FUSION_DIM)
    # GRU (gate order r, z, n; zero biases per module init)
    gru_in = FUSION_DIM + VECTOR_DIM
    kg1, kg2 = jax.random.split(next(keys))
    p["gru_wih"] = jax.random.normal(kg1, (3, gru_in, HIDDEN_STATE), jnp.float32) * 0.1
    p["gru_whh"] = jax.random.normal(kg2, (3, HIDDEN_STATE, HIDDEN_STATE), jnp.float32) * 0.1
    p["gru_bih"] = jnp.zeros((3, HIDDEN_STATE), jnp.float32)
    p["gru_bhh"] = jnp.zeros((3, HIDDEN_STATE), jnp.float32)
    # heads
    lin("lin_hidden", HIDDEN_STATE, HIDDEN_LAYER)
    lin("pol1", HIDDEN_LAYER, HIDDEN_LAYER)
    lin("pol2", HIDDEN_LAYER, ACTION_DIM)
    lin("val1", HIDDEN_LAYER, HIDDEN_LAYER)
    lin("val2", HIDDEN_LAYER, 1)
    p["log_std"] = jnp.zeros((1, ACTION_DIM), jnp.float32)
    return p


# ----------------- one-time weight packing / padding / BN folding ------------
def prepare_params(p):
    f32 = jnp.float32
    eps = 1e-5

    # visual conv weights, lane-aligned once
    c1_w = _padm(p["conv1_w"], _ceil(K1, 128), 128)
    c1_b = _padv(p["conv1_b"], 128)
    c2_w = _padm(p["conv2_w"], K2, 128)
    c2_b = _padv(p["conv2_b"], 128)
    w3f = _padm(p["conv3_w"], _ceil(K3, 128), 128)

    # lidar BatchNorm folded into second linear (eval mode)
    s_l = p["lbn_g"] / jnp.sqrt(p["lbn_rv"] + eps)
    wl2 = p["lfc2_w"] * s_l[None, :]
    bl2 = (p["lfc2_b"] - p["lbn_rm"]) * s_l + p["lbn_b"]

    # CFE: fold alpha into (W_o, b_o), delta into (W_ffn2, b_ffn2)
    wo_a = p["cfe_o_w"] * p["cfe_alpha"]
    bo_a = p["cfe_o_b"] * p["cfe_alpha"]
    wc2_d = p["cfe_ffn2_w"] * p["cfe_delta"]
    bc2_d = p["cfe_ffn2_b"] * p["cfe_delta"]
    beta_row = jnp.broadcast_to(p["cfe_beta"].astype(f32), (1, 128))
    gamma_row = jnp.broadcast_to(p["cfe_gamma"].astype(f32), (1, 128))

    # FeatureFusion: L == 1 => each conv1d reduces to its centre tap; fold BN
    ms1_c = jnp.transpose(p["ms1_w"][:, :, 1])              # (256, 64)
    ms2_c = jnp.transpose(p["ms2_w"][:, :, 2])              # (256, 64)
    wms = jnp.concatenate([ms1_c, ms2_c], axis=1)           # (256, 128)
    bms = jnp.concatenate([p["ms1_b"], p["ms2_b"]])         # (128,)
    s_f = p["fbn_g"] / jnp.sqrt(p["fbn_rv"] + eps)
    wfus1 = p["fus1_w"] * s_f[None, :]                      # (384, 256)
    bfus1 = (p["fus1_b"] - p["fbn_rm"]) * s_f + p["fbn_b"]
    w_f1 = jnp.stack([wfus1[0:128], wfus1[128:256], wfus1[256:384]])
    b_f1 = bfus1[None, :].astype(f32)

    # GRU: fuse the 3 gates into 384-wide matmuls (gate g -> lanes g*128..)
    wih, whh = p["gru_wih"], p["gru_whh"]
    bih, bhh = p["gru_bih"], p["gru_bhh"]
    wih_f = jnp.zeros((128, 384), f32)
    wih_v = jnp.zeros((128, 384), f32)
    whh_p = jnp.zeros((128, 384), f32)
    bih_p = jnp.zeros((1, 384), f32)
    bhh_p = jnp.zeros((1, 384), f32)
    for g in range(3):
        c0 = g * 128
        wih_f = wih_f.at[:FUSION_DIM, c0:c0 + HIDDEN_STATE].set(wih[g, :FUSION_DIM, :])
        wih_v = wih_v.at[:VECTOR_DIM, c0:c0 + HIDDEN_STATE].set(wih[g, FUSION_DIM:, :])
        whh_p = whh_p.at[:HIDDEN_STATE, c0:c0 + HIDDEN_STATE].set(whh[g])
        bih_p = bih_p.at[0, c0:c0 + HIDDEN_STATE].set(bih[g])
        bhh_p = bhh_p.at[0, c0:c0 + HIDDEN_STATE].set(bhh[g])

    w_sq = jnp.stack([
        _padm(p["lfc1_w"], 128, 128),            # W_L1
        _padm(wl2, 128, 128),                    # W_L2   (BN folded)
        _padm(p["cfe_v_w"], 128, 128),           # W_CV
        _padm(wo_a, 128, 128),                   # W_CO   (alpha folded)
        _padm(wms[0:128], 128, 128),             # W_MSV
        _padm(wms[128:256], 128, 128),           # W_MSL
        _padm(p["res_w"][0:128], 128, 128),      # W_RESV
        _padm(p["res_w"][128:256], 128, 128),    # W_RESL
        _padm(p["lin_hidden_w"], 128, 128),      # W_LH
        _padm(p["pol1_w"], 128, 128),            # W_P1
        _padm(p["pol2_w"], 128, 128),            # W_P2
        _padm(p["val1_w"], 128, 128),            # W_V1
        _padm(p["val2_w"], 128, 128),            # W_V2
        _padm(p["vfc1_w"], 128, 128),            # W_VFC1
        _padm(p["vfc2_w"], 128, 128),            # W_VFC2
    ])
    b_sm = jnp.stack([
        _padv(p["lfc1_b"], 128),                 # B_L1
        _padv(bl2, 128),                         # B_L2
        _padv(p["cfe_v_b"], 128),                # B_CV
        _padv(bo_a, 128),                        # B_CO
        _padv(bc2_d, 128),                       # B_CF2
        beta_row,                                # B_BETA
        gamma_row,                               # B_GAMMA
        _padv(bms, 128),                         # B_MS
        _padv(p["fus2_b"], 128),                 # B_FUS2
        _padv(p["res_b"], 128),                  # B_RES
        _padv(p["lin_hidden_b"], 128),           # B_LH
        _padv(p["pol1_b"], 128),                 # B_P1
        _padv(p["pol2_b"], 128),                 # B_P2
        _padv(p["val1_b"], 128),                 # B_V1
        _padv(p["val2_b"], 128),                 # B_V2
        _padv(p["conv3_b"], 128),                # B_C3
        _padv(p["vfc1_b"], 128),                 # B_VFC1
        _padv(p["vfc2_b"], 128),                 # B_VFC2
    ])

    return {
        "c1_w": c1_w, "c1_b": c1_b,
        "c2_w": c2_w, "c2_b": c2_b,
        "w3f": w3f,
        "w_sq": w_sq, "b_sm": b_sm,
        "w_f1": w_f1, "b_f1": b_f1, "w_f2": p["fus2_w"].astype(f32),
        "w_c1": p["cfe_ffn1_w"].astype(f32),
        "b_c1": p["cfe_ffn1_b"][None, :].astype(f32),
        "w_c2": wc2_d.astype(f32),
        "w_g": jnp.stack([wih_f, wih_v, whh_p]),
        "b_g": jnp.stack([bih_p, bhh_p]),
        "log_std": p["log_std"].astype(f32),
    }


# =================================== main ====================================
if __name__ == "__main__":
    B = 2
    key = jax.random.PRNGKey(0)
    kp, kv, kl, kvec = jax.random.split(key, 4)
    params = init_params(kp)
    packed = prepare_params(params)        # one-time padding / packing / BN-folding

    vision = jax.random.normal(kv, (B,) + IMG_SHAPE, jnp.float32)
    lidar = jax.random.normal(kl, (B, LIDAR_DIM), jnp.float32)
    vector = jax.random.normal(kvec, (B, VECTOR_DIM), jnp.float32)
    h0 = jnp.zeros((1, B, HIDDEN_STATE), jnp.float32)   # init_recurrent_cell_states

    fwd = jax.jit(forward)
    mean, std, value, cell = fwd(packed, vision, lidar, vector, h0)
    jax.block_until_ready((mean, std, value, cell))

    assert mean.shape == (B, ACTION_DIM)
    assert std.shape == (B, ACTION_DIM)
    assert value.shape == (B,)
    assert cell.shape == (1, B, HIDDEN_STATE)
    assert bool(jnp.all(jnp.isfinite(mean)))
    assert bool(jnp.all(jnp.isfinite(value)))
    print("KERNEL_OK")
</pallas_src>

<mosaic_0001>
module attributes {stable_mosaic.version = 11 : i64} {
  func.func @_matmul_bias_relu_kernel(%arg0: memref<128x256xf32, #tpu.memory_space<vmem>>, %arg1: memref<256x128xf32, #tpu.memory_space<vmem>>, %arg2: memref<1x128xf32, #tpu.memory_space<vmem>>, %arg3: memref<128x128xf32, #tpu.memory_space<vmem>>) attributes {dimension_semantics = [], scalar_prefetch = 0 : i64, scratch_operands = 0 : i64, tpu.core_type = #tpu.core_type<tc>} {
    %c0 = arith.constant 0 : index
    %c0_0 = arith.constant 0 : index
    %0 = vector.load %arg0[%c0, %c0_0] : memref<128x256xf32, #tpu.memory_space<vmem>>, vector<128x256xf32>
    %c0_1 = arith.constant 0 : index
    %c0_2 = arith.constant 0 : index
    %1 = vector.load %arg1[%c0_1, %c0_2] : memref<256x128xf32, #tpu.memory_space<vmem>>, vector<256x128xf32>
    %cst = arith.constant dense<0.000000e+00> : vector<128x128xf32>
    %2 = tpu.matmul %0, %1, %cst {dimension_numbers = #tpu.dot_dimension_numbers<[1], [0], [0], [1], [0, 0, 1, 1], [], []>} : vector<128x256xf32>, vector<256x128xf32>, vector<128x128xf32> -> vector<128x128xf32>
    %c0_3 = arith.constant 0 : index
    %c0_4 = arith.constant 0 : index
    %3 = vector.load %arg2[%c0_3, %c0_4] : memref<1x128xf32, #tpu.memory_space<vmem>>, vector<1x128xf32>
    %4 = vector.broadcast %3 : vector<1x128xf32> to vector<128x128xf32>
    %5 = arith.addf %2, %4 : vector<128x128xf32>
    %cst_5 = arith.constant 0.000000e+00 : f32
    %6 = vector.broadcast %cst_5 : f32 to vector<128x128xf32>
    %7 = arith.maximumf %5, %6 : vector<128x128xf32>
    %c0_6 = arith.constant 0 : index
    %c0_7 = arith.constant 0 : index
    %8 = vector.load %arg3[%c0_6, %c0_7] : memref<128x128xf32, #tpu.memory_space<vmem>>, vector<128x128xf32>
    tpu.vector_store %arg3[%c0_6, %c0_7], %7 {strides = array<i32>} : memref<128x128xf32, #tpu.memory_space<vmem>>, vector<128x128xf32>,
    return
  }
}

module attributes {stable_mosaic.version = 11 : i64} {
  func.func @_matmul_bias_relu_kernel(%arg0: memref<24x512xf32, #tpu.memory_space<vmem>>, %arg1: memref<512x128xf32, #tpu.memory_space<vmem>>, %arg2: memref<1x128xf32, #tpu.memory_space<vmem>>, %arg3: memref<24x128xf32, #tpu.memory_space<vmem>>) attributes {dimension_semantics = [], scalar_prefetch = 0 : i64, scratch_operands = 0 : i64, tpu.core_type = #tpu.core_type<tc>} {
    %c0 = arith.constant 0 : index
    %c0_0 = arith.constant 0 : index
    %0 = vector.load %arg0[%c0, %c0_0] : memref<24x512xf32, #tpu.memory_space<vmem>>, vector<24x512xf32>
    %c0_1 = arith.constant 0 : index
    %c0_2 = arith.constant 0 : index
    %1 = vector.load %arg1[%c0_1, %c0_2] : memref<512x128xf32, #tpu.memory_space<vmem>>, vector<512x128xf32>
    %cst = arith.constant dense<0.000000e+00> : vector<24x128xf32>
    %2 = tpu.matmul %0, %1, %cst {dimension_numbers = #tpu.dot_dimension_numbers<[1], [0], [0], [1], [0, 0, 1, 1], [], []>} : vector<24x512xf32>, vector<512x128xf32>, vector<24x128xf32> -> vector<24x128xf32>
    %c0_3 = arith.constant 0 : index
    %c0_4 = arith.constant 0 : index
    %3 = vector.load %arg2[%c0_3, %c0_4] : memref<1x128xf32, #tpu.memory_space<vmem>>, vector<1x128xf32>
    %4 = vector.broadcast %3 : vector<1x128xf32> to vector<24x128xf32>
    %5 = arith.addf %2, %4 : vector<24x128xf32>
    %cst_5 = arith.constant 0.000000e+00 : f32
    %6 = vector.broadcast %cst_5 : f32 to vector<24x128xf32>
    %7 = arith.maximumf %5, %6 : vector<24x128xf32>
    %c0_6 = arith.constant 0 : index
    %c0_7 = arith.constant 0 : index
    %8 = vector.load %arg3[%c0_6, %c0_7] : memref<24x128xf32, #tpu.memory_space<vmem>>, vector<24x128xf32>
    tpu.vector_store %arg3[%c0_6, %c0_7], %7 {strides = array<i32>} : memref<24x128xf32, #tpu.memory_space<vmem>>, vector<24x128xf32>,
    return
  }
}

module attributes {stable_mosaic.version = 11 : i64} {
  func.func @_trunk_kernel(%arg0: memref<8x640xf32, #tpu.memory_space<vmem>>, %arg1: memref<8x128xf32, #tpu.memory_space<vmem>>, %arg2: memref<8x128xf32, #tpu.memory_space<vmem>>, %arg3: memref<8x128xf32, #tpu.memory_space<vmem>>, %arg4: memref<640x128xf32, #tpu.memory_space<vmem>>, %arg5: memref<15x128x128xf32, #tpu.memory_space<vmem>>, %arg6: memref<18x1x128xf32, #tpu.memory_space<vmem>>, %arg7: memref<3x128x256xf32, #tpu.memory_space<vmem>>, %arg8: memref<1x256xf32, #tpu.memory_space<vmem>>, %arg9: memref<256x128xf32, #tpu.memory_space<vmem>>, %arg10: memref<128x512xf32, #tpu.memory_space<vmem>>, %arg11: memref<1x512xf32, #tpu.memory_space<vmem>>, %arg12: memref<512x128xf32, #tpu.memory_space<vmem>>, %arg13: memref<3x128x384xf32, #tpu.memory_space<vmem>>, %arg14: memref<2x1x384xf32, #tpu.memory_space<vmem>>, %arg15: memref<8x128xf32, #tpu.memory_space<vmem>>, %arg16: memref<8x128xf32, #tpu.memory_space<vmem>>, %arg17: memref<8x128xf32, #tpu.memory_space<vmem>>) attributes {dimension_semantics = [], scalar_prefetch = 0 : i64, scratch_operands = 0 : i64, tpu.core_type = #tpu.core_type<tc>} {
    %c0 = arith.constant 0 : index
    %c0_0 = arith.constant 0 : index
    %0 = vector.load %arg0[%c0, %c0_0] : memref<8x640xf32, #tpu.memory_space<vmem>>, vector<8x640xf32>
    %c0_1 = arith.constant 0 : index
    %c0_2 = arith.constant 0 : index
    %1 = vector.load %arg4[%c0_1, %c0_2] : memref<640x128xf32, #tpu.memory_space<vmem>>, vector<640x128xf32>
    %cst = arith.constant dense<0.000000e+00> : vector<8x128xf32>
    %2 = tpu.matmul %0, %1, %cst {dimension_numbers = #tpu.dot_dimension_numbers<[1], [0], [0], [1], [0, 0, 1, 1], [], []>} : vector<8x640xf32>, vector<640x128xf32>, vector<8x128xf32> -> vector<8x128xf32>
    %c15 = arith.constant 15 : index
    %c0_3 = arith.constant 0 : index
    %c0_4 = arith.constant 0 : index
    %3 = vector.load %arg6[%c15, %c0_3, %c0_4] : memref<18x1x128xf32, #tpu.memory_space<vmem>>, vector<1x1x128xf32>
    %4 = vector.shape_cast %3 : vector<1x1x128xf32> to vector<1x128xf32>
    %5 = vector.broadcast %4 : vector<1x128xf32> to vector<8x128xf32>
    %6 = arith.addf %2, %5 : vector<8x128xf32>
    %cst_5 = arith.constant 0.000000e+00 : f32
    %7 = vector.broadcast %cst_5 : f32 to vector<8x128xf32>
    %8 = arith.maximumf %6, %7 : vector<8x128xf32>
    %c13 = arith.constant 13 : index
    %c0_6 = arith.constant 0 : index
    %c0_7 = arith.constant 0 : index
    %9 = vector.load %arg5[%c13, %c0_6, %c0_7] : memref<15x128x128xf32, #tpu.memory_space<vmem>>, vector<1x128x128xf32>
    %10 = vector.shape_cast %9 : vector<1x128x128xf32> to vector<128x128xf32>
    %cst_8 = arith.constant dense<0.000000e+00> : vector<8x128xf32>
    %11 = tpu.matmul %8, %10, %cst_8 {dimension_numbers = #tpu.dot_dimension_numbers<[1], [0], [0], [1], [0, 0, 1, 1], [], []>} : vector<8x128xf32>, vector<128x128xf32>, vector<8x128xf32> -> vector<8x128xf32>
    %c16 = arith.constant 16 : index
    %c0_9 = arith.constant 0 : index
    %c0_10 = arith.constant 0 : index
    %12 = vector.load %arg6[%c16, %c0_9, %c0_10] : memref<18x1x128xf32, #tpu.memory_space<vmem>>, vector<1x1x128xf32>
    %13 = vector.shape_cast %12 : vector<1x1x128xf32> to vector<1x128xf32>
    %14 = vector.broadcast %13 : vector<1x128xf32> to vector<8x128xf32>
    %15 = arith.addf %11, %14 : vector<8x128xf32>
    %cst_11 = arith.constant 0.000000e+00 : f32
    %16 = vector.broadcast %cst_11 : f32 to vector<8x128xf32>
    %17 = arith.maximumf %15, %16 : vector<8x128xf32>
    %c14 = arith.constant 14 : index
    %c0_12 = arith.constant 0 : index
    %c0_13 = arith.constant 0 : index
    %18 = vector.load %arg5[%c14, %c0_12, %c0_13] : memref<15x128x128xf32, #tpu.memory_space<vmem>>, vector<1x128x128xf32>
    %19 = vector.shape_cast %18 : vector<1x128x128xf32> to vector<128x128xf32>
    %cst_14 = arith.constant dense<0.000000e+00> : vector<8x128xf32>
    %20 = tpu.matmul %17, %19, %cst_14 {dimension_numbers = #tpu.dot_dimension_numbers<[1], [0], [0], [1], [0, 0, 1, 1], [], []>} : vector<8x128xf32>, vector<128x128xf32>, vector<8x128xf32> -> vector<8x128xf32>
    %c17 = arith.constant 17 : index
    %c0_15 = arith.constant 0 : index
    %c0_16 = arith.constant 0 : index
    %21 = vector.load %arg6[%c17, %c0_15, %c0_16] : memref<18x1x128xf32, #tpu.memory_space<vmem>>, vector<1x1x128xf32>
    %22 = vector.shape_cast %21 : vector<1x1x128xf32> to vector<1x128xf32>
    %23 = vector.broadcast %22 : vector<1x128xf32> to vector<8x128xf32>
    %24 = arith.addf %20, %23 : vector<8x128xf32>
    %cst_17 = arith.constant 0.000000e+00 : f32
    %25 = vector.broadcast %cst_17 : f32 to vector<8x128xf32>
    %26 = arith.maximumf %24, %25 : vector<8x128xf32>
    %c0_18 = arith.constant 0 : index
    %c0_19 = arith.constant 0 : index
    %27 = vector.load %arg1[%c0_18, %c0_19] : memref<8x128xf32, #tpu.memory_space<vmem>>, vector<8x128xf32>
    %c0_20 = arith.constant 0 : index
    %c0_21 = arith.constant 0 : index
    %c0_22 = arith.constant 0 : index
    %28 = vector.load %arg5[%c0_20, %c0_21, %c0_22] : memref<15x128x128xf32, #tpu.memory_space<vmem>>, vector<1x128x128xf32>
    %29 = vector.shape_cast %28 : vector<1x128x128xf32> to vector<128x128xf32>
    %cst_23 = arith.constant dense<0.000000e+00> : vector<8x128xf32>
    %30 = tpu.matmul %27, %29, %cst_23 {dimension_numbers = #tpu.dot_dimension_numbers<[1], [0], [0], [1], [0, 0, 1, 1], [], []>} : vector<8x128xf32>, vector<128x128xf32>, vector<8x128xf32> -> vector<8x128xf32>
    %c0_24 = arith.constant 0 : index
    %c0_25 = arith.constant 0 : index
    %c0_26 = arith.constant 0 : index
    %31 = vector.load %arg6[%c0_24, %c0_25, %c0_26] : memref<18x1x128xf32, #tpu.memory_space<vmem>>, vector<1x1x128xf32>
    %32 = vector.shape_cast %31 : vector<1x1x128xf32> to vector<1x128xf32>
    %33 = vector.broadcast %32 : vector<1x128xf32> to vector<8x128xf32>
    %34 = arith.addf %30, %33 : vector<8x128xf32>
    %cst_27 = arith.constant 0.000000e+00 : f32
    %35 = vector.broadcast %cst_27 : f32 to vector<8x128xf32>
    %36 = arith.maximumf %34, %35 : vector<8x128xf32>
    %c1 = arith.constant 1 : index
    %c0_28 = arith.constant 0 : index
    %c0_29 = arith.constant 0 : index
    %37 = vector.load %arg5[%c1, %c0_28, %c0_29] : memref<15x128x128xf32, #tpu.memory_space<vmem>>, vector<1x128x128xf32>
    %38 = vector.shape_cast %37 : vector<1x128x128xf32> to vector<128x128xf32>
    %cst_30 = arith.constant dense<0.000000e+00> : vector<8x128xf32>
    %39 = tpu.matmul %36, %38, %cst_30 {dimension_numbers = #tpu.dot_dimension_numbers<[1], [0], [0], [1], [0, 0, 1, 1], [], []>} : vector<8x128xf32>, vector<128x128xf32>, vector<8x128xf32> -> vector<8x128xf32>
    %c1_31 = arith.constant 1 : index
    %c0_32 = arith.constant 0 : index
    %c0_33 = arith.constant 0 : index
    %40 = vector.load %arg6[%c1_31, %c0_32, %c0_33] : memref<18x1x128xf32, #tpu.memory_space<vmem>>, vector<1x1x128xf32>
    %41 = vector.shape_cast %40 : vector<1x1x128xf32> to vector<1x128xf32>
    %42 = vector.broadcast %41 : vector<1x128xf32> to vector<8x128xf32>
    %43 = arith.addf %39, %42 : vector<8x128xf32>
    %c5 = arith.constant 5 : index
    %c0_34 = arith.constant 0 : index
    %c0_35 = arith.constant 0 : index
    %44 = vector.load %arg6[%c5, %c0_34, %c0_35] : memref<18x1x128xf32, #tpu.memory_space<vmem>>, vector<1x1x128xf32>
    %45 = vector.shape_cast %44 : vector<1x1x128xf32> to vector<1x128xf32>
    %c6 = arith.constant 6 : index
    %c0_36 = arith.constant 0 : index
    %c0_37 = arith.constant 0 : index
    %46 = vector.load %arg6[%c6, %c0_36, %c0_37] : memref<18x1x128xf32, #tpu.memory_space<vmem>>, vector<1x1x128xf32>
    %47 = vector.shape_cast %46 : vector<1x1x128xf32> to vector<1x128xf32>
    %c2 = arith.constant 2 : index
    %c0_38 = arith.constant 0 : index
    %c0_39 = arith.constant 0 : index
    %48 = vector.load %arg5[%c2, %c0_38, %c0_39] : memref<15x128x128xf32, #tpu.memory_space<vmem>>, vector<1x128x128xf32>
    %49 = vector.shape_cast %48 : vector<1x128x128xf32> to vector<128x128xf32>
    %c2_40 = arith.constant 2 : index
    %c0_41 = arith.constant 0 : index
    %c0_42 = arith.constant 0 : index
    %50 = vector.load %arg6[%c2_40, %c0_41, %c0_42] : memref<18x1x128xf32, #tpu.memory_space<vmem>>, vector<1x1x128xf32>
    %51 = vector.shape_cast %50 : vector<1x1x128xf32> to vector<1x128xf32>
    %c3 = arith.constant 3 : index
    %c0_43 = arith.constant 0 : index
    %c0_44 = arith.constant 0 : index
    %52 = vector.load %arg5[%c3, %c0_43, %c0_44] : memref<15x128x128xf32, #tpu.memory_space<vmem>>, vector<1x128x128xf32>
    %53 = vector.shape_cast %52 : vector<1x128x128xf32> to vector<128x128xf32>
    %c3_45 = arith.constant 3 : index
    %c0_46 = arith.constant 0 : index
    %c0_47 = arith.constant 0 : index
    %54 = vector.load %arg6[%c3_45, %c0_46, %c0_47] : memref<18x1x128xf32, #tpu.memory_space<vmem>>, vector<1x1x128xf32>
    %55 = vector.shape_cast %54 : vector<1x1x128xf32> to vector<1x128xf32>
    %c0_48 = arith.constant 0 : index
    %c0_49 = arith.constant 0 : index
    %56 = vector.load %arg10[%c0_48, %c0_49] : memref<128x512xf32, #tpu.memory_space<vmem>>, vector<128x512xf32>
    %c0_50 = arith.constant 0 : index
    %c0_51 = arith.constant 0 : index
    %57 = vector.load %arg11[%c0_50, %c0_51] : memref<1x512xf32, #tpu.memory_space<vmem>>, vector<1x512xf32>
    %c0_52 = arith.constant 0 : index
    %c0_53 = arith.constant 0 : index
    %58 = vector.load %arg12[%c0_52, %c0_53] : memref<512x128xf32, #tpu.memory_space<vmem>>, vector<512x128xf32>
    %c4 = arith.constant 4 : index
    %c0_54 = arith.constant 0 : index
    %c0_55 = arith.constant 0 : index
    %59 = vector.load %arg6[%c4, %c0_54, %c0_55] : memref<18x1x128xf32, #tpu.memory_space<vmem>>, vector<1x1x128xf32>
    %60 = vector.shape_cast %59 : vector<1x1x128xf32> to vector<1x128xf32>
    %61 = tpu.concatenate %43, %26 in 0 : vector<8x128xf32>, vector<8x128xf32> -> vector<16x128xf32>
    %cst_56 = arith.constant dense<0.000000e+00> : vector<16x128xf32>
    %62 = tpu.matmul %61, %49, %cst_56 {dimension_numbers = #tpu.dot_dimension_numbers<[1], [0], [0], [1], [0, 0, 1, 1], [], []>} : vector<16x128xf32>, vector<128x128xf32>, vector<16x128xf32> -> vector<16x128xf32>
    %63 = vector.broadcast %51 : vector<1x128xf32> to vector<16x128xf32>
    %64 = arith.addf %62, %63 : vector<16x128xf32>
    %cst_57 = arith.constant dense<0.000000e+00> : vector<16x128xf32>
    %65 = tpu.matmul %64, %53, %cst_57 {dimension_numbers = #tpu.dot_dimension_numbers<[1], [0], [0], [1], [0, 0, 1, 1], [], []>} : vector<16x128xf32>, vector<128x128xf32>, vector<16x128xf32> -> vector<16x128xf32>
    %66 = vector.broadcast %55 : vector<1x128xf32> to vector<16x128xf32>
    %67 = arith.addf %65, %66 : vector<16x128xf32>
    %68 = vector.broadcast %45 : vector<1x128xf32> to vector<16x128xf32>
    %69 = arith.mulf %68, %61 : vector<16x128xf32>
    %70 = arith.addf %67, %69 : vector<16x128xf32>
    %cst_58 = arith.constant dense<0.000000e+00> : vector<16x512xf32>
    %71 = tpu.matmul %70, %56, %cst_58 {dimension_numbers = #tpu.dot_dimension_numbers<[1], [0], [0], [1], [0, 0, 1, 1], [], []>} : vector<16x128xf32>, vector<128x512xf32>, vector<16x512xf32> -> vector<16x512xf32>
    %72 = vector.broadcast %57 : vector<1x512xf32> to vector<16x512xf32>
    %73 = arith.addf %71, %72 : vector<16x512xf32>
    %cst_59 = arith.constant 0.000000e+00 : f32
    %74 = vector.broadcast %cst_59 : f32 to vector<16x512xf32>
    %75 = arith.maximumf %73, %74 : vector<16x512xf32>
    %cst_60 = arith.constant dense<0.000000e+00> : vector<16x128xf32>
    %76 = tpu.matmul %75, %58, %cst_60 {dimension_numbers = #tpu.dot_dimension_numbers<[1], [0], [0], [1], [0, 0, 1, 1], [], []>} : vector<16x512xf32>, vector<512x128xf32>, vector<16x128xf32> -> vector<16x128xf32>
    %77 = vector.broadcast %60 : vector<1x128xf32> to vector<16x128xf32>
    %78 = arith.addf %76, %77 : vector<16x128xf32>
    %79 = vector.broadcast %47 : vector<1x128xf32> to vector<16x128xf32>
    %80 = arith.mulf %79, %70 : vector<16x128xf32>
    %81 = arith.addf %80, %78 : vector<16x128xf32>
    %cst_61 = arith.constant dense<0.000000e+00> : vector<16x128xf32>
    %82 = tpu.matmul %81, %49, %cst_61 {dimension_numbers = #tpu.dot_dimension_numbers<[1], [0], [0], [1], [0, 0, 1, 1], [], []>} : vector<16x128xf32>, vector<128x128xf32>, vector<16x128xf32> -> vector<16x128xf32>
    %83 = vector.broadcast %51 : vector<1x128xf32> to vector<16x128xf32>
    %84 = arith.addf %82, %83 : vector<16x128xf32>
    %cst_62 = arith.constant dense<0.000000e+00> : vector<16x128xf32>
    %85 = tpu.matmul %84, %53, %cst_62 {dimension_numbers = #tpu.dot_dimension_numbers<[1], [0], [0], [1], [0, 0, 1, 1], [], []>} : vector<16x128xf32>, vector<128x128xf32>, vector<16x128xf32> -> vector<16x128xf32>
    %86 = vector.broadcast %55 : vector<1x128xf32> to vector<16x128xf32>
    %87 = arith.addf %85, %86 : vector<16x128xf32>
    %88 = vector.broadcast %45 : vector<1x128xf32> to vector<16x128xf32>
    %89 = arith.mulf %88, %81 : vector<16x128xf32>
    %90 = arith.addf %87, %89 : vector<16x128xf32>
    %cst_63 = arith.constant dense<0.000000e+00> : vector<16x512xf32>
    %91 = tpu.matmul %90, %56, %cst_63 {dimension_numbers = #tpu.dot_dimension_numbers<[1], [0], [0], [1], [0, 0, 1, 1], [], []>} : vector<16x128xf32>, vector<128x512xf32>, vector<16x512xf32> -> vector<16x512xf32>
    %92 = vector.broadcast %57 : vector<1x512xf32> to vector<16x512xf32>
    %93 = arith.addf %91, %92 : vector<16x512xf32>
    %cst_64 = arith.constant 0.000000e+00 : f32
    %94 = vector.broadcast %cst_64 : f32 to vector<16x512xf32>
    %95 = arith.maximumf %93, %94 : vector<16x512xf32>
    %cst_65 = arith.constant dense<0.000000e+00> : vector<16x128xf32>
    %96 = tpu.matmul %95, %58, %cst_65 {dimension_numbers = #tpu.dot_dimension_numbers<[1], [0], [0], [1], [0, 0, 1, 1], [], []>} : vector<16x512xf32>, vector<512x128xf32>, vector<16x128xf32> -> vector<16x128xf32>
    %97 = vector.broadcast %60 : vector<1x128xf32> to vector<16x128xf32>
    %98 = arith.addf %96, %97 : vector<16x128xf32>
    %99 = vector.broadcast %47 : vector<1x128xf32> to vector<16x128xf32>
    %100 = arith.mulf %99, %90 : vector<16x128xf32>
    %101 = arith.addf %100, %98 : vector<16x128xf32>
    %cst_66 = arith.constant dense<0.000000e+00> : vector<16x128xf32>
    %102 = tpu.matmul %101, %49, %cst_66 {dimension_numbers = #tpu.dot_dimension_numbers<[1], [0], [0], [1], [0, 0, 1, 1], [], []>} : vector<16x128xf32>, vector<128x128xf32>, vector<16x128xf32> -> vector<16x128xf32>
    %103 = vector.broadcast %51 : vector<1x128xf32> to vector<16x128xf32>
    %104 = arith.addf %102, %103 : vector<16x128xf32>
    %cst_67 = arith.constant dense<0.000000e+00> : vector<16x128xf32>
    %105 = tpu.matmul %104, %53, %cst_67 {dimension_numbers = #tpu.dot_dimension_numbers<[1], [0], [0], [1], [0, 0, 1, 1], [], []>} : vector<16x128xf32>, vector<128x128xf32>, vector<16x128xf32> -> vector<16x128xf32>
    %106 = vector.broadcast %55 : vector<1x128xf32> to vector<16x128xf32>
    %107 = arith.addf %105, %106 : vector<16x128xf32>
    %108 = vector.broadcast %45 : vector<1x128xf32> to vector<16x128xf32>
    %109 = arith.mulf %108, %101 : vector<16x128xf32>
    %110 = arith.addf %107, %109 : vector<16x128xf32>
    %cst_68 = arith.constant dense<0.000000e+00> : vector<16x512xf32>
    %111 = tpu.matmul %110, %56, %cst_68 {dimension_numbers = #tpu.dot_dimension_numbers<[1], [0], [0], [1], [0, 0, 1, 1], [], []>} : vector<16x128xf32>, vector<128x512xf32>, vector<16x512xf32> -> vector<16x512xf32>
    %112 = vector.broadcast %57 : vector<1x512xf32> to vector<16x512xf32>
    %113 = arith.addf %111, %112 : vector<16x512xf32>
    %cst_69 = arith.constant 0.000000e+00 : f32
    %114 = vector.broadcast %cst_69 : f32 to vector<16x512xf32>
    %115 = arith.maximumf %113, %114 : vector<16x512xf32>
    %cst_70 = arith.constant dense<0.000000e+00> : vector<16x128xf32>
    %116 = tpu.matmul %115, %58, %cst_70 {dimension_numbers = #tpu.dot_dimension_numbers<[1], [0], [0], [1], [0, 0, 1, 1], [], []>} : vector<16x512xf32>, vector<512x128xf32>, vector<16x128xf32> -> vector<16x128xf32>
    %117 = vector.broadcast %60 : vector<1x128xf32> to vector<16x128xf32>
    %118 = arith.addf %116, %117 : vector<16x128xf32>
    %119 = vector.broadcast %47 : vector<1x128xf32> to vector<16x128xf32>
    %120 = arith.mulf %119, %110 : vector<16x128xf32>
    %121 = arith.addf %120, %118 : vector<16x128xf32>
    %122 = vector.extract_strided_slice %121 {offsets = [0, 0], sizes = [8, 128], strides = [1, 1]} : vector<16x128xf32> to vector<8x128xf32>
    %123 = vector.extract_strided_slice %121 {offsets = [8, 0], sizes = [8, 128], strides = [1, 1]} : vector<16x128xf32> to vector<8x128xf32>
    %c4_71 = arith.constant 4 : index
    %c0_72 = arith.constant 0 : index
    %c0_73 = arith.constant 0 : index
    %124 = vector.load %arg5[%c4_71, %c0_72, %c0_73] : memref<15x128x128xf32, #tpu.memory_space<vmem>>, vector<1x128x128xf32>
    %125 = vector.shape_cast %124 : vector<1x128x128xf32> to vector<128x128xf32>
    %cst_74 = arith.constant dense<0.000000e+00> : vector<8x128xf32>
    %126 = tpu.matmul %123, %125, %cst_74 {dimension_numbers = #tpu.dot_dimension_numbers<[1], [0], [0], [1], [0, 0, 1, 1], [], []>} : vector<8x128xf32>, vector<128x128xf32>, vector<8x128xf32> -> vector<8x128xf32>
    %c5_75 = arith.constant 5 : index
    %c0_76 = arith.constant 0 : index
    %c0_77 = arith.constant 0 : index
    %127 = vector.load %arg5[%c5_75, %c0_76, %c0_77] : memref<15x128x128xf32, #tpu.memory_space<vmem>>, vector<1x128x128xf32>
    %128 = vector.shape_cast %127 : vector<1x128x128xf32> to vector<128x128xf32>
    %cst_78 = arith.constant dense<0.000000e+00> : vector<8x128xf32>
    %129 = tpu.matmul %122, %128, %cst_78 {dimension_numbers = #tpu.dot_dimension_numbers<[1], [0], [0], [1], [0, 0, 1, 1], [], []>} : vector<8x128xf32>, vector<128x128xf32>, vector<8x128xf32> -> vector<8x128xf32>
    %130 = arith.addf %126, %129 : vector<8x128xf32>
    %c7 = arith.constant 7 : index
    %c0_79 = arith.constant 0 : index
    %c0_80 = arith.constant 0 : index
    %131 = vector.load %arg6[%c7, %c0_79, %c0_80] : memref<18x1x128xf32, #tpu.memory_space<vmem>>, vector<1x1x128xf32>
    %132 = vector.shape_cast %131 : vector<1x1x128xf32> to vector<1x128xf32>
    %133 = vector.broadcast %132 : vector<1x128xf32> to vector<8x128xf32>
    %134 = arith.addf %130, %133 : vector<8x128xf32>
    %c0_81 = arith.constant 0 : index
    %c0_82 = arith.constant 0 : index
    %c0_83 = arith.constant 0 : index
    %135 = vector.load %arg7[%c0_81, %c0_82, %c0_83] : memref<3x128x256xf32, #tpu.memory_space<vmem>>, vector<1x128x256xf32>
    %136 = vector.shape_cast %135 : vector<1x128x256xf32> to vector<128x256xf32>
    %cst_84 = arith.constant dense<0.000000e+00> : vector<8x256xf32>
    %137 = tpu.matmul %134, %136, %cst_84 {dimension_numbers = #tpu.dot_dimension_numbers<[1], [0], [0], [1], [0, 0, 1, 1], [], []>} : vector<8x128xf32>, vector<128x256xf32>, vector<8x256xf32> -> vector<8x256xf32>
    %c1_85 = arith.constant 1 : index
    %c0_86 = arith.constant 0 : index
    %c0_87 = arith.constant 0 : index
    %138 = vector.load %arg7[%c1_85, %c0_86, %c0_87] : memref<3x128x256xf32, #tpu.memory_space<vmem>>, vector<1x128x256xf32>
    %139 = vector.shape_cast %138 : vector<1x128x256xf32> to vector<128x256xf32>
    %cst_88 = arith.constant dense<0.000000e+00> : vector<8x256xf32>
    %140 = tpu.matmul %123, %139, %cst_88 {dimension_numbers = #tpu.dot_dimension_numbers<[1], [0], [0], [1], [0, 0, 1, 1], [], []>} : vector<8x128xf32>, vector<128x256xf32>, vector<8x256xf32> -> vector<8x256xf32>
    %141 = arith.addf %137, %140 : vector<8x256xf32>
    %c2_89 = arith.constant 2 : index
    %c0_90 = arith.constant 0 : index
    %c0_91 = arith.constant 0 : index
    %142 = vector.load %arg7[%c2_89, %c0_90, %c0_91] : memref<3x128x256xf32, #tpu.memory_space<vmem>>, vector<1x128x256xf32>
    %143 = vector.shape_cast %142 : vector<1x128x256xf32> to vector<128x256xf32>
    %cst_92 = arith.constant dense<0.000000e+00> : vector<8x256xf32>
    %144 = tpu.matmul %122, %143, %cst_92 {dimension_numbers = #tpu.dot_dimension_numbers<[1], [0], [0], [1], [0, 0, 1, 1], [], []>} : vector<8x128xf32>, vector<128x256xf32>, vector<8x256xf32> -> vector<8x256xf32>
    %145 = arith.addf %141, %144 : vector<8x256xf32>
    %c0_93 = arith.constant 0 : index
    %c0_94 = arith.constant 0 : index
    %146 = vector.load %arg8[%c0_93, %c0_94] : memref<1x256xf32, #tpu.memory_space<vmem>>, vector<1x256xf32>
    %147 = vector.broadcast %146 : vector<1x256xf32> to vector<8x256xf32>
    %148 = arith.addf %145, %147 : vector<8x256xf32>
    %cst_95 = arith.constant 0.000000e+00 : f32
    %149 = vector.broadcast %cst_95 : f32 to vector<8x256xf32>
    %150 = arith.maximumf %148, %149 : vector<8x256xf32>
    %c0_96 = arith.constant 0 : index
    %c0_97 = arith.constant 0 : index
    %151 = vector.load %arg9[%c0_96, %c0_97] : memref<256x128xf32, #tpu.memory_space<vmem>>, vector<256x128xf32>
    %cst_98 = arith.constant dense<0.000000e+00> : vector<8x128xf32>
    %152 = tpu.matmul %150, %151, %cst_98 {dimension_numbers = #tpu.dot_dimension_numbers<[1], [0], [0], [1], [0, 0, 1, 1], [], []>} : vector<8x256xf32>, vector<256x128xf32>, vector<8x128xf32> -> vector<8x128xf32>
    %c8 = arith.constant 8 : index
    %c0_99 = arith.constant 0 : index
    %c0_100 = arith.constant 0 : index
    %153 = vector.load %arg6[%c8, %c0_99, %c0_100] : memref<18x1x128xf32, #tpu.memory_space<vmem>>, vector<1x1x128xf32>
    %154 = vector.shape_cast %153 : vector<1x1x128xf32> to vector<1x128xf32>
    %155 = vector.broadcast %154 : vector<1x128xf32> to vector<8x128xf32>
    %156 = arith.addf %152, %155 : vector<8x128xf32>
    %c6_101 = arith.constant 6 : index
    %c0_102 = arith.constant 0 : index
    %c0_103 = arith.constant 0 : index
    %157 = vector.load %arg5[%c6_101, %c0_102, %c0_103] : memref<15x128x128xf32, #tpu.memory_space<vmem>>, vector<1x128x128xf32>
    %158 = vector.shape_cast %157 : vector<1x128x128xf32> to vector<128x128xf32>
    %cst_104 = arith.constant dense<0.000000e+00> : vector<8x128xf32>
    %159 = tpu.matmul %123, %158, %cst_104 {dimension_numbers = #tpu.dot_dimension_numbers<[1], [0], [0], [1], [0, 0, 1, 1], [], []>} : vector<8x128xf32>, vector<128x128xf32>, vector<8x128xf32> -> vector<8x128xf32>
    %c7_105 = arith.constant 7 : index
    %c0_106 = arith.constant 0 : index
    %c0_107 = arith.constant 0 : index
    %160 = vector.load %arg5[%c7_105, %c0_106, %c0_107] : memref<15x128x128xf32, #tpu.memory_space<vmem>>, vector<1x128x128xf32>
    %161 = vector.shape_cast %160 : vector<1x128x128xf32> to vector<128x128xf32>
    %cst_108 = arith.constant dense<0.000000e+00> : vector<8x128xf32>
    %162 = tpu.matmul %122, %161, %cst_108 {dimension_numbers = #tpu.dot_dimension_numbers<[1], [0], [0], [1], [0, 0, 1, 1], [], []>} : vector<8x128xf32>, vector<128x128xf32>, vector<8x128xf32> -> vector<8x128xf32>
    %163 = arith.addf %159, %162 : vector<8x128xf32>
    %c9 = arith.constant 9 : index
    %c0_109 = arith.constant 0 : index
    %c0_110 = arith.constant 0 : index
    %164 = vector.load %arg6[%c9, %c0_109, %c0_110] : memref<18x1x128xf32, #tpu.memory_space<vmem>>, vector<1x1x128xf32>
    %165 = vector.shape_cast %164 : vector<1x1x128xf32> to vector<1x128xf32>
    %166 = vector.broadcast %165 : vector<1x128xf32> to vector<8x128xf32>
    %167 = arith.addf %163, %166 : vector<8x128xf32>
    %168 = arith.addf %156, %167 : vector<8x128xf32>
    %cst_111 = arith.constant 0.000000e+00 : f32
    %169 = vector.broadcast %cst_111 : f32 to vector<8x128xf32>
    %170 = arith.maximumf %168, %169 : vector<8x128xf32>
    %c0_112 = arith.constant 0 : index
    %c0_113 = arith.constant 0 : index
    %171 = vector.load %arg3[%c0_112, %c0_113] : memref<8x128xf32, #tpu.memory_space<vmem>>, vector<8x128xf32>
    %c0_114 = arith.constant 0 : index
    %c0_115 = arith.constant 0 : index
    %c0_116 = arith.constant 0 : index
    %172 = vector.load %arg13[%c0_114, %c0_115, %c0_116] : memref<3x128x384xf32, #tpu.memory_space<vmem>>, vector<1x128x384xf32>
    %173 = vector.shape_cast %172 : vector<1x128x384xf32> to vector<128x384xf32>
    %cst_117 = arith.constant dense<0.000000e+00> : vector<8x384xf32>
    %174 = tpu.matmul %170, %173, %cst_117 {dimension_numbers = #tpu.dot_dimension_numbers<[1], [0], [0], [1], [0, 0, 1, 1], [], []>} : vector<8x128xf32>, vector<128x384xf32>, vector<8x384xf32> -> vector<8x384xf32>
    %c0_118 = arith.constant 0 : index
    %c0_119 = arith.constant 0 : index
    %175 = vector.load %arg2[%c0_118, %c0_119] : memref<8x128xf32, #tpu.memory_space<vmem>>, vector<8x128xf32>
    %c1_120 = arith.constant 1 : index
    %c0_121 = arith.constant 0 : index
    %c0_122 = arith.constant 0 : index
    %176 = vector.load %arg13[%c1_120, %c0_121, %c0_122] : memref<3x128x384xf32, #tpu.memory_space<vmem>>, vector<1x128x384xf32>
    %177 = vector.shape_cast %176 : vector<1x128x384xf32> to vector<128x384xf32>
    %cst_123 = arith.constant dense<0.000000e+00> : vector<8x384xf32>
    %178 = tpu.matmul %175, %177, %cst_123 {dimension_numbers = #tpu.dot_dimension_numbers<[1], [0], [0], [1], [0, 0, 1, 1], [], []>} : vector<8x128xf32>, vector<128x384xf32>, vector<8x384xf32> -> vector<8x384xf32>
    %179 = arith.addf %174, %178 : vector<8x384xf32>
    %c0_124 = arith.constant 0 : index
    %c0_125 = arith.constant 0 : index
    %c0_126 = arith.constant 0 : index
    %180 = vector.load %arg14[%c0_124, %c0_125, %c0_126] : memref<2x1x384xf32, #tpu.memory_space<vmem>>, vector<1x1x384xf32>
    %181 = vector.shape_cast %180 : vector<1x1x384xf32> to vector<1x384xf32>
    %182 = vector.broadcast %181 : vector<1x384xf32> to vector<8x384xf32>
    %183 = arith.addf %179, %182 : vector<8x384xf32>
    %c2_127 = arith.constant 2 : index
    %c0_128 = arith.constant 0 : index
    %c0_129 = arith.constant 0 : index
    %184 = vector.load %arg13[%c2_127, %c0_128, %c0_129] : memref<3x128x384xf32, #tpu.memory_space<vmem>>, vector<1x128x384xf32>
    %185 = vector.shape_cast %184 : vector<1x128x384xf32> to vector<128x384xf32>
    %cst_130 = arith.constant dense<0.000000e+00> : vector<8x384xf32>
    %186 = tpu.matmul %171, %185, %cst_130 {dimension_numbers = #tpu.dot_dimension_numbers<[1], [0], [0], [1], [0, 0, 1, 1], [], []>} : vector<8x128xf32>, vector<128x384xf32>, vector<8x384xf32> -> vector<8x384xf32>
    %c1_131 = arith.constant 1 : index
    %c0_132 = arith.constant 0 : index
    %c0_133 = arith.constant 0 : index
    %187 = vector.load %arg14[%c1_131, %c0_132, %c0_133] : memref<2x1x384xf32, #tpu.memory_space<vmem>>, vector<1x1x384xf32>
    %188 = vector.shape_cast %187 : vector<1x1x384xf32> to vector<1x384xf32>
    %189 = vector.broadcast %188 : vector<1x384xf32> to vector<8x384xf32>
    %190 = arith.addf %186, %189 : vector<8x384xf32>
    %191 = vector.extract_strided_slice %183 {offsets = [0, 0], sizes = [8, 128], strides = [1, 1]} : vector<8x384xf32> to vector<8x128xf32>
    %192 = vector.extract_strided_slice %190 {offsets = [0, 0], sizes = [8, 128], strides = [1, 1]} : vector<8x384xf32> to vector<8x128xf32>
    %193 = arith.addf %191, %192 : vector<8x128xf32>
    %cst_134 = arith.constant 0.000000e+00 : f32
    %194 = vector.broadcast %cst_134 : f32 to vector<8x128xf32>
    %195 = arith.subf %194, %193 : vector<8x128xf32>
    %196 = math.exp %195 : vector<8x128xf32>
    %cst_135 = arith.constant 1.000000e+00 : f32
    %197 = vector.broadcast %cst_135 : f32 to vector<8x128xf32>
    %198 = arith.addf %197, %196 : vector<8x128xf32>
    %cst_136 = arith.constant 1.000000e+00 : f32
    %199 = vector.broadcast %cst_136 : f32 to vector<8x128xf32>
    %200 = arith.divf %199, %198 : vector<8x128xf32>
    %201 = vector.extract_strided_slice %183 {offsets = [0, 128], sizes = [8, 128], strides = [1, 1]} : vector<8x384xf32> to vector<8x128xf32>
    %202 = vector.extract_strided_slice %190 {offsets = [0, 128], sizes = [8, 128], strides = [1, 1]} : vector<8x384xf32> to vector<8x128xf32>
    %203 = arith.addf %201, %202 : vector<8x128xf32>
    %cst_137 = arith.constant 0.000000e+00 : f32
    %204 = vector.broadcast %cst_137 : f32 to vector<8x128xf32>
    %205 = arith.subf %204, %203 : vector<8x128xf32>
    %206 = math.exp %205 : vector<8x128xf32>
    %cst_138 = arith.constant 1.000000e+00 : f32
    %207 = vector.broadcast %cst_138 : f32 to vector<8x128xf32>
    %208 = arith.addf %207, %206 : vector<8x128xf32>
    %cst_139 = arith.constant 1.000000e+00 : f32
    %209 = vector.broadcast %cst_139 : f32 to vector<8x128xf32>
    %210 = arith.divf %209, %208 : vector<8x128xf32>
    %211 = vector.extract_strided_slice %183 {offsets = [0, 256], sizes = [8, 128], strides = [1, 1]} : vector<8x384xf32> to vector<8x128xf32>
    %212 = vector.extract_strided_slice %190 {offsets = [0, 256], sizes = [8, 128], strides = [1, 1]} : vector<8x384xf32> to vector<8x128xf32>
    %213 = arith.mulf %200, %212 : vector<8x128xf32>
    %214 = arith.addf %211, %213 : vector<8x128xf32>
    %215 = math.tanh %214 : vector<8x128xf32>
    %cst_140 = arith.constant 1.000000e+00 : f32
    %216 = vector.broadcast %cst_140 : f32 to vector<8x128xf32>
    %217 = arith.subf %216, %210 : vector<8x128xf32>
    %218 = arith.mulf %217, %215 : vector<8x128xf32>
    %219 = arith.mulf %210, %171 : vector<8x128xf32>
    %220 = arith.addf %218, %219 : vector<8x128xf32>
    %c0_141 = arith.constant 0 : index
    %c0_142 = arith.constant 0 : index
    %221 = vector.load %arg17[%c0_141, %c0_142] : memref<8x128xf32, #tpu.memory_space<vmem>>, vector<8x128xf32>
    tpu.vector_store %arg17[%c0_141, %c0_142], %220 {strides = array<i32>} : memref<8x128xf32, #tpu.memory_space<vmem>>, vector<8x128xf32>,
    %c8_143 = arith.constant 8 : index
    %c0_144 = arith.constant 0 : index
    %c0_145 = arith.constant 0 : index
    %222 = vector.load %arg5[%c8_143, %c0_144, %c0_145] : memref<15x128x128xf32, #tpu.memory_space<vmem>>, vector<1x128x128xf32>
    %223 = vector.shape_cast %222 : vector<1x128x128xf32> to vector<128x128xf32>
    %cst_146 = arith.constant dense<0.000000e+00> : vector<8x128xf32>
    %224 = tpu.matmul %220, %223, %cst_146 {dimension_numbers = #tpu.dot_dimension_numbers<[1], [0], [0], [1], [0, 0, 1, 1], [], []>} : vector<8x128xf32>, vector<128x128xf32>, vector<8x128xf32> -> vector<8x128xf32>
    %c10 = arith.constant 10 : index
    %c0_147 = arith.constant 0 : index
    %c0_148 = arith.constant 0 : index
    %225 = vector.load %arg6[%c10, %c0_147, %c0_148] : memref<18x1x128xf32, #tpu.memory_space<vmem>>, vector<1x1x128xf32>
    %226 = vector.shape_cast %225 : vector<1x1x128xf32> to vector<1x128xf32>
    %227 = vector.broadcast %226 : vector<1x128xf32> to vector<8x128xf32>
    %228 = arith.addf %224, %227 : vector<8x128xf32>
    %cst_149 = arith.constant 0.000000e+00 : f32
    %229 = vector.broadcast %cst_149 : f32 to vector<8x128xf32>
    %230 = arith.maximumf %228, %229 : vector<8x128xf32>
    %c9_150 = arith.constant 9 : index
    %c0_151 = arith.constant 0 : index
    %c0_152 = arith.constant 0 : index
    %231 = vector.load %arg5[%c9_150, %c0_151, %c0_152] : memref<15x128x128xf32, #tpu.memory_space<vmem>>, vector<1x128x128xf32>
    %232 = vector.shape_cast %231 : vector<1x128x128xf32> to vector<128x128xf32>
    %cst_153 = arith.constant dense<0.000000e+00> : vector<8x128xf32>
    %233 = tpu.matmul %230, %232, %cst_153 {dimension_numbers = #tpu.dot_dimension_numbers<[1], [0], [0], [1], [0, 0, 1, 1], [], []>} : vector<8x128xf32>, vector<128x128xf32>, vector<8x128xf32> -> vector<8x128xf32>
    %c11 = arith.constant 11 : index
    %c0_154 = arith.constant 0 : index
    %c0_155 = arith.constant 0 : index
    %234 = vector.load %arg6[%c11, %c0_154, %c0_155] : memref<18x1x128xf32, #tpu.memory_space<vmem>>, vector<1x1x128xf32>
    %235 = vector.shape_cast %234 : vector<1x1x128xf32> to vector<1x128xf32>
    %236 = vector.broadcast %235 : vector<1x128xf32> to vector<8x128xf32>
    %237 = arith.addf %233, %236 : vector<8x128xf32>
    %cst_156 = arith.constant 0.000000e+00 : f32
    %238 = vector.broadcast %cst_156 : f32 to vector<8x128xf32>
    %239 = arith.maximumf %237, %238 : vector<8x128xf32>
    %c10_157 = arith.constant 10 : index
    %c0_158 = arith.constant 0 : index
    %c0_159 = arith.constant 0 : index
    %240 = vector.load %arg5[%c10_157, %c0_158, %c0_159] : memref<15x128x128xf32, #tpu.memory_space<vmem>>, vector<1x128x128xf32>
    %241 = vector.shape_cast %240 : vector<1x128x128xf32> to vector<128x128xf32>
    %cst_160 = arith.constant dense<0.000000e+00> : vector<8x128xf32>
    %242 = tpu.matmul %239, %241, %cst_160 {dimension_numbers = #tpu.dot_dimension_numbers<[1], [0], [0], [1], [0, 0, 1, 1], [], []>} : vector<8x128xf32>, vector<128x128xf32>, vector<8x128xf32> -> vector<8x128xf32>
    %c12 = arith.constant 12 : index
    %c0_161 = arith.constant 0 : index
    %c0_162 = arith.constant 0 : index
    %243 = vector.load %arg6[%c12, %c0_161, %c0_162] : memref<18x1x128xf32, #tpu.memory_space<vmem>>, vector<1x1x128xf32>
    %244 = vector.shape_cast %243 : vector<1x1x128xf32> to vector<1x128xf32>
    %245 = vector.broadcast %244 : vector<1x128xf32> to vector<8x128xf32>
    %246 = arith.addf %242, %245 : vector<8x128xf32>
    %247 = math.tanh %246 : vector<8x128xf32>
    %c0_163 = arith.constant 0 : index
    %c0_164 = arith.constant 0 : index
    %248 = vector.load %arg15[%c0_163, %c0_164] : memref<8x128xf32, #tpu.memory_space<vmem>>, vector<8x128xf32>
    tpu.vector_store %arg15[%c0_163, %c0_164], %247 {strides = array<i32>} : memref<8x128xf32, #tpu.memory_space<vmem>>, vector<8x128xf32>,
    %c11_165 = arith.constant 11 : index
    %c0_166 = arith.constant 0 : index
    %c0_167 = arith.constant 0 : index
    %249 = vector.load %arg5[%c11_165, %c0_166, %c0_167] : memref<15x128x128xf32, #tpu.memory_space<vmem>>, vector<1x128x128xf32>
    %250 = vector.shape_cast %249 : vector<1x128x128xf32> to vector<128x128xf32>
    %cst_168 = arith.constant dense<0.000000e+00> : vector<8x128xf32>
    %251 = tpu.matmul %230, %250, %cst_168 {dimension_numbers = #tpu.dot_dimension_numbers<[1], [0], [0], [1], [0, 0, 1, 1], [], []>} : vector<8x128xf32>, vector<128x128xf32>, vector<8x128xf32> -> vector<8x128xf32>
    %c13_169 = arith.constant 13 : index
    %c0_170 = arith.constant 0 : index
    %c0_171 = arith.constant 0 : index
    %252 = vector.load %arg6[%c13_169, %c0_170, %c0_171] : memref<18x1x128xf32, #tpu.memory_space<vmem>>, vector<1x1x128xf32>
    %253 = vector.shape_cast %252 : vector<1x1x128xf32> to vector<1x128xf32>
    %254 = vector.broadcast %253 : vector<1x128xf32> to vector<8x128xf32>
    %255 = arith.addf %251, %254 : vector<8x128xf32>
    %cst_172 = arith.constant 0.000000e+00 : f32
    %256 = vector.broadcast %cst_172 : f32 to vector<8x128xf32>
    %257 = arith.maximumf %255, %256 : vector<8x128xf32>
    %c12_173 = arith.constant 12 : index
    %c0_174 = arith.constant 0 : index
    %c0_175 = arith.constant 0 : index
    %258 = vector.load %arg5[%c12_173, %c0_174, %c0_175] : memref<15x128x128xf32, #tpu.memory_space<vmem>>, vector<1x128x128xf32>
    %259 = vector.shape_cast %258 : vector<1x128x128xf32> to vector<128x128xf32>
    %cst_176 = arith.constant dense<0.000000e+00> : vector<8x128xf32>
    %260 = tpu.matmul %257, %259, %cst_176 {dimension_numbers = #tpu.dot_dimension_numbers<[1], [0], [0], [1], [0, 0, 1, 1], [], []>} : vector<8x128xf32>, vector<128x128xf32>, vector<8x128xf32> -> vector<8x128xf32>
    %c14_177 = arith.constant 14 : index
    %c0_178 = arith.constant 0 : index
    %c0_179 = arith.constant 0 : index
    %261 = vector.load %arg6[%c14_177, %c0_178, %c0_179] : memref<18x1x128xf32, #tpu.memory_space<vmem>>, vector<1x1x128xf32>
    %262 = vector.shape_cast %261 : vector<1x1x128xf32> to vector<1x128xf32>
    %263 = vector.broadcast %262 : vector<1x128xf32> to vector<8x128xf32>
    %264 = arith.addf %260, %263 : vector<8x128xf32>
    %c0_180 = arith.constant 0 : index
    %c0_181 = arith.constant 0 : index
    %265 = vector.load %arg16[%c0_180, %c0_181] : memref<8x128xf32, #tpu.memory_space<vmem>>, vector<8x128xf32>
    tpu.vector_store %arg16[%c0_180, %c0_181], %264 {strides = array<i32>} : memref<8x128xf32, #tpu.memory_space<vmem>>, vector<8x128xf32>,
    return
  }
}

</mosaic_0001>

<bundles_post_ra>
// kernel: forward.3
= control target key start
LH: loop header
LB: loop body
LE: loop exit
PB: predicated region body
PF: predicated region fallthrough
CT: control target
= control target key end

     0   :  { %s562_s1 = inlined_call_operand.vmem [shape: f32[256,128], index: 1, kind: input, shape index: {}]   ;;  %s563_s2 = inlined_call_operand.vmem [shape: f32[1,128], index: 2, kind: input, shape index: {}]   ;;  %s564_s0 = inlined_call_operand.vmem [shape: f32[128,256], index: 0, kind: input, shape index: {}]   ;;  %s565_s3 = inlined_call_operand.vmem [shape: f32[128,128], index: 3, kind: output, shape index: {}]  }
   0x1   :  { %v61_v0 = vld [vmem:[%s562_s1 + $0x78] sm:$0xff]  ;;  %v60_v1 = vld [vmem:[%s562_s1 + $0x70] sm:$0xff]  ;;  %v59_v4 = vld [vmem:[%s562_s1 + $0x68] sm:$0xff] }
   0x2   :  { %v77_v2 = vld [vmem:[%s562_s1 + $0xf8] sm:$0xff]  ;;  %248 = vmatpush.msra.mxu2 %v61_v0  ;;  %v76_v3 = vld [vmem:[%s562_s1 + $0xf0] sm:$0xff]  ;;  %82 = vmatpush.msra.mxu0 %v61_v0  ;;  %v75_v5 = vld [vmem:[%s562_s1 + $0xe8] sm:$0xff] }
   0x3   :  { %264 = vmatpush.msra.mxu3 %v77_v2  ;;  %147 = vmatpush.msra.mxu1 %v77_v2  ;;  %v58_v6 = vld [vmem:[%s562_s1 + $0x60] sm:$0xff]  ;;  %v57_v8 = vld [vmem:[%s562_s1 + $0x58] sm:$0xff]  ;;  %v56_v10 = vld [vmem:[%s562_s1 + $0x50] sm:$0xff] }
   0x4   :  { %249 = vmatpush.msra.mxu2 %v60_v1  ;;  %83 = vmatpush.msra.mxu0 %v60_v1  ;;  %v74_v7 = vld [vmem:[%s562_s1 + $0xe0] sm:$0xff]  ;;  %v73_v9 = vld [vmem:[%s562_s1 + $0xd8] sm:$0xff]  ;;  %v72_v11 = vld [vmem:[%s562_s1 + $0xd0] sm:$0xff] }
   0x5   :  { %265 = vmatpush.msra.mxu3 %v76_v3  ;;  %148 = vmatpush.msra.mxu1 %v76_v3  ;;  %v55_v12 = vld [vmem:[%s562_s1 + $0x48] sm:$0xff]  ;;  %v54_v14 = vld [vmem:[%s562_s1 + $0x40] sm:$0xff]  ;;  %v53_v16 = vld [vmem:[%s562_s1 + $0x38] sm:$0xff] }
   0x6   :  { %250 = vmatpush.msra.mxu2 %v59_v4  ;;  %84 = vmatpush.msra.mxu0 %v59_v4  ;;  %v71_v13 = vld [vmem:[%s562_s1 + $0xc8] sm:$0xff]  ;;  %v70_v15 = vld [vmem:[%s562_s1 + $0xc0] sm:$0xff]  ;;  %v69_v17 = vld [vmem:[%s562_s1 + $0xb8] sm:$0xff] }
   0x7   :  { %266 = vmatpush.msra.mxu3 %v75_v5  ;;  %149 = vmatpush.msra.mxu1 %v75_v5  ;;  %v52_v18 = vld [vmem:[%s562_s1 + $0x30] sm:$0xff]  ;;  %v51_v20 = vld [vmem:[%s562_s1 + $0x28] sm:$0xff]  ;;  %v50_v22 = vld [vmem:[%s562_s1 + $0x20] sm:$0xff] }
   0x8   :  { %251 = vmatpush.msra.mxu2 %v58_v6  ;;  %85 = vmatpush.msra.mxu0 %v58_v6  ;;  %v68_v19 = vld [vmem:[%s562_s1 + $0xb0] sm:$0xff]  ;;  %v67_v21 = vld [vmem:[%s562_s1 + $0xa8] sm:$0xff]  ;;  %v66_v23 = vld [vmem:[%s562_s1 + $0xa0] sm:$0xff] }
   0x9   :  { %267 = vmatpush.msra.mxu3 %v74_v7  ;;  %150 = vmatpush.msra.mxu1 %v74_v7  ;;  %v49_v24 = vld [vmem:[%s562_s1 + $0x18] sm:$0xff]  ;;  %v48_v26 = vld [vmem:[%s562_s1 + $0x10] sm:$0xff]  ;;  %v47_v28 = vld [vmem:[%s562_s1 + $0x8] sm:$0xff] }
   0xa   :  { %252 = vmatpush.msra.mxu2 %v57_v8  ;;  %86 = vmatpush.msra.mxu0 %v57_v8  ;;  %v65_v25 = vld [vmem:[%s562_s1 + $0x98] sm:$0xff]  ;;  %v64_v27 = vld [vmem:[%s562_s1 + $0x90] sm:$0xff]  ;;  %v63_v29 = vld [vmem:[%s562_s1 + $0x88] sm:$0xff] }
   0xb   :  { %268 = vmatpush.msra.mxu3 %v73_v9  ;;  %151 = vmatpush.msra.mxu1 %v73_v9  ;;  %v46_v30 = vld [vmem:[%s562_s1] sm:$0xff]  ;;  %v31_v33 = vld [vmem:[%s564_s0 + $0x88] sm:$0xff]  ;;  %v32_v36 = vld [vmem:[%s564_s0 + $0x90] sm:$0xff] }
   0xc   :  { %253 = vmatpush.msra.mxu2 %v56_v10  ;;  %87 = vmatpush.msra.mxu0 %v56_v10  ;;  %v62_v31 = vld [vmem:[%s562_s1 + $0x80] sm:$0xff]  ;;  %v15_v35 = vld [vmem:[%s564_s0 + $0x8] sm:$0xff]  ;;  %v33_v37 = vld [vmem:[%s564_s0 + $0x98] sm:$0xff] }
   0xd   :  { %269 = vmatpush.msra.mxu3 %v72_v11  ;;  %152 = vmatpush.msra.mxu1 %v72_v11  ;;  %v30_v32 = vld [vmem:[%s564_s0 + $0x80] sm:$0xff]  ;;  %v16_v38 = vld [vmem:[%s564_s0 + $0x10] sm:$0xff]  ;;  %v17_v39 = vld [vmem:[%s564_s0 + $0x18] sm:$0xff] }
   0xe   :  { %254 = vmatpush.msra.mxu2 %v55_v12  ;;  %88 = vmatpush.msra.mxu0 %v55_v12  ;;  %v14_v34 = vld [vmem:[%s564_s0] sm:$0xff]  ;;  %v35_v41 = vld [vmem:[%s564_s0 + $0xa8] sm:$0xff]  ;;  %v36_v44 = vld [vmem:[%s564_s0 + $0xb0] sm:$0xff] }
   0xf   :  { %270 = vmatpush.msra.mxu3 %v71_v13  ;;  %153 = vmatpush.msra.mxu1 %v71_v13  ;;  %v34_v40 = vld [vmem:[%s564_s0 + $0xa0] sm:$0xff]  ;;  %v19_v43 = vld [vmem:[%s564_s0 + $0x28] sm:$0xff]  ;;  %v37_v45 = vld [vmem:[%s564_s0 + $0xb8] sm:$0xff] }
  0x10   :  { %255 = vmatpush.msra.mxu2 %v54_v14  ;;  %89 = vmatpush.msra.mxu0 %v54_v14  ;;  %v18_v42 = vld [vmem:[%s564_s0 + $0x20] sm:$0xff]  ;;  %v20_v46 = vld [vmem:[%s564_s0 + $0x30] sm:$0xff]  ;;  %v21_v47 = vld [vmem:[%s564_s0 + $0x38] sm:$0xff] }
  0x11   :  { %271 = vmatpush.msra.mxu3 %v70_v15  ;;  %154 = vmatpush.msra.mxu1 %v70_v15  ;;  %v38_v48 = vld [vmem:[%s564_s0 + $0xc0] sm:$0xff]  ;;  %v39_v49 = vld [vmem:[%s564_s0 + $0xc8] sm:$0xff]  ;;  %v40_v52 = vld [vmem:[%s564_s0 + $0xd0] sm:$0xff] }
  0x12   :  { %256 = vmatpush.msra.mxu2 %v53_v16  ;;  %90 = vmatpush.msra.mxu0 %v53_v16  ;;  %v22_v50 = vld [vmem:[%s564_s0 + $0x40] sm:$0xff]  ;;  %v23_v51 = vld [vmem:[%s564_s0 + $0x48] sm:$0xff]  ;;  %v41_v53 = vld [vmem:[%s564_s0 + $0xd8] sm:$0xff] }
  0x13   :  { %272 = vmatpush.msra.mxu3 %v69_v17  ;;  %155 = vmatpush.msra.mxu1 %v69_v17  ;;  %v24_v54 = vld [vmem:[%s564_s0 + $0x50] sm:$0xff]  ;;  %v25_v55 = vld [vmem:[%s564_s0 + $0x58] sm:$0xff]  ;;  %v42_v56 = vld [vmem:[%s564_s0 + $0xe0] sm:$0xff] }
  0x14   :  { %257 = vmatpush.msra.mxu2 %v52_v18  ;;  %91 = vmatpush.msra.mxu0 %v52_v18  ;;  %v43_v57 = vld [vmem:[%s564_s0 + $0xe8] sm:$0xff]  ;;  %v26_v58 = vld [vmem:[%s564_s0 + $0x60] sm:$0xff]  ;;  %v44_v60 = vld [vmem:[%s564_s0 + $0xf0] sm:$0xff] }
  0x15   :  { %273 = vmatpush.msra.mxu3 %v68_v19  ;;  %156 = vmatpush.msra.mxu1 %v68_v19  ;;  %v27_v59 = vld [vmem:[%s564_s0 + $0x68] sm:$0xff]  ;;  %v45_v61 = vld [vmem:[%s564_s0 + $0xf8] sm:$0xff]  ;;  %v28_v62 = vld [vmem:[%s564_s0 + $0x70] sm:$0xff] }
  0x16   :  { %258 = vmatpush.msra.mxu2 %v51_v20  ;;  %92 = vmatpush.msra.mxu0 %v51_v20  ;;  %v29_v63 = vld [vmem:[%s564_s0 + $0x78] sm:$0xff]  ;;  %v496_v0 = vld [vmem:[%s563_s2] ss:$0 sm:$0xff] }
  0x17   :  { %274 = vmatpush.msra.mxu3 %v67_v21  ;;  %157 = vmatpush.msra.mxu1 %v67_v21 }
  0x18   :  { %259 = vmatpush.msra.mxu2 %v50_v22  ;;  %93 = vmatpush.msra.mxu0 %v50_v22 }
  0x19   :  { %275 = vmatpush.msra.mxu3 %v66_v23  ;;  %158 = vmatpush.msra.mxu1 %v66_v23 }
  0x1a   :  { %260 = vmatpush.msra.mxu2 %v49_v24  ;;  %94 = vmatpush.msra.mxu0 %v49_v24 }
  0x1b   :  { %276 = vmatpush.msra.mxu3 %v65_v25  ;;  %159 = vmatpush.msra.mxu1 %v65_v25 }
  0x1c   :  { %261 = vmatpush.msra.mxu2 %v48_v26  ;;  %95 = vmatpush.msra.mxu0 %v48_v26 }
  0x1d   :  { %277 = vmatpush.msra.mxu3 %v64_v27  ;;  %160 = vmatpush.msra.mxu1 %v64_v27 }
  0x1e   :  { %262 = vmatpush.msra.mxu2 %v47_v28  ;;  %96 = vmatpush.msra.mxu0 %v47_v28 }
  0x1f   :  { %278 = vmatpush.msra.mxu3 %v63_v29  ;;  %161 = vmatpush.msra.mxu1 %v63_v29 }
  0x20   :  { %263 = vmatpush.msra.mxu2 %v46_v30  ;;  %97 = vmatpush.msra.mxu0 %v46_v30 }
  0x21   :  { %279 = vmatpush.msra.mxu3 %v62_v31  ;;  %122 = vmatmul.f32.vlgmr.msra.gmra.mxu2 %v30_v32 }
  0x22   :  { %187 = vmatmul.f32.vlgmr.msra.gmra.mxu3 %v31_v33  ;;  %162 = vmatpush.msra.mxu1 %v62_v31 }
  0x23   :  { %98 = vmatmul.f32.vlgmr.msra.gmra.mxu0 %v14_v34  ;;  %163 = vmatmul.f32.vlgmr.msra.gmra.mxu1 %v15_v35 }
  0x29   :  { %125 = vmatmul.f32.gmra.mxu2 %v32_v36 }
  0x2a   :  { %190 = vmatmul.f32.gmra.mxu3 %v33_v37 }
  0x2b   :  { %101 = vmatmul.f32.gmra.mxu0 %v16_v38  ;;  %166 = vmatmul.f32.gmra.mxu1 %v17_v39 }
  0x31   :  { %128 = vmatmul.f32.gmra.mxu2 %v34_v40 }
  0x32   :  { %193 = vmatmul.f32.gmra.mxu3 %v35_v41 }
  0x33   :  { %104 = vmatmul.f32.gmra.mxu0 %v18_v42  ;;  %169 = vmatmul.f32.gmra.mxu1 %v19_v43 }
  0x39   :  { %131 = vmatmul.f32.gmra.mxu2 %v36_v44 }
  0x3a   :  { %196 = vmatmul.f32.gmra.mxu3 %v37_v45 }
  0x3b   :  { %107 = vmatmul.f32.gmra.mxu0 %v20_v46  ;;  %172 = vmatmul.f32.gmra.mxu1 %v21_v47 }
  0x41   :  { %134 = vmatmul.f32.gmra.mxu2 %v38_v48 }
  0x42   :  { %199 = vmatmul.f32.gmra.mxu3 %v39_v49 }
  0x43   :  { %110 = vmatmul.f32.gmra.mxu0 %v22_v50  ;;  %175 = vmatmul.f32.gmra.mxu1 %v23_v51 }
  0x49   :  { %137 = vmatmul.f32.gmra.mxu2 %v40_v52 }
  0x4a   :  { %202 = vmatmul.f32.gmra.mxu3 %v41_v53 }
  0x4b   :  { %113 = vmatmul.f32.gmra.mxu0 %v24_v54  ;;  %178 = vmatmul.f32.gmra.mxu1 %v25_v55 }
  0x51   :  { %140 = vmatmul.f32.gmra.mxu2 %v42_v56 }
  0x52   :  { %205 = vmatmul.f32.gmra.mxu3 %v43_v57 }
  0x53   :  { %116 = vmatmul.f32.gmra.mxu0 %v26_v58  ;;  %181 = vmatmul.f32.gmra.mxu1 %v27_v59 }
  0x59   :  { %143 = vmatmul.f32.gmra.mxu2 %v44_v60 }
  0x5a   :  { %208 = vmatmul.f32.gmra.mxu3 %v45_v61 }
  0x5b   :  { %119 = vmatmul.f32.gmra.mxu0 %v28_v62  ;;  %184 = vmatmul.f32.gmra.mxu1 %v29_v63 }
  0xa0   :  { %v99_v1 = vpop.f32.mrf.mxu0  ;;  %v164_v2 = vpop.f32.mrf.mxu1 }
  0xa1   :  { %v100_v3 = vadd.f32 %v496_v0, %v99_v1 }
  0xa3   :  { %v165_v4 = vadd.f32 %v164_v2, %v100_v3 }
  0xa4   :  { %v123_v5 = vpop.f32.mrf.mxu2 }
  0xa5   :  { %v188_v6 = vpop.f32.mrf.mxu3  ;;  %v124_v7 = vadd.f32 %v496_v0, %v123_v5  ;;  %v212_v8 = vmax.f32 %v165_v4, 0.0 }
  0xa7   :  { %228 = vst [vmem:[%s565_s3] sm:$0xff] %v212_v8  ;;  %v189_v9 = vadd.f32 %v188_v6, %v124_v7 }
  0xa8   :  { %v102_v10 = vpop.f32.mrf.mxu0  ;;  %v167_v11 = vpop.f32.mrf.mxu1 }
  0xa9   :  { %v220_v12 = vmax.f32 %v189_v9, 0.0  ;;  %v103_v13 = vadd.f32 %v496_v0, %v102_v10 }
  0xab   :  { %236 = vst [vmem:[%s565_s3 + $0x40] sm:$0xff] %v220_v12  ;;  %v168_v14 = vadd.f32 %v167_v11, %v103_v13 }
  0xac   :  { %v126_v15 = vpop.f32.mrf.mxu2 }
  0xad   :  { %v191_v16 = vpop.f32.mrf.mxu3  ;;  %v127_v17 = vadd.f32 %v496_v0, %v126_v15  ;;  %v213_v18 = vmax.f32 %v168_v14, 0.0 }
  0xaf   :  { %229 = vst [vmem:[%s565_s3 + $0x8] sm:$0xff] %v213_v18  ;;  %v192_v19 = vadd.f32 %v191_v16, %v127_v17 }
  0xb0   :  { %v105_v20 = vpop.f32.mrf.mxu0  ;;  %v170_v21 = vpop.f32.mrf.mxu1 }
  0xb1   :  { %v221_v22 = vmax.f32 %v192_v19, 0.0  ;;  %v106_v23 = vadd.f32 %v496_v0, %v105_v20 }
  0xb3   :  { %237 = vst [vmem:[%s565_s3 + $0x48] sm:$0xff] %v221_v22  ;;  %v171_v24 = vadd.f32 %v170_v21, %v106_v23 }
  0xb4   :  { %v129_v25 = vpop.f32.mrf.mxu2 }
  0xb5   :  { %v194_v26 = vpop.f32.mrf.mxu3  ;;  %v130_v27 = vadd.f32 %v496_v0, %v129_v25  ;;  %v214_v28 = vmax.f32 %v171_v24, 0.0 }
  0xb7   :  { %230 = vst [vmem:[%s565_s3 + $0x10] sm:$0xff] %v214_v28  ;;  %v195_v29 = vadd.f32 %v194_v26, %v130_v27 }
  0xb8   :  { %v108_v30 = vpop.f32.mrf.mxu0  ;;  %v173_v31 = vpop.f32.mrf.mxu1 }
  0xb9   :  { %v222_v32 = vmax.f32 %v195_v29, 0.0  ;;  %v109_v33 = vadd.f32 %v496_v0, %v108_v30 }
  0xbb   :  { %238 = vst [vmem:[%s565_s3 + $0x50] sm:$0xff] %v222_v32  ;;  %v174_v34 = vadd.f32 %v173_v31, %v109_v33 }
  0xbc   :  { %v132_v35 = vpop.f32.mrf.mxu2 }
  0xbd   :  { %v197_v36 = vpop.f32.mrf.mxu3  ;;  %v133_v37 = vadd.f32 %v496_v0, %v132_v35  ;;  %v215_v38 = vmax.f32 %v174_v34, 0.0 }
  0xbf   :  { %231 = vst [vmem:[%s565_s3 + $0x18] sm:$0xff] %v215_v38  ;;  %v198_v39 = vadd.f32 %v197_v36, %v133_v37 }
  0xc0   :  { %v111_v40 = vpop.f32.mrf.mxu0  ;;  %v176_v41 = vpop.f32.mrf.mxu1 }
  0xc1   :  { %v223_v42 = vmax.f32 %v198_v39, 0.0  ;;  %v112_v43 = vadd.f32 %v496_v0, %v111_v40 }
  0xc3   :  { %239 = vst [vmem:[%s565_s3 + $0x58] sm:$0xff] %v223_v42  ;;  %v177_v44 = vadd.f32 %v176_v41, %v112_v43 }
  0xc4   :  { %v135_v45 = vpop.f32.mrf.mxu2 }
  0xc5   :  { %v200_v46 = vpop.f32.mrf.mxu3  ;;  %v136_v47 = vadd.f32 %v496_v0, %v135_v45  ;;  %v216_v48 = vmax.f32 %v177_v44, 0.0 }
  0xc7   :  { %232 = vst [vmem:[%s565_s3 + $0x20] sm:$0xff] %v216_v48  ;;  %v201_v49 = vadd.f32 %v200_v46, %v136_v47 }
  0xc8   :  { %v114_v50 = vpop.f32.mrf.mxu0  ;;  %v179_v51 = vpop.f32.mrf.mxu1 }
  0xc9   :  { %v224_v52 = vmax.f32 %v201_v49, 0.0  ;;  %v115_v53 = vadd.f32 %v496_v0, %v114_v50 }
  0xcb   :  { %240 = vst [vmem:[%s565_s3 + $0x60] sm:$0xff] %v224_v52  ;;  %v180_v54 = vadd.f32 %v179_v51, %v115_v53 }
  0xcc   :  { %v138_v55 = vpop.f32.mrf.mxu2 }
  0xcd   :  { %v203_v56 = vpop.f32.mrf.mxu3  ;;  %v139_v57 = vadd.f32 %v496_v0, %v138_v55  ;;  %v217_v58 = vmax.f32 %v180_v54, 0.0 }
  0xcf   :  { %233 = vst [vmem:[%s565_s3 + $0x28] sm:$0xff] %v217_v58  ;;  %v204_v59 = vadd.f32 %v203_v56, %v139_v57 }
  0xd0   :  { %v117_v60 = vpop.f32.mrf.mxu0  ;;  %v182_v61 = vpop.f32.mrf.mxu1 }
  0xd1   :  { %v225_v62 = vmax.f32 %v204_v59, 0.0  ;;  %v118_v63 = vadd.f32 %v496_v0, %v117_v60 }
  0xd3   :  { %241 = vst [vmem:[%s565_s3 + $0x68] sm:$0xff] %v225_v62  ;;  %v183_v1 = vadd.f32 %v182_v61, %v118_v63 }
  0xd4   :  { %v141_v2 = vpop.f32.mrf.mxu2 }
  0xd5   :  { %v206_v3 = vpop.f32.mrf.mxu3  ;;  %v142_v4 = vadd.f32 %v496_v0, %v141_v2  ;;  %v218_v5 = vmax.f32 %v183_v1, 0.0 }
  0xd7   :  { %234 = vst [vmem:[%s565_s3 + $0x30] sm:$0xff] %v218_v5  ;;  %v207_v6 = vadd.f32 %v206_v3, %v142_v4 }
  0xd8   :  { %v120_v7 = vpop.f32.mrf.mxu0  ;;  %v185_v8 = vpop.f32.mrf.mxu1 }
  0xd9   :  { %v226_v9 = vmax.f32 %v207_v6, 0.0  ;;  %v121_v10 = vadd.f32 %v496_v0, %v120_v7 }
  0xdb   :  { %242 = vst [vmem:[%s565_s3 + $0x70] sm:$0xff] %v226_v9  ;;  %v186_v11 = vadd.f32 %v185_v8, %v121_v10 }
  0xdc   :  { %v144_v12 = vpop.f32.mrf.mxu2 }
  0xdd   :  { %v209_v13 = vpop.f32.mrf.mxu3  ;;  %v145_v14 = vadd.f32 %v496_v0, %v144_v12  ;;  %v219_v15 = vmax.f32 %v186_v11, 0.0 }
  0xdf   :  { %235 = vst [vmem:[%s565_s3 + $0x38] sm:$0xff] %v219_v15  ;;  %v210_v16 = vadd.f32 %v209_v13, %v145_v14 }
  0xe1   :  { %v227_v17 = vmax.f32 %v210_v16, 0.0 }
  0xe3   :  { %243 = vst [vmem:[%s565_s3 + $0x78] sm:$0xff] %v227_v17 }

// kernel: forward.4
= control target key start
LH: loop header
LB: loop body
LE: loop exit
PB: predicated region body
PF: predicated region fallthrough
CT: control target
= control target key end

     0   :  { %s469_s1 = inlined_call_operand.vmem [shape: f32[512,128], index: 1, kind: input, shape index: {}]   ;;  %s470_s2 = inlined_call_operand.vmem [shape: f32[1,128], index: 2, kind: input, shape index: {}]   ;;  %s471_s0 = inlined_call_operand.vmem [shape: f32[24,512], index: 0, kind: input, shape index: {}]   ;;  %s472_s3 = inlined_call_operand.vmem [shape: f32[24,128], index: 3, kind: output, shape index: {}]  }
   0x1   :  { %v73_v0 = vld [vmem:[%s469_s1 + $0x178] sm:$0xff]  ;;  %v72_v2 = vld [vmem:[%s469_s1 + $0x170] sm:$0xff]  ;;  %v71_v6 = vld [vmem:[%s469_s1 + $0x168] sm:$0xff] }
   0x2   :  { %v41_v1 = vld [vmem:[%s469_s1 + $0x78] sm:$0xff]  ;;  %146 = vmatpush.msra.mxu2 %v73_v0  ;;  %v40_v4 = vld [vmem:[%s469_s1 + $0x70] sm:$0xff]  ;;  %v39_v8 = vld [vmem:[%s469_s1 + $0x68] sm:$0xff] }
   0x3   :  { %94 = vmatpush.msra.mxu0 %v41_v1  ;;  %v89_v3 = vld [vmem:[%s469_s1 + $0x1f8] sm:$0xff]  ;;  %v88_v7 = vld [vmem:[%s469_s1 + $0x1f0] sm:$0xff]  ;;  %v87_v10 = vld [vmem:[%s469_s1 + $0x1e8] sm:$0xff] }
   0x4   :  { %v57_v5 = vld [vmem:[%s469_s1 + $0xf8] sm:$0xff]  ;;  %172 = vmatpush.msra.mxu3 %v89_v3  ;;  %147 = vmatpush.msra.mxu2 %v72_v2  ;;  %v56_v9 = vld [vmem:[%s469_s1 + $0xf0] sm:$0xff]  ;;  %v70_v11 = vld [vmem:[%s469_s1 + $0x160] sm:$0xff] }
   0x5   :  { %120 = vmatpush.msra.mxu1 %v57_v5  ;;  %95 = vmatpush.msra.mxu0 %v40_v4  ;;  %v38_v12 = vld [vmem:[%s469_s1 + $0x60] sm:$0xff]  ;;  %v55_v13 = vld [vmem:[%s469_s1 + $0xe8] sm:$0xff]  ;;  %v69_v16 = vld [vmem:[%s469_s1 + $0x158] sm:$0xff] }
   0x6   :  { %173 = vmatpush.msra.mxu3 %v88_v7  ;;  %148 = vmatpush.msra.mxu2 %v71_v6  ;;  %v86_v14 = vld [vmem:[%s469_s1 + $0x1e0] sm:$0xff]  ;;  %v37_v17 = vld [vmem:[%s469_s1 + $0x58] sm:$0xff]  ;;  %v68_v20 = vld [vmem:[%s469_s1 + $0x150] sm:$0xff] }
   0x7   :  { %121 = vmatpush.msra.mxu1 %v56_v9  ;;  %96 = vmatpush.msra.mxu0 %v39_v8  ;;  %v54_v15 = vld [vmem:[%s469_s1 + $0xe0] sm:$0xff]  ;;  %v85_v18 = vld [vmem:[%s469_s1 + $0x1d8] sm:$0xff]  ;;  %v36_v21 = vld [vmem:[%s469_s1 + $0x50] sm:$0xff] }
   0x8   :  { %174 = vmatpush.msra.mxu3 %v87_v10  ;;  %149 = vmatpush.msra.mxu2 %v70_v11  ;;  %v53_v19 = vld [vmem:[%s469_s1 + $0xd8] sm:$0xff]  ;;  %v84_v22 = vld [vmem:[%s469_s1 + $0x1d0] sm:$0xff]  ;;  %v67_v24 = vld [vmem:[%s469_s1 + $0x148] sm:$0xff] }
   0x9   :  { %122 = vmatpush.msra.mxu1 %v55_v13  ;;  %97 = vmatpush.msra.mxu0 %v38_v12  ;;  %v52_v23 = vld [vmem:[%s469_s1 + $0xd0] sm:$0xff]  ;;  %v35_v25 = vld [vmem:[%s469_s1 + $0x48] sm:$0xff]  ;;  %v66_v28 = vld [vmem:[%s469_s1 + $0x140] sm:$0xff] }
   0xa   :  { %175 = vmatpush.msra.mxu3 %v86_v14  ;;  %150 = vmatpush.msra.mxu2 %v69_v16  ;;  %v83_v26 = vld [vmem:[%s469_s1 + $0x1c8] sm:$0xff]  ;;  %v34_v29 = vld [vmem:[%s469_s1 + $0x40] sm:$0xff]  ;;  %v65_v32 = vld [vmem:[%s469_s1 + $0x138] sm:$0xff] }
   0xb   :  { %123 = vmatpush.msra.mxu1 %v54_v15  ;;  %98 = vmatpush.msra.mxu0 %v37_v17  ;;  %v51_v27 = vld [vmem:[%s469_s1 + $0xc8] sm:$0xff]  ;;  %v82_v30 = vld [vmem:[%s469_s1 + $0x1c0] sm:$0xff]  ;;  %v33_v33 = vld [vmem:[%s469_s1 + $0x38] sm:$0xff] }
   0xc   :  { %176 = vmatpush.msra.mxu3 %v85_v18  ;;  %151 = vmatpush.msra.mxu2 %v68_v20  ;;  %v50_v31 = vld [vmem:[%s469_s1 + $0xc0] sm:$0xff]  ;;  %v81_v34 = vld [vmem:[%s469_s1 + $0x1b8] sm:$0xff]  ;;  %v64_v36 = vld [vmem:[%s469_s1 + $0x130] sm:$0xff] }
   0xd   :  { %124 = vmatpush.msra.mxu1 %v53_v19  ;;  %99 = vmatpush.msra.mxu0 %v36_v21  ;;  %v49_v35 = vld [vmem:[%s469_s1 + $0xb8] sm:$0xff]  ;;  %v32_v37 = vld [vmem:[%s469_s1 + $0x30] sm:$0xff]  ;;  %v63_v40 = vld [vmem:[%s469_s1 + $0x128] sm:$0xff] }
   0xe   :  { %177 = vmatpush.msra.mxu3 %v84_v22  ;;  %152 = vmatpush.msra.mxu2 %v67_v24  ;;  %v80_v38 = vld [vmem:[%s469_s1 + $0x1b0] sm:$0xff]  ;;  %v31_v41 = vld [vmem:[%s469_s1 + $0x28] sm:$0xff]  ;;  %v62_v44 = vld [vmem:[%s469_s1 + $0x120] sm:$0xff] }
   0xf   :  { %125 = vmatpush.msra.mxu1 %v52_v23  ;;  %100 = vmatpush.msra.mxu0 %v35_v25  ;;  %v48_v39 = vld [vmem:[%s469_s1 + $0xb0] sm:$0xff]  ;;  %v79_v42 = vld [vmem:[%s469_s1 + $0x1a8] sm:$0xff]  ;;  %v30_v45 = vld [vmem:[%s469_s1 + $0x20] sm:$0xff] }
  0x10   :  { %178 = vmatpush.msra.mxu3 %v83_v26  ;;  %153 = vmatpush.msra.mxu2 %v66_v28  ;;  %v47_v43 = vld [vmem:[%s469_s1 + $0xa8] sm:$0xff]  ;;  %v78_v46 = vld [vmem:[%s469_s1 + $0x1a0] sm:$0xff]  ;;  %v61_v48 = vld [vmem:[%s469_s1 + $0x118] sm:$0xff] }
  0x11   :  { %126 = vmatpush.msra.mxu1 %v51_v27  ;;  %101 = vmatpush.msra.mxu0 %v34_v29  ;;  %v46_v47 = vld [vmem:[%s469_s1 + $0xa0] sm:$0xff]  ;;  %v29_v49 = vld [vmem:[%s469_s1 + $0x18] sm:$0xff]  ;;  %v60_v52 = vld [vmem:[%s469_s1 + $0x110] sm:$0xff] }
  0x12   :  { %179 = vmatpush.msra.mxu3 %v82_v30  ;;  %154 = vmatpush.msra.mxu2 %v65_v32  ;;  %v77_v50 = vld [vmem:[%s469_s1 + $0x198] sm:$0xff]  ;;  %v28_v53 = vld [vmem:[%s469_s1 + $0x10] sm:$0xff]  ;;  %v59_v56 = vld [vmem:[%s469_s1 + $0x108] sm:$0xff] }
  0x13   :  { %127 = vmatpush.msra.mxu1 %v50_v31  ;;  %102 = vmatpush.msra.mxu0 %v33_v33  ;;  %v45_v51 = vld [vmem:[%s469_s1 + $0x98] sm:$0xff]  ;;  %v76_v54 = vld [vmem:[%s469_s1 + $0x190] sm:$0xff]  ;;  %v27_v57 = vld [vmem:[%s469_s1 + $0x8] sm:$0xff] }
  0x14   :  { %180 = vmatpush.msra.mxu3 %v81_v34  ;;  %155 = vmatpush.msra.mxu2 %v64_v36  ;;  %v44_v55 = vld [vmem:[%s469_s1 + $0x90] sm:$0xff]  ;;  %v75_v58 = vld [vmem:[%s469_s1 + $0x188] sm:$0xff]  ;;  %v58_v60 = vld [vmem:[%s469_s1 + $0x100] sm:$0xff] }
  0x15   :  { %128 = vmatpush.msra.mxu1 %v49_v35  ;;  %103 = vmatpush.msra.mxu0 %v32_v37  ;;  %v43_v59 = vld [vmem:[%s469_s1 + $0x88] sm:$0xff]  ;;  %v26_v61 = vld [vmem:[%s469_s1] sm:$0xff]  ;;  %v16_v62 = vld [vmem:[%s471_s0 + $0x10] sm:$0xff] }
  0x16   :  { %181 = vmatpush.msra.mxu3 %v80_v38  ;;  %156 = vmatpush.msra.mxu2 %v63_v40  ;;  %v74_v63 = vld [vmem:[%s469_s1 + $0x180] sm:$0xff]  ;;  %v17_v1 = vld [vmem:[%s471_s0 + $0x18] sm:$0xff]  ;;  %v15_v3 = vld [vmem:[%s471_s0 + $0x8] sm:$0xff] }
  0x17   :  { %129 = vmatpush.msra.mxu1 %v48_v39  ;;  %104 = vmatpush.msra.mxu0 %v31_v41  ;;  %v14_v0 = vld [vmem:[%s471_s0] sm:$0xff]  ;;  %v20_v4 = vld [vmem:[%s471_s0 + $0x30] sm:$0xff]  ;;  %v21_v6 = vld [vmem:[%s471_s0 + $0x38] sm:$0xff] }
  0x18   :  { %182 = vmatpush.msra.mxu3 %v79_v42  ;;  %157 = vmatpush.msra.mxu2 %v62_v44  ;;  %v42_v2 = vld [vmem:[%s469_s1 + $0x80] sm:$0xff]  ;;  %v19_v7 = vld [vmem:[%s471_s0 + $0x28] sm:$0xff]  ;;  %v24_v8 = vld [vmem:[%s471_s0 + $0x50] sm:$0xff] }
  0x19   :  { %130 = vmatpush.msra.mxu1 %v47_v43  ;;  %105 = vmatpush.msra.mxu0 %v30_v45  ;;  %v18_v5 = vld [vmem:[%s471_s0 + $0x20] sm:$0xff]  ;;  %v25_v10 = vld [vmem:[%s471_s0 + $0x58] sm:$0xff]  ;;  %v23_v11 = vld [vmem:[%s471_s0 + $0x48] sm:$0xff] }
  0x1a   :  { %183 = vmatpush.msra.mxu3 %v78_v46  ;;  %158 = vmatpush.msra.mxu2 %v61_v48  ;;  %v22_v9 = vld [vmem:[%s471_s0 + $0x40] sm:$0xff] }
  0x1b   :  { %131 = vmatpush.msra.mxu1 %v46_v47  ;;  %106 = vmatpush.msra.mxu0 %v29_v49  ;;  %v208_v12 = vld [vmem:[%s470_s2] ss:$0 sm:$0xff] }
  0x1c   :  { %184 = vmatpush.msra.mxu3 %v77_v50  ;;  %159 = vmatpush.msra.mxu2 %v60_v52 }
  0x1d   :  { %132 = vmatpush.msra.mxu1 %v45_v51  ;;  %107 = vmatpush.msra.mxu0 %v28_v53 }
  0x1e   :  { %185 = vmatpush.msra.mxu3 %v76_v54  ;;  %160 = vmatpush.msra.mxu2 %v59_v56 }
  0x1f   :  { %133 = vmatpush.msra.mxu1 %v44_v55  ;;  %108 = vmatpush.msra.mxu0 %v27_v57 }
  0x20   :  { %186 = vmatpush.msra.mxu3 %v75_v58  ;;  %161 = vmatpush.msra.mxu2 %v58_v60 }
  0x21   :  { %134 = vmatpush.msra.mxu1 %v43_v59  ;;  %109 = vmatpush.msra.mxu0 %v26_v61 }
  0x22   :  { %162 = vmatmul.f32.vlgmr.msra.gmra.mxu2 %v16_v62  ;;  %187 = vmatpush.msra.mxu3 %v74_v63 }
  0x23   :  { %110 = vmatmul.f32.vlgmr.msra.gmra.mxu0 %v14_v0  ;;  %188 = vmatmul.f32.vlgmr.msra.gmra.mxu3 %v17_v1 }
  0x24   :  { %135 = vmatpush.msra.mxu1 %v42_v2 }
  0x25   :  { %136 = vmatmul.f32.vlgmr.msra.gmra.mxu1 %v15_v3 }
  0x2a   :  { %165 = vmatmul.f32.gmra.mxu2 %v20_v4 }
  0x2b   :  { %113 = vmatmul.f32.gmra.mxu0 %v18_v5  ;;  %191 = vmatmul.f32.gmra.mxu3 %v21_v6 }
  0x2d   :  { %139 = vmatmul.f32.gmra.mxu1 %v19_v7 }
  0x32   :  { %168 = vmatmul.f32.gmra.mxu2 %v24_v8 }
  0x33   :  { %116 = vmatmul.f32.gmra.mxu0 %v22_v9  ;;  %194 = vmatmul.f32.gmra.mxu3 %v25_v10 }
  0x35   :  { %142 = vmatmul.f32.gmra.mxu1 %v23_v11 }
  0xa0   :  { %v111_v13 = vpop.f32.mrf.mxu0 }
  0xa1   :  { %v112_v14 = vadd.f32 %v208_v12, %v111_v13 }
  0xa2   :  { %v137_v15 = vpop.f32.mrf.mxu1 }
  0xa3   :  { %v138_v16 = vadd.f32 %v137_v15, %v112_v14 }
  0xa5   :  { %v163_v17 = vpop.f32.mrf.mxu2 }
  0xa6   :  { %v164_v18 = vadd.f32 %v163_v17, %v138_v16  ;;  %v189_v19 = vpop.f32.mrf.mxu3 }
  0xa8   :  { %v190_v20 = vadd.f32 %v189_v19, %v164_v18  ;;  %v114_v21 = vpop.f32.mrf.mxu0 }
  0xa9   :  { %v115_v22 = vadd.f32 %v208_v12, %v114_v21 }
  0xaa   :  { %v198_v23 = vmax.f32 %v190_v20, 0.0  ;;  %v140_v24 = vpop.f32.mrf.mxu1 }
  0xab   :  { %v141_v25 = vadd.f32 %v140_v24, %v115_v22 }
  0xac   :  { %201 = vst [vmem:[%s472_s3] sm:$0xff] %v198_v23 }
  0xad   :  { %v166_v26 = vpop.f32.mrf.mxu2 }
  0xae   :  { %v167_v27 = vadd.f32 %v166_v26, %v141_v25  ;;  %v192_v28 = vpop.f32.mrf.mxu3 }
  0xb0   :  { %v193_v29 = vadd.f32 %v192_v28, %v167_v27  ;;  %v117_v30 = vpop.f32.mrf.mxu0 }
  0xb1   :  { %v118_v31 = vadd.f32 %v208_v12, %v117_v30 }
  0xb2   :  { %v199_v32 = vmax.f32 %v193_v29, 0.0  ;;  %v143_v33 = vpop.f32.mrf.mxu1 }
  0xb3   :  { %v144_v34 = vadd.f32 %v143_v33, %v118_v31 }
  0xb4   :  { %202 = vst [vmem:[%s472_s3 + $0x8] sm:$0xff] %v199_v32 }
  0xb5   :  { %v169_v35 = vpop.f32.mrf.mxu2 }
  0xb6   :  { %v170_v36 = vadd.f32 %v169_v35, %v144_v34  ;;  %v195_v37 = vpop.f32.mrf.mxu3 }
  0xb8   :  { %v196_v38 = vadd.f32 %v195_v37, %v170_v36 }
  0xba   :  { %v200_v39 = vmax.f32 %v196_v38, 0.0 }
  0xbc   :  { %203 = vst [vmem:[%s472_s3 + $0x10] sm:$0xff] %v200_v39 }

// kernel: forward.5
= control target key start
LH: loop header
LB: loop body
LE: loop exit
PB: predicated region body
PF: predicated region fallthrough
CT: control target
= control target key end

     0   :  { %s6248_s0 = inlined_call_operand.vmem [shape: f32[8,640], index: 0, kind: input, shape index: {}]   ;;  %s6249_s1 = inlined_call_operand.vmem [shape: f32[8,128], index: 1, kind: input, shape index: {}]   ;;  %s6250_s2 = inlined_call_operand.vmem [shape: f32[8,128], index: 2, kind: input, shape index: {}]   ;;  %s6251_s3 = inlined_call_operand.vmem [shape: f32[8,128], index: 3, kind: input, shape index: {}]   ;;  %s6252_s4 = inlined_call_operand.vmem [shape: f32[640,128], index: 4, kind: input, shape index: {}]   ;;  %s6253_s5 = inlined_call_operand.vmem [shape: f32[15,128,128], index: 5, kind: input, shape index: {}]   ;;  %s6254_s6 = inlined_call_operand.vmem [shape: f32[18,1,128], index: 6, kind: input, shape index: {}]   ;;  %s6255_s7 = inlined_call_operand.vmem [shape: f32[3,128,256], index: 7, kind: input, shape index: {}]   ;;  %s6256_s8 = inlined_call_operand.vmem [shape: f32[1,256], index: 8, kind: input, shape index: {}]   ;;  %s6257_s9 = inlined_call_operand.hbm [shape: f32[256,128], index: 9, kind: input, shape index: {}]   ;;  %s6258_s10 = inlined_call_operand.vmem [shape: f32[128,512], index: 10, kind: input, shape index: {}]   ;;  %s6259_s11 = inlined_call_operand.vmem [shape: f32[1,512], index: 11, kind: input, shape index: {}]   ;;  %s6260_s12 = inlined_call_operand.hbm [shape: f32[512,128], index: 12, kind: input, shape index: {}]   ;;  %s6261_s13 = inlined_call_operand.vmem [shape: f32[3,128,384], index: 13, kind: input, shape index: {}]   ;;  %s6262_s14 = inlined_call_operand.vmem [shape: f32[2,1,384], index: 14, kind: input, shape index: {}]   ;;  %s6263_s15 = inlined_call_operand.vmem [shape: f32[8,128], index: 15, kind: output, shape index: {0}]   ;;  %s6264_s16 = inlined_call_operand.vmem [shape: f32[8,128], index: 16, kind: output, shape index: {1}]   ;;  %s6265_s17 = inlined_call_operand.vmem [shape: f32[8,128], index: 17, kind: output, shape index: {2}]  }
   0x1   :  { %6420 = sst [smem:[#allocation116_spill]] %s6248_s0 }
   0x2   :  { %6421 = sst [smem:[#allocation117_spill]] %s6249_s1 }
   0x3   :  { %23 = vsyncpa [#allocation3], 0  ;;  %s47_s26 = sshll.u32 %s6257_s9, 4  ;;  %s48_s26 = int_to_ptr.hbm [resolvable:$true] %s47_s26 }
   0x4   :  { %24 = vsyncpa [#allocation5], 0  ;;  %s3062_s27 = smov [#allocation2]   ;;  %s64_s30 = sshll.u32 %s6260_s12, 4  ;;  %s65_s30 = int_to_ptr.hbm [resolvable:$true] %s64_s30 }
   0x5   :  { %s49_s28 = sshll.u32 %s3062_s27, 4  ;;  %s3063_s18 = smov 128   ;;  %s50_s28 = int_to_ptr.vmem [resolvable:$true] %s49_s28 }
   0x6   :  { %s3064_s19 = smov 8   ;;  %s3065_s1 = smov [#allocation4]  }
   0x7   :  { %55 = dma.hbm_to_vmem [thread:$0]  %s48_s26, 4096, %s50_s28, [#allocation3], %s3063_s18, %s3063_s18, %s3064_s19  }
   0x8   :  { %s66_s20 = sshll.u32 %s3065_s1, 4  ;;  %s67_s20 = int_to_ptr.vmem [resolvable:$true] %s66_s20 }
   0x9   :  { %72 = dma.hbm_to_vmem [thread:$0]  %s65_s30, 8192, %s67_s20, [#allocation5], %s3063_s18, %s3063_s18, %s3064_s19  }
   0xa   :  { %3058 = dma.done.wait [#allocation3], 4096  }
   0xb   :  { %3059 = vsyncadd [#allocation3], 4294963200 }
   0xc   :  { %3060 = dma.done.wait [#allocation5], 8192  }
   0xd   :  { %3061 = vsyncadd [#allocation5], 4294959104  ;;  %v105_v0 = vld [vmem:[%s6252_s4 + $0x78] sm:$0xff]  ;;  %v104_v2 = vld [vmem:[%s6252_s4 + $0x70] sm:$0xff]  ;;  %s6422_s20 = sld [smem:[#allocation116_spill]] }
   0xe   :  { %v153_v1 = vld [vmem:[%s6252_s4 + $0x1f8] sm:$0xff]  ;;  %175 = vmatpush.msra.mxu0 %v105_v0  ;;  %v152_v3 = vld [vmem:[%s6252_s4 + $0x1f0] sm:$0xff]  ;;  %v103_v4 = vld [vmem:[%s6252_s4 + $0x68] sm:$0xff]  ;;  %s6423_s12 = sld [smem:[#allocation117_spill]] }
   0xf   :  { %235 = vmatpush.msra.mxu3 %v153_v1  ;;  %v151_v5 = vld [vmem:[%s6252_s4 + $0x1e8] sm:$0xff]  ;;  %v102_v6 = vld [vmem:[%s6252_s4 + $0x60] sm:$0xff]  ;;  %v101_v8 = vld [vmem:[%s6252_s4 + $0x58] sm:$0xff] }
  0x10   :  { %176 = vmatpush.msra.mxu0 %v104_v2  ;;  %v150_v7 = vld [vmem:[%s6252_s4 + $0x1e0] sm:$0xff]  ;;  %v149_v9 = vld [vmem:[%s6252_s4 + $0x1d8] sm:$0xff]  ;;  %v100_v11 = vld [vmem:[%s6252_s4 + $0x50] sm:$0xff] }
  0x11   :  { %236 = vmatpush.msra.mxu3 %v152_v3  ;;  %v137_v10 = vld [vmem:[%s6252_s4 + $0x178] sm:$0xff]  ;;  %v148_v12 = vld [vmem:[%s6252_s4 + $0x1d0] sm:$0xff]  ;;  %v135_v15 = vld [vmem:[%s6252_s4 + $0x168] sm:$0xff] }
  0x12   :  { %177 = vmatpush.msra.mxu0 %v103_v4  ;;  %215 = vmatpush.msra.mxu2 %v137_v10  ;;  %v136_v13 = vld [vmem:[%s6252_s4 + $0x170] sm:$0xff]  ;;  %v121_v14 = vld [vmem:[%s6252_s4 + $0xf8] sm:$0xff]  ;;  %v99_v16 = vld [vmem:[%s6252_s4 + $0x48] sm:$0xff] }
  0x13   :  { %237 = vmatpush.msra.mxu3 %v151_v5  ;;  %v147_v17 = vld [vmem:[%s6252_s4 + $0x1c8] sm:$0xff]  ;;  %195 = vmatpush.msra.mxu1 %v121_v14  ;;  %v120_v18 = vld [vmem:[%s6252_s4 + $0xf0] sm:$0xff]  ;;  %v134_v19 = vld [vmem:[%s6252_s4 + $0x160] sm:$0xff] }
  0x14   :  { %178 = vmatpush.msra.mxu0 %v102_v6  ;;  %216 = vmatpush.msra.mxu2 %v136_v13  ;;  %v98_v20 = vld [vmem:[%s6252_s4 + $0x40] sm:$0xff]  ;;  %v119_v22 = vld [vmem:[%s6252_s4 + $0xe8] sm:$0xff]  ;;  %v133_v23 = vld [vmem:[%s6252_s4 + $0x158] sm:$0xff] }
  0x15   :  { %238 = vmatpush.msra.mxu3 %v150_v7  ;;  %v146_v21 = vld [vmem:[%s6252_s4 + $0x1c0] sm:$0xff]  ;;  %196 = vmatpush.msra.mxu1 %v120_v18  ;;  %v97_v25 = vld [vmem:[%s6252_s4 + $0x38] sm:$0xff]  ;;  %v132_v27 = vld [vmem:[%s6252_s4 + $0x150] sm:$0xff] }
  0x16   :  { %179 = vmatpush.msra.mxu0 %v101_v8  ;;  %217 = vmatpush.msra.mxu2 %v135_v15  ;;  %v118_v24 = vld [vmem:[%s6252_s4 + $0xe0] sm:$0xff]  ;;  %v145_v26 = vld [vmem:[%s6252_s4 + $0x1b8] sm:$0xff]  ;;  %v96_v29 = vld [vmem:[%s6252_s4 + $0x30] sm:$0xff] }
  0x17   :  { %239 = vmatpush.msra.mxu3 %v149_v9  ;;  %197 = vmatpush.msra.mxu1 %v119_v22  ;;  %v117_v28 = vld [vmem:[%s6252_s4 + $0xd8] sm:$0xff]  ;;  %v144_v30 = vld [vmem:[%s6252_s4 + $0x1b0] sm:$0xff]  ;;  %v131_v31 = vld [vmem:[%s6252_s4 + $0x148] sm:$0xff] }
  0x18   :  { %180 = vmatpush.msra.mxu0 %v100_v11  ;;  %218 = vmatpush.msra.mxu2 %v134_v19  ;;  %v116_v32 = vld [vmem:[%s6252_s4 + $0xd0] sm:$0xff]  ;;  %v95_v33 = vld [vmem:[%s6252_s4 + $0x28] sm:$0xff]  ;;  %v130_v35 = vld [vmem:[%s6252_s4 + $0x140] sm:$0xff] }
  0x19   :  { %240 = vmatpush.msra.mxu3 %v148_v12  ;;  %198 = vmatpush.msra.mxu1 %v118_v24  ;;  %v143_v34 = vld [vmem:[%s6252_s4 + $0x1a8] sm:$0xff]  ;;  %v94_v37 = vld [vmem:[%s6252_s4 + $0x20] sm:$0xff]  ;;  %v129_v39 = vld [vmem:[%s6252_s4 + $0x138] sm:$0xff] }
  0x1a   :  { %181 = vmatpush.msra.mxu0 %v99_v16  ;;  %219 = vmatpush.msra.mxu2 %v133_v23  ;;  %v115_v36 = vld [vmem:[%s6252_s4 + $0xc8] sm:$0xff]  ;;  %v142_v38 = vld [vmem:[%s6252_s4 + $0x1a0] sm:$0xff]  ;;  %v93_v41 = vld [vmem:[%s6252_s4 + $0x18] sm:$0xff] }
  0x1b   :  { %241 = vmatpush.msra.mxu3 %v147_v17  ;;  %199 = vmatpush.msra.mxu1 %v117_v28  ;;  %v114_v40 = vld [vmem:[%s6252_s4 + $0xc0] sm:$0xff]  ;;  %v141_v42 = vld [vmem:[%s6252_s4 + $0x198] sm:$0xff]  ;;  %v128_v43 = vld [vmem:[%s6252_s4 + $0x130] sm:$0xff] }
  0x1c   :  { %182 = vmatpush.msra.mxu0 %v98_v20  ;;  %220 = vmatpush.msra.mxu2 %v132_v27  ;;  %v113_v44 = vld [vmem:[%s6252_s4 + $0xb8] sm:$0xff]  ;;  %v92_v45 = vld [vmem:[%s6252_s4 + $0x10] sm:$0xff]  ;;  %v127_v47 = vld [vmem:[%s6252_s4 + $0x128] sm:$0xff] }
  0x1d   :  { %242 = vmatpush.msra.mxu3 %v146_v21  ;;  %200 = vmatpush.msra.mxu1 %v116_v32  ;;  %v140_v46 = vld [vmem:[%s6252_s4 + $0x190] sm:$0xff]  ;;  %v91_v49 = vld [vmem:[%s6252_s4 + $0x8] sm:$0xff]  ;;  %v126_v51 = vld [vmem:[%s6252_s4 + $0x120] sm:$0xff] }
  0x1e   :  { %183 = vmatpush.msra.mxu0 %v97_v25  ;;  %221 = vmatpush.msra.mxu2 %v131_v31  ;;  %v112_v48 = vld [vmem:[%s6252_s4 + $0xb0] sm:$0xff]  ;;  %v139_v50 = vld [vmem:[%s6252_s4 + $0x188] sm:$0xff]  ;;  %v90_v53 = vld [vmem:[%s6252_s4] sm:$0xff] }
  0x1f   :  { %243 = vmatpush.msra.mxu3 %v145_v26  ;;  %201 = vmatpush.msra.mxu1 %v115_v36  ;;  %v111_v52 = vld [vmem:[%s6252_s4 + $0xa8] sm:$0xff]  ;;  %v138_v54 = vld [vmem:[%s6252_s4 + $0x180] sm:$0xff]  ;;  %v169_v55 = vld [vmem:[%s6252_s4 + $0x278] sm:$0xff] }
  0x20   :  { %184 = vmatpush.msra.mxu0 %v96_v29  ;;  %222 = vmatpush.msra.mxu2 %v130_v35  ;;  %v378_v56 = vld [vmem:[%s6253_s5 + $0x78] sm:$0xff]  ;;  %v110_v58 = vld [vmem:[%s6252_s4 + $0xa0] sm:$0xff]  ;;  %v168_v59 = vld [vmem:[%s6252_s4 + $0x270] sm:$0xff] }
  0x21   :  { %244 = vmatpush.msra.mxu3 %v144_v30  ;;  %202 = vmatpush.msra.mxu1 %v114_v40  ;;  %v125_v57 = vld [vmem:[%s6252_s4 + $0x118] sm:$0xff]  ;;  %v377_v60 = vld [vmem:[%s6253_s5 + $0x70] sm:$0xff]  ;;  %v167_v63 = vld [vmem:[%s6252_s4 + $0x268] sm:$0xff] }
  0x22   :  { %185 = vmatpush.msra.mxu0 %v95_v33  ;;  %223 = vmatpush.msra.mxu2 %v129_v39  ;;  %v124_v61 = vld [vmem:[%s6252_s4 + $0x110] sm:$0xff]  ;;  %v109_v62 = vld [vmem:[%s6252_s4 + $0x98] sm:$0xff]  ;;  %v376_v0 = vld [vmem:[%s6253_s5 + $0x68] sm:$0xff] }
  0x23   :  { %245 = vmatpush.msra.mxu3 %v143_v34  ;;  %203 = vmatpush.msra.mxu1 %v113_v44  ;;  %v123_v1 = vld [vmem:[%s6252_s4 + $0x108] sm:$0xff]  ;;  %v108_v2 = vld [vmem:[%s6252_s4 + $0x90] sm:$0xff]  ;;  %v166_v3 = vld [vmem:[%s6252_s4 + $0x260] sm:$0xff] }
  0x24   :  { %186 = vmatpush.msra.mxu0 %v94_v37  ;;  %224 = vmatpush.msra.mxu2 %v128_v43  ;;  %v375_v4 = vld [vmem:[%s6253_s5 + $0x60] sm:$0xff]  ;;  %v165_v5 = vld [vmem:[%s6252_s4 + $0x258] sm:$0xff]  ;;  %v107_v8 = vld [vmem:[%s6252_s4 + $0x88] sm:$0xff] }
  0x25   :  { %246 = vmatpush.msra.mxu3 %v142_v38  ;;  %204 = vmatpush.msra.mxu1 %v112_v48  ;;  %v374_v6 = vld [vmem:[%s6253_s5 + $0x58] sm:$0xff]  ;;  %v122_v7 = vld [vmem:[%s6252_s4 + $0x100] sm:$0xff]  ;;  %v164_v9 = vld [vmem:[%s6252_s4 + $0x250] sm:$0xff] }
  0x26   :  { %187 = vmatpush.msra.mxu0 %v93_v41  ;;  %225 = vmatpush.msra.mxu2 %v127_v47  ;;  %v373_v10 = vld [vmem:[%s6253_s5 + $0x50] sm:$0xff]  ;;  %v85_v12 = vld [vmem:[%s6422_s20] sm:$0xff]  ;;  %v88_v13 = vld [vmem:[%s6422_s20 + $0x18] sm:$0xff] }
  0x27   :  { %247 = vmatpush.msra.mxu3 %v141_v42  ;;  %205 = vmatpush.msra.mxu1 %v111_v52  ;;  %v87_v11 = vld [vmem:[%s6422_s20 + $0x10] sm:$0xff]  ;;  %v163_v14 = vld [vmem:[%s6252_s4 + $0x248] sm:$0xff]  ;;  %v106_v16 = vld [vmem:[%s6252_s4 + $0x80] sm:$0xff] }
  0x28   :  { %188 = vmatpush.msra.mxu0 %v92_v45  ;;  %226 = vmatpush.msra.mxu2 %v126_v51  ;;  %v372_v15 = vld [vmem:[%s6253_s5 + $0x48] sm:$0xff]  ;;  %v162_v18 = vld [vmem:[%s6252_s4 + $0x240] sm:$0xff]  ;;  %v2492_v20 = vld [vmem:[%s6253_s5 + $0x6f8] sm:$0xff] }
  0x29   :  { %248 = vmatpush.msra.mxu3 %v140_v46  ;;  %206 = vmatpush.msra.mxu1 %v110_v58  ;;  %v86_v17 = vld [vmem:[%s6422_s20 + $0x8] sm:$0xff]  ;;  %v371_v19 = vld [vmem:[%s6253_s5 + $0x40] sm:$0xff]  ;;  %v161_v21 = vld [vmem:[%s6252_s4 + $0x238] sm:$0xff] }
  0x2a   :  { %189 = vmatpush.msra.mxu0 %v91_v49  ;;  %227 = vmatpush.msra.mxu2 %v125_v57  ;;  %v370_v22 = vld [vmem:[%s6253_s5 + $0x38] sm:$0xff]  ;;  %v2491_v23 = vld [vmem:[%s6253_s5 + $0x6f0] sm:$0xff]  ;;  %v2490_v26 = vld [vmem:[%s6253_s5 + $0x6e8] sm:$0xff] }
  0x2b   :  { %249 = vmatpush.msra.mxu3 %v139_v50  ;;  %207 = vmatpush.msra.mxu1 %v109_v62  ;;  %v160_v24 = vld [vmem:[%s6252_s4 + $0x230] sm:$0xff]  ;;  %v159_v27 = vld [vmem:[%s6252_s4 + $0x228] sm:$0xff]  ;;  %v2489_v29 = vld [vmem:[%s6253_s5 + $0x6e0] sm:$0xff] }
  0x2c   :  { %190 = vmatpush.msra.mxu0 %v90_v53  ;;  %228 = vmatpush.msra.mxu2 %v124_v61  ;;  %v369_v25 = vld [vmem:[%s6253_s5 + $0x30] sm:$0xff]  ;;  %v368_v28 = vld [vmem:[%s6253_s5 + $0x28] sm:$0xff]  ;;  %v158_v30 = vld [vmem:[%s6252_s4 + $0x220] sm:$0xff] }
  0x2d   :  { %250 = vmatpush.msra.mxu3 %v138_v54  ;;  %208 = vmatpush.msra.mxu1 %v108_v2  ;;  %v367_v31 = vld [vmem:[%s6253_s5 + $0x20] sm:$0xff]  ;;  %v2488_v32 = vld [vmem:[%s6253_s5 + $0x6d8] sm:$0xff]  ;;  %v2487_v35 = vld [vmem:[%s6253_s5 + $0x6d0] sm:$0xff] }
  0x2e   :  { %255 = vmatpush.msrb.mxu0 %v169_v55  ;;  %229 = vmatpush.msra.mxu2 %v123_v1  ;;  %v157_v33 = vld [vmem:[%s6252_s4 + $0x218] sm:$0xff]  ;;  %v156_v36 = vld [vmem:[%s6252_s4 + $0x210] sm:$0xff]  ;;  %v2486_v38 = vld [vmem:[%s6253_s5 + $0x6c8] sm:$0xff] }
  0x2f   :  { %383 = vmatpush.msrb.mxu3 %v378_v56  ;;  %209 = vmatpush.msra.mxu1 %v107_v8  ;;  %v366_v34 = vld [vmem:[%s6253_s5 + $0x18] sm:$0xff]  ;;  %v365_v37 = vld [vmem:[%s6253_s5 + $0x10] sm:$0xff]  ;;  %v155_v39 = vld [vmem:[%s6252_s4 + $0x208] sm:$0xff] }
  0x30   :  { %256 = vmatpush.msrb.mxu0 %v168_v59  ;;  %230 = vmatpush.msra.mxu2 %v122_v7  ;;  %v364_v40 = vld [vmem:[%s6253_s5 + $0x8] sm:$0xff]  ;;  %v2485_v41 = vld [vmem:[%s6253_s5 + $0x6c0] sm:$0xff]  ;;  %v2526_v46 = vld [vmem:[%s6253_s5 + $0xf8] sm:$0xff] }
  0x31   :  { %384 = vmatpush.msrb.mxu3 %v377_v60  ;;  %231 = vmatmul.f32.vlgmr.msra.gmra.mxu2 %v87_v11  ;;  %v154_v42 = vld [vmem:[%s6252_s4 + $0x200] sm:$0xff]  ;;  %v2484_v47 = vld [vmem:[%s6253_s5 + $0x6b8] sm:$0xff]  ;;  %v2525_v48 = vld [vmem:[%s6253_s5 + $0xf0] sm:$0xff] }
  0x32   :  { %257 = vmatpush.msrb.mxu0 %v167_v63  ;;  %251 = vmatmul.f32.vlgmr.msra.gmra.mxu3 %v88_v13  ;;  %v363_v43 = vld [vmem:[%s6253_s5] sm:$0xff]  ;;  %v2524_v49 = vld [vmem:[%s6253_s5 + $0xe8] sm:$0xff]  ;;  %v2522_v51 = vld [vmem:[%s6253_s5 + $0xd8] sm:$0xff] }
  0x33   :  { %385 = vmatpush.msrb.mxu3 %v376_v0  ;;  %191 = vmatmul.f32.vlgmr.msra.gmra.mxu0 %v85_v12  ;;  %v89_v44 = vld [vmem:[%s6422_s20 + $0x20] sm:$0xff]  ;;  %v2521_v52 = vld [vmem:[%s6253_s5 + $0xd0] sm:$0xff]  ;;  %v2520_v54 = vld [vmem:[%s6253_s5 + $0xc8] sm:$0xff] }
  0x34   :  { %258 = vmatpush.msrb.mxu0 %v166_v3  ;;  %210 = vmatpush.msra.mxu1 %v106_v16  ;;  %v362_v45 = vld [vmem:[%s6423_s12] sm:$0xff]  ;;  %v2483_v53 = vld [vmem:[%s6253_s5 + $0x6b0] sm:$0xff]  ;;  %v2482_v55 = vld [vmem:[%s6253_s5 + $0x6a8] sm:$0xff] }
  0x35   :  { %386 = vmatpush.msrb.mxu3 %v375_v4  ;;  %211 = vmatmul.f32.vlgmr.msra.gmra.mxu1 %v86_v17  ;;  %v2523_v50 = vld [vmem:[%s6253_s5 + $0xe0] sm:$0xff]  ;;  %v2518_v58 = vld [vmem:[%s6253_s5 + $0xb8] sm:$0xff]  ;;  %v2517_v60 = vld [vmem:[%s6253_s5 + $0xb0] sm:$0xff] }
  0x36   :  { %259 = vmatpush.msrb.mxu0 %v165_v5  ;;  %298 = vmatpush.msrb.mxu1 %v2492_v20  ;;  %v2519_v56 = vld [vmem:[%s6253_s5 + $0xc0] sm:$0xff]  ;;  %v2480_v59 = vld [vmem:[%s6253_s5 + $0x698] sm:$0xff]  ;;  %v2479_v61 = vld [vmem:[%s6253_s5 + $0x690] sm:$0xff] }
  0x37   :  { %387 = vmatpush.msrb.mxu3 %v374_v6  ;;  %v2481_v57 = vld [vmem:[%s6253_s5 + $0x6a0] sm:$0xff]  ;;  %v2516_v62 = vld [vmem:[%s6253_s5 + $0xa8] sm:$0xff]  ;;  %v2514_v2 = vld [vmem:[%s6253_s5 + $0x98] sm:$0xff] }
  0x38   :  { %260 = vmatpush.msrb.mxu0 %v164_v9  ;;  %299 = vmatpush.msrb.mxu1 %v2491_v23  ;;  %v2478_v63 = vld [vmem:[%s6253_s5 + $0x688] sm:$0xff]  ;;  %v2515_v0 = vld [vmem:[%s6253_s5 + $0xa0] sm:$0xff]  ;;  %v2513_v3 = vld [vmem:[%s6253_s5 + $0x90] sm:$0xff] }
  0x39   :  { %388 = vmatpush.msrb.mxu3 %v373_v10  ;;  %v2477_v1 = vld [vmem:[%s6253_s5 + $0x680] sm:$0xff]  ;;  %v2512_v4 = vld [vmem:[%s6253_s5 + $0x88] sm:$0xff]  ;;  %v2509_v6 = vld [vmem:[%s6253_s5 + $0x778] sm:$0xff] }
  0x3a   :  { %261 = vmatpush.msrb.mxu0 %v163_v14  ;;  %300 = vmatpush.msrb.mxu1 %v2490_v26  ;;  %v2511_v5 = vld [vmem:[%s6253_s5 + $0x80] sm:$0xff]  ;;  %v2508_v7 = vld [vmem:[%s6253_s5 + $0x770] sm:$0xff]  ;;  %v3573_v8 = vld [vmem:[%s6253_s5 + $0x178] sm:$0xff] }
  0x3b   :  { %389 = vmatpush.msrb.mxu3 %v372_v15  ;;  %341 = vmatpush.msrb.mxu2 %v2509_v6  ;;  %v3578_v9 = vld [vmem:[%s6253_s5 + $0x170] sm:$0xff]  ;;  %v2882_v10 = vld [vmem:[%s6254_s6 + $0xf] ss:$0 sm:$0xff]  ;;  %v2506_v14 = vld [vmem:[%s6253_s5 + $0x760] sm:$0xff] }
  0x3c   :  { %262 = vmatpush.msrb.mxu0 %v162_v18  ;;  %301 = vmatpush.msrb.mxu1 %v2489_v29  ;;  %v2507_v11 = vld [vmem:[%s6253_s5 + $0x768] sm:$0xff]  ;;  %v3599_v15 = vld [vmem:[%s6253_s5 + $0x160] sm:$0xff]  ;;  %v2505_v17 = vld [vmem:[%s6253_s5 + $0x758] sm:$0xff] }
  0x3d   :  { %390 = vmatpush.msrb.mxu3 %v371_v19  ;;  %342 = vmatpush.msrb.mxu2 %v2508_v7  ;;  %v3590_v13 = vld [vmem:[%s6253_s5 + $0x168] sm:$0xff]  ;;  %v3608_v19 = vld [vmem:[%s6253_s5 + $0x158] sm:$0xff]  ;;  %v2504_v20 = vld [vmem:[%s6253_s5 + $0x750] sm:$0xff] }
  0x3e   :  { %263 = vmatpush.msrb.mxu0 %v161_v21  ;;  %302 = vmatpush.msrb.mxu1 %v2488_v32  ;;  %v3617_v21 = vld [vmem:[%s6253_s5 + $0x150] sm:$0xff]  ;;  %v2503_v23 = vld [vmem:[%s6253_s5 + $0x748] sm:$0xff]  ;;  %v2502_v26 = vld [vmem:[%s6253_s5 + $0x740] sm:$0xff] }
  0x3f   :  { %391 = vmatpush.msrb.mxu3 %v370_v22  ;;  %343 = vmatpush.msrb.mxu2 %v2507_v11  ;;  %v2501_v29 = vld [vmem:[%s6253_s5 + $0x738] sm:$0xff]  ;;  %v2500_v32 = vld [vmem:[%s6253_s5 + $0x730] sm:$0xff] }
  0x40   :  { %264 = vmatpush.msrb.mxu0 %v160_v24  ;;  %303 = vmatpush.msrb.mxu1 %v2487_v35  ;;  %v2499_v35 = vld [vmem:[%s6253_s5 + $0x728] sm:$0xff]  ;;  %v3797_v6 = vld [vmem:[%s6253_s5 + $0x190] sm:$0xff] }
  0x41   :  { %392 = vmatpush.msrb.mxu3 %v369_v25  ;;  %344 = vmatpush.msrb.mxu2 %v2506_v14  ;;  %v3626_v25 = vld [vmem:[%s6253_s5 + $0x148] sm:$0xff]  ;;  %6427 = vst [vmem:[#allocation11_spill] sm:$0xff] %v3797_v6 }
  0x42   :  { %265 = vmatpush.msrb.mxu0 %v159_v27  ;;  %304 = vmatpush.msrb.mxu1 %v2486_v38  ;;  %v3635_v27 = vld [vmem:[%s6253_s5 + $0x140] sm:$0xff]  ;;  %v3810_v14 = vld [vmem:[%s6253_s5 + $0x188] sm:$0xff] }
  0x43   :  { %393 = vmatpush.msrb.mxu3 %v368_v28  ;;  %345 = vmatpush.msrb.mxu2 %v2505_v17  ;;  %6428 = vst [vmem:[#allocation12_spill] sm:$0xff] %v3810_v14  ;;  %v3822_v17 = vld [vmem:[%s6258_s10 + $0x1e0] sm:$0xff] }
  0x44   :  { %266 = vmatpush.msrb.mxu0 %v158_v30  ;;  %305 = vmatpush.msrb.mxu1 %v2485_v41 }
  0x45   :  { %394 = vmatpush.msrb.mxu3 %v367_v31  ;;  %346 = vmatpush.msrb.mxu2 %v2504_v20  ;;  %v3644_v31 = vld [vmem:[%s6253_s5 + $0x138] sm:$0xff]  ;;  %v3832_v20 = vld [vmem:[%s6258_s10 + $0x1f0] sm:$0xff] }
  0x46   :  { %267 = vmatpush.msrb.mxu0 %v157_v33  ;;  %306 = vmatpush.msrb.mxu1 %v2484_v47  ;;  %v3653_v33 = vld [vmem:[%s6253_s5 + $0x130] sm:$0xff]  ;;  %v3681_v47 = vld [vmem:[%s6253_s5 + $0x120] sm:$0xff]  ;;  %6430 = vst [vmem:[#allocation14_spill] sm:$0xff] %v3832_v20 }
  0x47   :  { %395 = vmatpush.msrb.mxu3 %v366_v34  ;;  %347 = vmatpush.msrb.mxu2 %v2503_v23  ;;  %v3844_v23 = vld [vmem:[%s6258_s10 + $0x1c8] sm:$0xff] }
  0x48   :  { %268 = vmatpush.msrb.mxu0 %v156_v36  ;;  %307 = vmatpush.msrb.mxu1 %v2483_v53  ;;  %v3662_v36 = vld [vmem:[%s6253_s5 + $0x128] sm:$0xff]  ;;  %v3711_v53 = vld [vmem:[%s6253_s5 + $0x100] sm:$0xff] }
  0x49   :  { %396 = vmatpush.msrb.mxu3 %v365_v37  ;;  %348 = vmatpush.msrb.mxu2 %v2502_v26  ;;  %v2498_v37 = vld [vmem:[%s6253_s5 + $0x720] sm:$0xff]  ;;  %6426 = vst [vmem:[#allocation10_spill] sm:$0xff] %v3711_v53 }
  0x4a   :  { %269 = vmatpush.msrb.mxu0 %v155_v39  ;;  %308 = vmatpush.msrb.mxu1 %v2482_v55  ;;  %v3722_v55 = vld [vmem:[%s6253_s5 + $0x1f0] sm:$0xff]  ;;  %v3855_v26 = vld [vmem:[%s6258_s10 + $0x1a0] sm:$0xff] }
  0x4b   :  { %397 = vmatpush.msrb.mxu3 %v364_v40  ;;  %349 = vmatpush.msrb.mxu2 %v2501_v29  ;;  %v2497_v40 = vld [vmem:[%s6253_s5 + $0x718] sm:$0xff]  ;;  %v3867_v29 = vld [vmem:[%s6258_s10 + $0x1b0] sm:$0xff] }
  0x4c   :  { %270 = vmatpush.msrb.mxu0 %v154_v42  ;;  %309 = vmatpush.msrb.mxu1 %v2481_v57  ;;  %v2883_v42 = vld [vmem:[%s6254_s6] ss:$0 sm:$0xff]  ;;  %6432 = vst [vmem:[#allocation16_spill] sm:$0xff] %v3867_v29 }
  0x4d   :  { %398 = vmatpush.msrb.mxu3 %v363_v43  ;;  %271 = vmatmul.f32.vlgmr.msrb.gmra.mxu0 %v89_v44  ;;  %v3734_v57 = vld [vmem:[%s6253_s5 + $0x1e0] sm:$0xff] }
  0x4e   :  { %399 = vmatmul.f32.vlgmr.msrb.gmra.mxu3 %v362_v45  ;;  %426 = vmatpush.msra.mxu0 %v2526_v46  ;;  %v2496_v46 = vld [vmem:[%s6253_s5 + $0x710] sm:$0xff] }
  0x4f   :  { %310 = vmatpush.msrb.mxu1 %v2480_v59  ;;  %350 = vmatpush.msrb.mxu2 %v2500_v32  ;;  %v3746_v59 = vld [vmem:[%s6253_s5 + $0x1d0] sm:$0xff]  ;;  %v3879_v32 = vld [vmem:[%s6258_s10 + $0x180] sm:$0xff] }
  0x50   :  { %427 = vmatpush.msra.mxu0 %v2525_v48  ;;  %v2495_v48 = vld [vmem:[%s6253_s5 + $0x708] sm:$0xff]  ;;  %687 = vmatpush.msra.mxu3 %v3822_v17 }
  0x51   :  { %311 = vmatpush.msrb.mxu1 %v2479_v61  ;;  %351 = vmatpush.msrb.mxu2 %v2499_v35  ;;  %v3758_v61 = vld [vmem:[%s6253_s5 + $0x1c0] sm:$0xff]  ;;  %v3889_v35 = vld [vmem:[%s6258_s10 + $0x1d8] sm:$0xff] }
  0x52   :  { %428 = vmatpush.msra.mxu0 %v2524_v49  ;;  %v3690_v49 = vld [vmem:[%s6253_s5 + $0x118] sm:$0xff]  ;;  %6434 = vst [vmem:[#allocation18_spill] sm:$0xff] %v3889_v35 }
  0x53   :  { %312 = vmatpush.msrb.mxu1 %v2478_v63  ;;  %352 = vmatpush.msrb.mxu2 %v2498_v37  ;;  %v3770_v63 = vld [vmem:[%s6253_s5 + $0x1b0] sm:$0xff] }
  0x54   :  { %429 = vmatpush.msra.mxu0 %v2523_v50  ;;  %v2494_v50 = vld [vmem:[%s6253_s5 + $0x700] sm:$0xff]  ;;  %v3896_v37 = vld [vmem:[%s6258_s10 + $0x190] sm:$0xff] }
  0x55   :  { %313 = vmatpush.msrb.mxu1 %v2477_v1  ;;  %353 = vmatpush.msrb.mxu2 %v2497_v40  ;;  %v2884_v1 = vld [vmem:[%s6254_s6 + $0x10] ss:$0 sm:$0xff]  ;;  %6435 = vst [vmem:[#allocation19_spill] sm:$0xff] %v3896_v37  ;;  %v3913_v40 = vld [vmem:[%s6258_s10 + $0x168] sm:$0xff] }
  0x56   :  { %430 = vmatpush.msra.mxu0 %v2522_v51  ;;  %v3699_v51 = vld [vmem:[%s6253_s5 + $0x110] sm:$0xff] }
  0x57   :  { %622 = vmatpush.msra.mxu1 %v3573_v8  ;;  %354 = vmatpush.msrb.mxu2 %v2496_v46  ;;  %6424 = vst [vmem:[#allocation8_spill] sm:$0xff] %v3699_v51  ;;  %v3949_v46 = vld [vmem:[%s6258_s10 + $0x178] sm:$0xff] }
  0x58   :  { %431 = vmatpush.msra.mxu0 %v2521_v52  ;;  %v3705_v52 = vld [vmem:[%s6253_s5 + $0x108] sm:$0xff]  ;;  %6440 = vst [vmem:[#allocation24_spill] sm:$0xff] %v3949_v46 }
  0x59   :  { %623 = vmatpush.msra.mxu1 %v3578_v9  ;;  %355 = vmatpush.msrb.mxu2 %v2495_v48  ;;  %6425 = vst [vmem:[#allocation9_spill] sm:$0xff] %v3705_v52  ;;  %v3956_v48 = vld [vmem:[%s6258_s10 + $0x120] sm:$0xff] }
  0x5a   :  { %432 = vmatpush.msra.mxu0 %v2520_v54  ;;  %v3717_v54 = vld [vmem:[%s6253_s5 + $0x1f8] sm:$0xff] }
  0x5b   :  { %624 = vmatpush.msra.mxu1 %v3590_v13  ;;  %356 = vmatpush.msrb.mxu2 %v2494_v50  ;;  %v3961_v50 = vld [vmem:[%s6258_s10 + $0x128] sm:$0xff] }
  0x5c   :  { %433 = vmatpush.msra.mxu0 %v2519_v56  ;;  %v3728_v56 = vld [vmem:[%s6253_s5 + $0x1e8] sm:$0xff] }
  0x5d   :  { %625 = vmatpush.msra.mxu1 %v3599_v15  ;;  %648 = vmatpush.msra.mxu2 %v3717_v54 }
  0x5e   :  { %434 = vmatpush.msra.mxu0 %v2518_v58  ;;  %v3740_v58 = vld [vmem:[%s6253_s5 + $0x1d8] sm:$0xff] }
  0x5f   :  { %626 = vmatpush.msra.mxu1 %v3608_v19  ;;  %649 = vmatpush.msra.mxu2 %v3722_v55 }
  0x60   :  { %435 = vmatpush.msra.mxu0 %v2517_v60  ;;  %v3752_v60 = vld [vmem:[%s6253_s5 + $0x1c8] sm:$0xff] }
  0x61   :  { %627 = vmatpush.msra.mxu1 %v3617_v21  ;;  %650 = vmatpush.msra.mxu2 %v3728_v56 }
  0x62   :  { %436 = vmatpush.msra.mxu0 %v2516_v62  ;;  %v3764_v62 = vld [vmem:[%s6253_s5 + $0x1b8] sm:$0xff] }
  0x63   :  { %628 = vmatpush.msra.mxu1 %v3626_v25  ;;  %651 = vmatpush.msra.mxu2 %v3734_v57 }
  0x64   :  { %437 = vmatpush.msra.mxu0 %v2515_v0  ;;  %v3776_v0 = vld [vmem:[%s6253_s5 + $0x1a8] sm:$0xff] }
  0x65   :  { %629 = vmatpush.msra.mxu1 %v3635_v27  ;;  %652 = vmatpush.msra.mxu2 %v3740_v58 }
  0x66   :  { %438 = vmatpush.msra.mxu0 %v2514_v2  ;;  %v3785_v2 = vld [vmem:[%s6253_s5 + $0x1a0] sm:$0xff] }
  0x67   :  { %630 = vmatpush.msra.mxu1 %v3644_v31  ;;  %653 = vmatpush.msra.mxu2 %v3746_v59 }
  0x68   :  { %439 = vmatpush.msra.mxu0 %v2513_v3  ;;  %v3791_v3 = vld [vmem:[%s6253_s5 + $0x198] sm:$0xff] }
  0x69   :  { %631 = vmatpush.msra.mxu1 %v3653_v33  ;;  %654 = vmatpush.msra.mxu2 %v3752_v60 }
  0x6a   :  { %440 = vmatpush.msra.mxu0 %v2512_v4 }
  0x6b   :  { %632 = vmatpush.msra.mxu1 %v3662_v36  ;;  %655 = vmatpush.msra.mxu2 %v3758_v61 }
  0x6c   :  { %441 = vmatpush.msra.mxu0 %v2511_v5 }
  0x6d   :  { %633 = vmatpush.msra.mxu1 %v3681_v47  ;;  %656 = vmatpush.msra.mxu2 %v3764_v62 }
  0x6f   :  { %634 = vmatpush.msra.mxu1 %v3690_v49  ;;  %657 = vmatpush.msra.mxu2 %v3770_v63 }
  0x71   :  { %635 = vmatpush.msra.mxu1 %v3699_v51  ;;  %658 = vmatpush.msra.mxu2 %v3776_v0  ;;  %v4237_v51 = vld [vmem:[#allocation4 + $0x68] sm:$0xff] }
  0x72   :  { %6479 = vst [vmem:[#allocation63_spill] sm:$0xff] %v4237_v51 }
  0x73   :  { %636 = vmatpush.msra.mxu1 %v3705_v52  ;;  %659 = vmatpush.msra.mxu2 %v3785_v2  ;;  %v4170_v52 = vld [vmem:[%s6258_s10 + $0x30] sm:$0xff] }
  0x74   :  { %6463 = vst [vmem:[#allocation47_spill] sm:$0xff] %v4170_v52 }
  0x75   :  { %637 = vmatpush.msra.mxu1 %v3711_v53  ;;  %660 = vmatpush.msra.mxu2 %v3791_v3 }
  0x77   :  { %661 = vmatpush.msra.mxu2 %v3797_v6  ;;  %v4229_v6 = vld [vmem:[#allocation4 + $0xf0] sm:$0xff] }
  0x78   :  { %6476 = vst [vmem:[#allocation60_spill] sm:$0xff] %v4229_v6 }
  0x79   :  { %662 = vmatpush.msra.mxu2 %v3810_v14  ;;  %v4165_v14 = vld [vmem:[%s6258_s10 + $0x28] sm:$0xff] }
  0x7a   :  { %6462 = vst [vmem:[#allocation46_spill] sm:$0xff] %v4165_v14 }
  0xb0   :  { %v192_v12 = vpop.f32.mrf.mxu0 }
  0xb1   :  { %v193_v16 = vadd.f32 %v2882_v10, %v192_v12  ;;  %v2885_v10 = vld [vmem:[%s6254_s6 + $0x1] ss:$0 sm:$0xff] }
  0xb2   :  { %v212_v18 = vpop.f32.mrf.mxu1 }
  0xb3   :  { %v213_v22 = vadd.f32 %v212_v18, %v193_v16  ;;  %v3816_v16 = vld [vmem:[%s6253_s5 + $0x180] sm:$0xff]  ;;  %v3827_v18 = vld [vmem:[%s6258_s10 + $0x1e8] sm:$0xff] }
  0xb4   :  { %v232_v24 = vpop.f32.mrf.mxu2  ;;  %6429 = vst [vmem:[#allocation13_spill] sm:$0xff] %v3816_v16  ;;  %663 = vmatpush.msra.mxu2 %v3816_v16  ;;  %710 = vmatpush.msrb.mxu0 %v3827_v18 }
  0xb5   :  { %v233_v28 = vadd.f32 %v232_v24, %v213_v22  ;;  %v252_v30 = vpop.f32.mrf.mxu3  ;;  %v3839_v22 = vld [vmem:[%s6258_s10 + $0x1c0] sm:$0xff]  ;;  %v3849_v24 = vld [vmem:[%s6258_s10 + $0x1d0] sm:$0xff] }
  0xb6   :  { %6431 = vst [vmem:[#allocation15_spill] sm:$0xff] %v3849_v24  ;;  %688 = vmatpush.msra.mxu3 %v3839_v22  ;;  %711 = vmatpush.msrb.mxu0 %v3844_v23 }
  0xb7   :  { %v253_v34 = vadd.f32 %v252_v30, %v233_v28  ;;  %v3860_v28 = vld [vmem:[%s6258_s10 + $0x1a8] sm:$0xff]  ;;  %v3872_v30 = vld [vmem:[%s6258_s10 + $0x1f8] sm:$0xff] }
  0xb8   :  { %6433 = vst [vmem:[#allocation17_spill] sm:$0xff] %v3872_v30  ;;  %689 = vmatpush.msra.mxu3 %v3855_v26  ;;  %712 = vmatpush.msrb.mxu0 %v3860_v28 }
  0xba   :  { %690 = vmatpush.msra.mxu3 %v3879_v32 }
  0xca   :  { %v272_v38 = vpop.f32.mrf.mxu0 }
  0xcb   :  { %v273_v39 = vadd.f32 %v272_v38, %v253_v34  ;;  %v3884_v34 = vld [vmem:[%s6258_s10 + $0x188] sm:$0xff]  ;;  %v3901_v38 = vld [vmem:[%s6258_s10 + $0x1b8] sm:$0xff] }
  0xcc   :  { %6436 = vst [vmem:[#allocation20_spill] sm:$0xff] %v3901_v38  ;;  %713 = vmatpush.msrb.mxu0 %v3884_v34 }
  0xcd   :  { %v275_v41 = vmax.f32 %v273_v39, 0.0  ;;  %v3908_v39 = vld [vmem:[%s6258_s10 + $0x160] sm:$0xff] }
  0xce   :  { %691 = vmatpush.msra.mxu3 %v3908_v39  ;;  %714 = vmatpush.msrb.mxu0 %v3913_v40 }
  0xcf   :  { %314 = vmatmul.f32.vlgmr.msrb.gmra.mxu1 %v275_v41  ;;  %v3920_v41 = vld [vmem:[%s6258_s10 + $0x170] sm:$0xff] }
  0xd0   :  { %733 = vmatpush.msrb.mxu1 %v3832_v20  ;;  %6437 = vst [vmem:[#allocation21_spill] sm:$0xff] %v3920_v41 }
  0xd1   :  { %v400_v43 = vpop.f32.mrf.mxu3 }
  0xd2   :  { %v401_v44 = vadd.f32 %v2883_v42, %v400_v43  ;;  %734 = vmatpush.msrb.mxu1 %v3849_v24  ;;  %v3925_v42 = vld [vmem:[%s6258_s10 + $0x198] sm:$0xff]  ;;  %v3932_v43 = vld [vmem:[%s6258_s10 + $0x140] sm:$0xff]  ;;  %v2888_v24 = vld [vmem:[%s6254_s6 + $0x11] ss:$0 sm:$0xff] }
  0xd3   :  { %6438 = vst [vmem:[#allocation22_spill] sm:$0xff] %v3925_v42  ;;  %692 = vmatpush.msra.mxu3 %v3932_v43 }
  0xd4   :  { %v403_v45 = vmax.f32 %v401_v44, 0.0  ;;  %735 = vmatpush.msrb.mxu1 %v3867_v29  ;;  %v3937_v44 = vld [vmem:[%s6258_s10 + $0x148] sm:$0xff]  ;;  %v4076_v29 = vld [vmem:[%s6258_s10 + $0x80] sm:$0xff] }
  0xd5   :  { %715 = vmatpush.msrb.mxu0 %v3937_v44  ;;  %693 = vmatpush.msra.mxu3 %v3956_v48 }
  0xd6   :  { %442 = vmatmul.f32.vlgmr.msra.gmra.mxu0 %v403_v45  ;;  %736 = vmatpush.msrb.mxu1 %v3896_v37  ;;  %v3944_v45 = vld [vmem:[%s6258_s10 + $0x150] sm:$0xff]  ;;  %v4052_v37 = vld [vmem:[%s6258_s10 + $0xa0] sm:$0xff] }
  0xd7   :  { %6439 = vst [vmem:[#allocation23_spill] sm:$0xff] %v3944_v45  ;;  %716 = vmatpush.msrb.mxu0 %v3961_v50 }
  0xd8   :  { %737 = vmatpush.msrb.mxu1 %v3920_v41  ;;  %v4028_v41 = vld [vmem:[%s6258_s10 + $0xc0] sm:$0xff] }
  0xda   :  { %738 = vmatpush.msrb.mxu1 %v3944_v45  ;;  %v4004_v45 = vld [vmem:[%s6258_s10 + $0xe0] sm:$0xff] }
 0x14c   :  { %v315_v4 = vpop.f32.mrf.mxu1 }
 0x14d   :  { %v316_v5 = vadd.f32 %v2884_v1, %v315_v4  ;;  %v3968_v1 = vld [vmem:[%s6258_s10 + $0x130] sm:$0xff]  ;;  %v3973_v4 = vld [vmem:[%s6258_s10 + $0x158] sm:$0xff] }
 0x14e   :  { %6441 = vst [vmem:[#allocation25_spill] sm:$0xff] %v3968_v1  ;;  %739 = vmatpush.msrb.mxu1 %v3968_v1  ;;  %v4016_v1 = vld [vmem:[%s6258_s10 + $0xf0] sm:$0xff] }
 0x14f   :  { %v318_v7 = vmax.f32 %v316_v5, 0.0  ;;  %6442 = vst [vmem:[#allocation26_spill] sm:$0xff] %v3973_v4  ;;  %v3980_v5 = vld [vmem:[%s6258_s10 + $0x100] sm:$0xff] }
 0x150   :  { %694 = vmatpush.msra.mxu3 %v3980_v5  ;;  %6445 = vst [vmem:[#allocation29_spill] sm:$0xff] %v4016_v1 }
 0x151   :  { %357 = vmatmul.f32.vlgmr.msrb.gmra.mxu2 %v318_v7  ;;  %v3985_v7 = vld [vmem:[%s6258_s10 + $0x108] sm:$0xff] }
 0x152   :  { %756 = vmatpush.msrb.mxu2 %v3872_v30  ;;  %717 = vmatpush.msrb.mxu0 %v3985_v7 }
 0x153   :  { %v443_v11 = vpop.f32.mrf.mxu0  ;;  %695 = vmatpush.msra.mxu3 %v4004_v45 }
 0x154   :  { %v3804_v12 = vadd.f32 %v2885_v10, %v443_v11  ;;  %757 = vmatpush.msrb.mxu2 %v3889_v35  ;;  %v3992_v10 = vld [vmem:[%s6258_s10 + $0x110] sm:$0xff]  ;;  %v3997_v11 = vld [vmem:[%s6258_s10 + $0x138] sm:$0xff]  ;;  %v4081_v35 = vld [vmem:[%s6258_s10 + $0x88] sm:$0xff] }
 0x155   :  { %6443 = vst [vmem:[#allocation27_spill] sm:$0xff] %v3992_v10  ;;  %740 = vmatpush.msrb.mxu1 %v3992_v10  ;;  %v4040_v10 = vld [vmem:[%s6258_s10 + $0xd0] sm:$0xff]  ;;  %696 = vmatpush.msra.mxu3 %v4028_v41 }
 0x156   :  { %638 = vmatmul.f32.vlgmr.msra.gmra.mxu1 %v3804_v12  ;;  %758 = vmatpush.msrb.mxu2 %v3901_v38  ;;  %6444 = vst [vmem:[#allocation28_spill] sm:$0xff] %v3997_v11  ;;  %v4057_v38 = vld [vmem:[%s6258_s10 + $0xa8] sm:$0xff] }
 0x157   :  { %6447 = vst [vmem:[#allocation31_spill] sm:$0xff] %v4040_v10  ;;  %741 = vmatpush.msrb.mxu1 %v4016_v1  ;;  %v4064_v1 = vld [vmem:[%s6258_s10 + $0xb0] sm:$0xff]  ;;  %697 = vmatpush.msra.mxu3 %v4052_v37 }
 0x158   :  { %759 = vmatpush.msrb.mxu2 %v3925_v42  ;;  %v4033_v42 = vld [vmem:[%s6258_s10 + $0xc8] sm:$0xff]  ;;  %6449 = vst [vmem:[#allocation33_spill] sm:$0xff] %v4064_v1 }
 0x159   :  { %742 = vmatpush.msrb.mxu1 %v4040_v10  ;;  %v4088_v10 = vld [vmem:[%s6258_s10 + $0x90] sm:$0xff]  ;;  %698 = vmatpush.msra.mxu3 %v4076_v29 }
 0x15a   :  { %760 = vmatpush.msrb.mxu2 %v3949_v46  ;;  %v4009_v46 = vld [vmem:[%s6258_s10 + $0xe8] sm:$0xff]  ;;  %6451 = vst [vmem:[#allocation35_spill] sm:$0xff] %v4088_v10 }
 0x15b   :  { %718 = vmatpush.msrb.mxu0 %v4009_v46  ;;  %743 = vmatpush.msrb.mxu1 %v4064_v1 }
 0x15c   :  { %761 = vmatpush.msrb.mxu2 %v3973_v4  ;;  %v4021_v4 = vld [vmem:[%s6258_s10 + $0x118] sm:$0xff] }
 0x15d   :  { %6446 = vst [vmem:[#allocation30_spill] sm:$0xff] %v4021_v4  ;;  %719 = vmatpush.msrb.mxu0 %v4033_v42  ;;  %744 = vmatpush.msrb.mxu1 %v4088_v10  ;;  %v4117_v10 = vld [vmem:[%s6258_s10 + $0x68] sm:$0xff] }
 0x15e   :  { %762 = vmatpush.msrb.mxu2 %v3997_v11  ;;  %v4045_v11 = vld [vmem:[%s6258_s10 + $0xf8] sm:$0xff]  ;;  %6454 = vst [vmem:[#allocation38_spill] sm:$0xff] %v4117_v10 }
 0x15f   :  { %6448 = vst [vmem:[#allocation32_spill] sm:$0xff] %v4045_v11  ;;  %720 = vmatpush.msrb.mxu0 %v4057_v38 }
 0x160   :  { %763 = vmatpush.msrb.mxu2 %v4021_v4  ;;  %v4069_v4 = vld [vmem:[%s6258_s10 + $0xd8] sm:$0xff] }
 0x161   :  { %6450 = vst [vmem:[#allocation34_spill] sm:$0xff] %v4069_v4  ;;  %721 = vmatpush.msrb.mxu0 %v4081_v35 }
 0x162   :  { %764 = vmatpush.msrb.mxu2 %v4045_v11  ;;  %v4093_v11 = vld [vmem:[%s6254_s6 + $0x2] ss:$0 sm:$0xff] }
 0x163   :  { %6452 = vst [vmem:[#allocation36_spill] sm:$0xff] %v4093_v11  ;;  %722 = vmatpush.msrb.mxu0 %v4117_v10  ;;  %v4245_v10 = vld [vmem:[#allocation4 + $0x1e8] sm:$0xff] }
 0x164   :  { %765 = vmatpush.msrb.mxu2 %v4069_v4  ;;  %v4112_v4 = vld [vmem:[%s6258_s10 + $0x60] sm:$0xff]  ;;  %6482 = vst [vmem:[#allocation66_spill] sm:$0xff] %v4245_v10 }
 0x165   :  { %6453 = vst [vmem:[#allocation37_spill] sm:$0xff] %v4112_v4  ;;  %699 = vmatpush.msra.mxu3 %v4112_v4  ;;  %v4261_v4 = vld [vmem:[#allocation4 + $0x58] sm:$0xff] }
 0x166   :  { %6487 = vst [vmem:[#allocation71_spill] sm:$0xff] %v4261_v4 }
 0x1d3   :  { %v639_v30 = vpop.f32.mrf.mxu1 }
 0x1d4   :  { %v640_v20 = vadd.f32 %v4093_v11, %v639_v30  ;;  %v358_v16 = vpop.f32.mrf.mxu2  ;;  %v4141_v30 = vld [vmem:[%s6258_s10 + $0x48] sm:$0xff] }
 0x1d5   :  { %v4104_v53 = vadd.f32 %v2888_v24, %v358_v16  ;;  %v4122_v16 = vld [vmem:[%s6258_s10 + $0x70] sm:$0xff]  ;;  %v4136_v24 = vld [vmem:[%s6258_s10 + $0x40] sm:$0xff]  ;;  %6458 = vst [vmem:[#allocation42_spill] sm:$0xff] %v4141_v30  ;;  %723 = vmatpush.msrb.mxu0 %v4141_v30  ;;  %v4219_v30 = vld [vmem:[#allocation4 + $0xf8] sm:$0xff] }
 0x1d6   :  { %664 = vmatmul.f32.vlgmr.msra.gmra.mxu2 %v640_v20  ;;  %6455 = vst [vmem:[#allocation39_spill] sm:$0xff] %v4122_v16  ;;  %v4129_v20 = vld [vmem:[%s6258_s10 + $0xb8] sm:$0xff]  ;;  %745 = vmatpush.msrb.mxu1 %v4122_v16 }
 0x1d7   :  { %v6291_v1 = vmax.f32 %v4104_v53, 0.0  ;;  %6456 = vst [vmem:[#allocation40_spill] sm:$0xff] %v4129_v20  ;;  %766 = vmatpush.msrb.mxu2 %v4129_v20  ;;  %700 = vmatpush.msra.mxu3 %v4136_v24  ;;  %v4153_v16 = vld [vmem:[%s6258_s10 + $0x98] sm:$0xff]  ;;  %v4160_v20 = vld [vmem:[%s6258_s10 + $0x20] sm:$0xff] }
 0x1d8   :  { %6457 = vst [vmem:[#allocation41_spill] sm:$0xff] %v4136_v24  ;;  %724 = vmatpush.msrb.mxu0 %v4165_v14  ;;  %v4194_v14 = vld [vmem:[%s6258_s10 + $0x10] sm:$0xff] }
 0x1d9   :  { %641 = vmatmul.f32.gmra.mxu1 %v6291_v1  ;;  %v4148_v1 = vld [vmem:[%s6258_s10 + $0x50] sm:$0xff]  ;;  %6460 = vst [vmem:[#allocation44_spill] sm:$0xff] %v4153_v16  ;;  %767 = vmatpush.msrb.mxu2 %v4153_v16  ;;  %v4184_v16 = vld [vmem:[%s6258_s10] sm:$0xff] }
 0x1da   :  { %6459 = vst [vmem:[#allocation43_spill] sm:$0xff] %v4148_v1  ;;  %746 = vmatpush.msrb.mxu1 %v4148_v1  ;;  %701 = vmatpush.msra.mxu3 %v4160_v20  ;;  %v4177_v1 = vld [vmem:[%s6258_s10 + $0x78] sm:$0xff]  ;;  %v4227_v24 = vld [vmem:[#allocation4 + $0x70] sm:$0xff] }
 0x1db   :  { %6461 = vst [vmem:[#allocation45_spill] sm:$0xff] %v4160_v20  ;;  %768 = vmatpush.msrb.mxu2 %v4177_v1  ;;  %v4189_v20 = vld [vmem:[%s6258_s10 + $0x8] sm:$0xff] }
 0x1dc   :  { %6464 = vst [vmem:[#allocation48_spill] sm:$0xff] %v4177_v1  ;;  %747 = vmatpush.msrb.mxu1 %v4170_v52  ;;  %702 = vmatpush.msra.mxu3 %v4184_v16  ;;  %v4201_v52 = vld [vmem:[%s6258_s10 + $0x58] sm:$0xff] }
 0x1dd   :  { %6465 = vst [vmem:[#allocation49_spill] sm:$0xff] %v4184_v16  ;;  %725 = vmatpush.msrb.mxu0 %v4189_v20  ;;  %769 = vmatpush.msrb.mxu2 %v4201_v52  ;;  %v4208_v1 = vld [vmem:[%s6258_s10 + $0x38] sm:$0xff] }
 0x1de   :  { %6466 = vst [vmem:[#allocation50_spill] sm:$0xff] %v4189_v20  ;;  %748 = vmatpush.msrb.mxu1 %v4194_v14  ;;  %v4213_v16 = vld [vmem:[%s6258_s10 + $0x18] sm:$0xff] }
 0x1df   :  { %6467 = vst [vmem:[#allocation51_spill] sm:$0xff] %v4194_v14  ;;  %770 = vmatpush.msrb.mxu2 %v4208_v1  ;;  %v4217_v20 = vld [vmem:[#allocation4 + $0x78] sm:$0xff]  ;;  %813 = vmatpush.msra.mxu0 %v4219_v30 }
 0x1e0   :  { %6468 = vst [vmem:[#allocation52_spill] sm:$0xff] %v4201_v52  ;;  %v4221_v14 = vld [vmem:[#allocation4 + $0x178] sm:$0xff]  ;;  %790 = vmatpush.msrb.mxu3 %v4217_v20 }
 0x1e1   :  { %6469 = vst [vmem:[#allocation53_spill] sm:$0xff] %v4208_v1  ;;  %771 = vmatpush.msrb.mxu2 %v4213_v16  ;;  %v4225_v52 = vld [vmem:[#allocation4 + $0x1f8] sm:$0xff]  ;;  %836 = vmatpush.msra.mxu1 %v4221_v14  ;;  %v4235_v1 = vld [vmem:[#allocation4 + $0x1f0] sm:$0xff] }
 0x1e2   :  { %6470 = vst [vmem:[#allocation54_spill] sm:$0xff] %v4213_v16  ;;  %v4233_v16 = vld [vmem:[#allocation4 + $0x170] sm:$0xff]  ;;  %791 = vmatpush.msrb.mxu3 %v4227_v24  ;;  %814 = vmatpush.msra.mxu0 %v4229_v6  ;;  %v4257_v6 = vld [vmem:[#allocation4 + $0x1e0] sm:$0xff] }
 0x1e3   :  { %6471 = vst [vmem:[#allocation55_spill] sm:$0xff] %v4217_v20  ;;  %859 = vmatpush.msra.mxu2 %v4225_v52  ;;  %v4243_v20 = vld [vmem:[#allocation4 + $0x168] sm:$0xff]  ;;  %837 = vmatpush.msra.mxu1 %v4233_v16 }
 0x1e4   :  { %6472 = vst [vmem:[#allocation56_spill] sm:$0xff] %v4219_v30  ;;  %v4241_v30 = vld [vmem:[#allocation4 + $0xe8] sm:$0xff]  ;;  %792 = vmatpush.msrb.mxu3 %v4237_v51  ;;  %v4269_v51 = vld [vmem:[#allocation4 + $0x1d8] sm:$0xff] }
 0x1e5   :  { %6473 = vst [vmem:[#allocation57_spill] sm:$0xff] %v4221_v14  ;;  %860 = vmatpush.msra.mxu2 %v4235_v1  ;;  %v4251_v14 = vld [vmem:[#allocation4 + $0xe0] sm:$0xff]  ;;  %815 = vmatpush.msra.mxu0 %v4241_v30 }
 0x1e6   :  { %6474 = vst [vmem:[#allocation58_spill] sm:$0xff] %v4225_v52  ;;  %v4249_v52 = vld [vmem:[#allocation4 + $0x60] sm:$0xff]  ;;  %838 = vmatpush.msra.mxu1 %v4243_v20 }
 0x1e7   :  { %6475 = vst [vmem:[#allocation59_spill] sm:$0xff] %v4227_v24  ;;  %v4255_v24 = vld [vmem:[#allocation4 + $0x160] sm:$0xff]  ;;  %861 = vmatpush.msra.mxu2 %v4245_v10  ;;  %793 = vmatpush.msrb.mxu3 %v4249_v52  ;;  %v4279_v10 = vld [vmem:[#allocation4 + $0x150] sm:$0xff] }
 0x1e8   :  { %6477 = vst [vmem:[#allocation61_spill] sm:$0xff] %v4233_v16  ;;  %v4263_v16 = vld [vmem:[#allocation4 + $0xd8] sm:$0xff]  ;;  %816 = vmatpush.msra.mxu0 %v4251_v14  ;;  %839 = vmatpush.msra.mxu1 %v4255_v24 }
 0x1e9   :  { %6478 = vst [vmem:[#allocation62_spill] sm:$0xff] %v4235_v1  ;;  %v4267_v1 = vld [vmem:[#allocation4 + $0x158] sm:$0xff]  ;;  %862 = vmatpush.msra.mxu2 %v4257_v6  ;;  %794 = vmatpush.msrb.mxu3 %v4261_v4  ;;  %v4293_v4 = vld [vmem:[#allocation4 + $0x1c8] sm:$0xff] }
 0x1ea   :  { %6480 = vst [vmem:[#allocation64_spill] sm:$0xff] %v4241_v30  ;;  %v4273_v30 = vld [vmem:[#allocation4 + $0x50] sm:$0xff]  ;;  %817 = vmatpush.msra.mxu0 %v4263_v16  ;;  %840 = vmatpush.msra.mxu1 %v4267_v1 }
 0x1eb   :  { %6481 = vst [vmem:[#allocation65_spill] sm:$0xff] %v4243_v20  ;;  %v4275_v20 = vld [vmem:[#allocation4 + $0xd0] sm:$0xff]  ;;  %863 = vmatpush.msra.mxu2 %v4269_v51  ;;  %795 = vmatpush.msrb.mxu3 %v4273_v30 }
 0x1ec   :  { %6483 = vst [vmem:[#allocation67_spill] sm:$0xff] %v4249_v52  ;;  %v4281_v52 = vld [vmem:[#allocation4 + $0x1d0] sm:$0xff]  ;;  %818 = vmatpush.msra.mxu0 %v4275_v20  ;;  %841 = vmatpush.msra.mxu1 %v4279_v10 }
 0x1ed   :  { %6484 = vst [vmem:[#allocation68_spill] sm:$0xff] %v4251_v14  ;;  %v4285_v14 = vld [vmem:[#allocation4 + $0x48] sm:$0xff]  ;;  %864 = vmatpush.msra.mxu2 %v4281_v52 }
 0x1ee   :  { %6485 = vst [vmem:[#allocation69_spill] sm:$0xff] %v4255_v24  ;;  %v4287_v24 = vld [vmem:[#allocation4 + $0xc8] sm:$0xff]  ;;  %796 = vmatpush.msrb.mxu3 %v4285_v14 }
 0x1ef   :  { %6486 = vst [vmem:[#allocation70_spill] sm:$0xff] %v4257_v6  ;;  %v4291_v6 = vld [vmem:[#allocation4 + $0x148] sm:$0xff]  ;;  %819 = vmatpush.msra.mxu0 %v4287_v24  ;;  %865 = vmatpush.msra.mxu2 %v4293_v4 }
 0x1f0   :  { %6488 = vst [vmem:[#allocation72_spill] sm:$0xff] %v4263_v16  ;;  %v4297_v16 = vld [vmem:[#allocation4 + $0x40] sm:$0xff]  ;;  %842 = vmatpush.msra.mxu1 %v4291_v6 }
 0x1f1   :  { %6489 = vst [vmem:[#allocation73_spill] sm:$0xff] %v4267_v1  ;;  %v4299_v1 = vld [vmem:[#allocation4 + $0xc0] sm:$0xff]  ;;  %797 = vmatpush.msrb.mxu3 %v4297_v16 }
 0x1f2   :  { %6490 = vst [vmem:[#allocation74_spill] sm:$0xff] %v4269_v51  ;;  %v4303_v51 = vld [vmem:[#allocation4 + $0x140] sm:$0xff]  ;;  %820 = vmatpush.msra.mxu0 %v4299_v1 }
 0x1f3   :  { %6491 = vst [vmem:[#allocation75_spill] sm:$0xff] %v4273_v30  ;;  %v4305_v30 = vld [vmem:[#allocation4 + $0x1c0] sm:$0xff]  ;;  %843 = vmatpush.msra.mxu1 %v4303_v51 }
 0x1f4   :  { %6492 = vst [vmem:[#allocation76_spill] sm:$0xff] %v4279_v10  ;;  %866 = vmatpush.msra.mxu2 %v4305_v30  ;;  %v4321_v10 = vld [vmem:[%s6254_s6 + $0x3] ss:$0 sm:$0xff] }
 0x1f5   :  { %6493 = vst [vmem:[#allocation77_spill] sm:$0xff] %v4281_v52  ;;  %v4316_v52 = vld [vmem:[%s6254_s6 + $0x5] ss:$0 sm:$0xff] }
 0x1f6   :  { %6494 = vst [vmem:[#allocation78_spill] sm:$0xff] %v4287_v24  ;;  %v4333_v24 = vld [vmem:[#allocation4 + $0x38] sm:$0xff] }
 0x1f7   :  { %6495 = vst [vmem:[#allocation79_spill] sm:$0xff] %v4291_v6  ;;  %798 = vmatpush.msrb.mxu3 %v4333_v24 }
 0x1f8   :  { %6496 = vst [vmem:[#allocation80_spill] sm:$0xff] %v4293_v4 }
 0x1f9   :  { %6497 = vst [vmem:[#allocation81_spill] sm:$0xff] %v4297_v16 }
 0x1fa   :  { %6498 = vst [vmem:[#allocation82_spill] sm:$0xff] %v4299_v1  ;;  %v674_v1 = vmul.f32 %v4316_v52, %v3804_v12  ;;  %v4345_v12 = vld [vmem:[#allocation4 + $0x30] sm:$0xff] }
 0x1fb   :  { %6499 = vst [vmem:[#allocation83_spill] sm:$0xff] %v4303_v51  ;;  %799 = vmatpush.msrb.mxu3 %v4345_v12 }
 0x1fc   :  { %6500 = vst [vmem:[#allocation84_spill] sm:$0xff] %v4305_v30 }
 0x1fd   :  { %6502 = vst [vmem:[#allocation86_spill] sm:$0xff] %v4333_v24 }
 0x1fe   :  { %6506 = vst [vmem:[#allocation90_spill] sm:$0xff] %v4345_v12  ;;  %v4377_v12 = vld [vmem:[#allocation4 + $0x1a0] sm:$0xff] }
 0x1ff   :  { %6517 = vst [vmem:[#allocation101_spill] sm:$0xff] %v4377_v12 }
 0x256   :  { %v642_v6 = vpop.f32.mrf.mxu1 }
 0x257   :  { %v643_v4 = vadd.f32 %v4093_v11, %v642_v6  ;;  %v4335_v6 = vld [vmem:[#allocation4 + $0xb8] sm:$0xff] }
 0x258   :  { %6503 = vst [vmem:[#allocation87_spill] sm:$0xff] %v4335_v6  ;;  %v4337_v11 = vld [vmem:[#allocation4 + $0x138] sm:$0xff]  ;;  %821 = vmatpush.msra.mxu0 %v4335_v6  ;;  %v4365_v6 = vld [vmem:[#allocation4 + $0x1a8] sm:$0xff] }
 0x259   :  { %v665_v16 = vpop.f32.mrf.mxu2  ;;  %667 = vmatmul.f32.gmra.mxu2 %v643_v4  ;;  %6504 = vst [vmem:[#allocation88_spill] sm:$0xff] %v4337_v11  ;;  %844 = vmatpush.msra.mxu1 %v4337_v11  ;;  %v4349_v4 = vld [vmem:[#allocation4 + $0x130] sm:$0xff]  ;;  %v4359_v11 = vld [vmem:[#allocation4 + $0xa8] sm:$0xff] }
 0x25a   :  { %v666_v51 = vadd.f32 %v4321_v10, %v665_v16  ;;  %6508 = vst [vmem:[#allocation92_spill] sm:$0xff] %v4349_v4  ;;  %v4353_v16 = vld [vmem:[#allocation4 + $0x1b0] sm:$0xff] }
 0x25b   :  { %6509 = vst [vmem:[#allocation93_spill] sm:$0xff] %v4353_v16  ;;  %845 = vmatpush.msra.mxu1 %v4349_v4  ;;  %v4371_v4 = vld [vmem:[#allocation4 + $0xa0] sm:$0xff] }
 0x25c   :  { %v4327_v30 = vadd.f32 %v674_v1, %v666_v51  ;;  %v4341_v51 = vld [vmem:[#allocation4 + $0x1b8] sm:$0xff]  ;;  %v4347_v1 = vld [vmem:[#allocation4 + $0xb0] sm:$0xff]  ;;  %6511 = vst [vmem:[#allocation95_spill] sm:$0xff] %v4359_v11 }
 0x25d   :  { %6505 = vst [vmem:[#allocation89_spill] sm:$0xff] %v4341_v51  ;;  %867 = vmatpush.msra.mxu2 %v4341_v51  ;;  %822 = vmatpush.msra.mxu0 %v4347_v1  ;;  %v4361_v51 = vld [vmem:[#allocation4 + $0x128] sm:$0xff] }
 0x25e   :  { %6501 = vst [vmem:[#allocation85_spill] sm:$0xff] %v4327_v30  ;;  %703 = vmatmul.f32.vlgmr.msra.gmra.mxu3 %v4327_v30  ;;  %726 = vmatmul.f32.vlgmr.msrb.gmra.mxu0 %v4327_v30 }
 0x25f   :  { %749 = vmatmul.f32.vlgmr.msrb.gmra.mxu1 %v4327_v30  ;;  %6507 = vst [vmem:[#allocation91_spill] sm:$0xff] %v4347_v1  ;;  %868 = vmatpush.msra.mxu2 %v4353_v16  ;;  %v4369_v1 = vld [vmem:[#allocation4 + $0x20] sm:$0xff] }
 0x260   :  { %6512 = vst [vmem:[#allocation96_spill] sm:$0xff] %v4361_v51  ;;  %823 = vmatpush.msra.mxu0 %v4359_v11  ;;  %846 = vmatpush.msra.mxu1 %v4361_v51  ;;  %v4373_v16 = vld [vmem:[#allocation4 + $0x120] sm:$0xff]  ;;  %v4381_v11 = vld [vmem:[#allocation4 + $0x18] sm:$0xff] }
 0x261   :  { %772 = vmatmul.f32.vlgmr.msrb.gmra.mxu2 %v4327_v30  ;;  %v4357_v30 = vld [vmem:[#allocation4 + $0x28] sm:$0xff]  ;;  %6513 = vst [vmem:[#allocation97_spill] sm:$0xff] %v4365_v6  ;;  %v4383_v51 = vld [vmem:[#allocation4 + $0x98] sm:$0xff] }
 0x262   :  { %6510 = vst [vmem:[#allocation94_spill] sm:$0xff] %v4357_v30  ;;  %800 = vmatpush.msrb.mxu3 %v4357_v30  ;;  %869 = vmatpush.msra.mxu2 %v4365_v6  ;;  %v4385_v6 = vld [vmem:[#allocation4 + $0x118] sm:$0xff] }
 0x263   :  { %6514 = vst [vmem:[#allocation98_spill] sm:$0xff] %v4369_v1  ;;  %824 = vmatpush.msra.mxu0 %v4371_v4  ;;  %847 = vmatpush.msra.mxu1 %v4373_v16  ;;  %v4389_v30 = vld [vmem:[#allocation4 + $0x198] sm:$0xff] }
 0x264   :  { %6515 = vst [vmem:[#allocation99_spill] sm:$0xff] %v4371_v4  ;;  %801 = vmatpush.msrb.mxu3 %v4369_v1  ;;  %870 = vmatpush.msra.mxu2 %v4377_v12  ;;  %v4393_v4 = vld [vmem:[#allocation4 + $0x10] sm:$0xff] }
 0x265   :  { %6516 = vst [vmem:[#allocation100_spill] sm:$0xff] %v4373_v16  ;;  %825 = vmatpush.msra.mxu0 %v4383_v51  ;;  %848 = vmatpush.msra.mxu1 %v4385_v6  ;;  %v4395_v16 = vld [vmem:[#allocation4 + $0x90] sm:$0xff] }
 0x266   :  { %6518 = vst [vmem:[#allocation102_spill] sm:$0xff] %v4381_v11  ;;  %802 = vmatpush.msrb.mxu3 %v4381_v11  ;;  %871 = vmatpush.msra.mxu2 %v4389_v30  ;;  %v4397_v12 = vld [vmem:[#allocation4 + $0x110] sm:$0xff]  ;;  %v4413_v11 = vld [vmem:[#allocation4 + $0x188] sm:$0xff] }
 0x267   :  { %6519 = vst [vmem:[#allocation103_spill] sm:$0xff] %v4383_v51  ;;  %826 = vmatpush.msra.mxu0 %v4395_v16  ;;  %v4401_v1 = vld [vmem:[#allocation4 + $0x190] sm:$0xff]  ;;  %849 = vmatpush.msra.mxu1 %v4397_v12  ;;  %v4405_v51 = vld [vmem:[#allocation4 + $0x8] sm:$0xff] }
 0x268   :  { %6520 = vst [vmem:[#allocation104_spill] sm:$0xff] %v4385_v6  ;;  %803 = vmatpush.msrb.mxu3 %v4393_v4  ;;  %872 = vmatpush.msra.mxu2 %v4401_v1  ;;  %v4407_v6 = vld [vmem:[#allocation4 + $0x88] sm:$0xff] }
 0x269   :  { %6521 = vst [vmem:[#allocation105_spill] sm:$0xff] %v4389_v30  ;;  %v4409_v30 = vld [vmem:[#allocation4 + $0x108] sm:$0xff]  ;;  %827 = vmatpush.msra.mxu0 %v4407_v6 }
 0x26a   :  { %6522 = vst [vmem:[#allocation106_spill] sm:$0xff] %v4393_v4  ;;  %804 = vmatpush.msrb.mxu3 %v4405_v51  ;;  %v4415_v4 = vld [vmem:[#allocation4] sm:$0xff]  ;;  %850 = vmatpush.msra.mxu1 %v4409_v30 }
 0x26b   :  { %6523 = vst [vmem:[#allocation107_spill] sm:$0xff] %v4395_v16  ;;  %v4417_v16 = vld [vmem:[#allocation4 + $0x80] sm:$0xff]  ;;  %873 = vmatpush.msra.mxu2 %v4413_v11 }
 0x26c   :  { %6524 = vst [vmem:[#allocation108_spill] sm:$0xff] %v4397_v12  ;;  %v4423_v12 = vld [vmem:[#allocation4 + $0x180] sm:$0xff]  ;;  %805 = vmatpush.msrb.mxu3 %v4415_v4  ;;  %828 = vmatpush.msra.mxu0 %v4417_v16 }
 0x26d   :  { %6525 = vst [vmem:[#allocation109_spill] sm:$0xff] %v4401_v1  ;;  %v4421_v1 = vld [vmem:[#allocation4 + $0x100] sm:$0xff]  ;;  %874 = vmatpush.msra.mxu2 %v4423_v12 }
 0x26e   :  { %6526 = vst [vmem:[#allocation110_spill] sm:$0xff] %v4405_v51  ;;  %851 = vmatpush.msra.mxu1 %v4421_v1  ;;  %889 = vmatpush.msra.mxu3 %v3573_v8  ;;  %v552_v8 = vld [vmem:[%s6259_s11] sm:$0xf] }
 0x26f   :  { %6527 = vst [vmem:[#allocation111_spill] sm:$0xff] %v4407_v6  ;;  %912 = vmatpush.msrb.mxu0 %v3717_v54  ;;  %962 = vmatpush.msrb.mxu2 %v3827_v18  ;;  %v6537_v18 = vld [vmem:[#allocation41_spill] sm:$0xff] }
 0x270   :  { %6528 = vst [vmem:[#allocation112_spill] sm:$0xff] %v4409_v30  ;;  %939 = vmatpush.msrb.mxu1 %v3822_v17  ;;  %890 = vmatpush.msra.mxu3 %v3578_v9 }
 0x271   :  { %6529 = vst [vmem:[#allocation113_spill] sm:$0xff] %v4415_v4  ;;  %913 = vmatpush.msrb.mxu0 %v3722_v55  ;;  %963 = vmatpush.msrb.mxu2 %v3844_v23  ;;  %v4490_v55 = vperm.slane %v552_v8, 3  ;;  %v6541_v23 = vld [vmem:[#allocation45_spill] sm:$0xff] }
 0x272   :  { %6530 = vst [vmem:[#allocation114_spill] sm:$0xff] %v4417_v16  ;;  %940 = vmatpush.msrb.mxu1 %v3839_v22  ;;  %891 = vmatpush.msra.mxu3 %v3590_v13  ;;  %v6532_v13 = vmax.f32 %v4104_v53, 0.0  ;;  %v4484_v53 = vperm.slane %v552_v8, 2  ;;  %v6538_v22 = vld [vmem:[#allocation42_spill] sm:$0xff] }
 0x273   :  { %6531 = vst [vmem:[#allocation115_spill] sm:$0xff] %v4421_v1  ;;  %914 = vmatpush.msrb.mxu0 %v3728_v56  ;;  %964 = vmatpush.msrb.mxu2 %v3860_v28  ;;  %v6543_v28 = vld [vmem:[#allocation10_spill] sm:$0xff] }
 0x274   :  { %941 = vmatpush.msrb.mxu1 %v3855_v26  ;;  %892 = vmatpush.msra.mxu3 %v3599_v15  ;;  %v675_v15 = vmul.f32 %v4316_v52, %v6532_v13  ;;  %v6542_v26 = vld [vmem:[#allocation46_spill] sm:$0xff]  ;;  %v6551_v13 = vld [vmem:[#allocation55_spill] sm:$0xff] }
 0x275   :  { %915 = vmatpush.msrb.mxu0 %v3734_v57  ;;  %965 = vmatpush.msrb.mxu2 %v3884_v34  ;;  %v6545_v34 = vld [vmem:[#allocation14_spill] sm:$0xff] }
 0x276   :  { %942 = vmatpush.msrb.mxu1 %v3879_v32  ;;  %893 = vmatpush.msra.mxu3 %v3608_v19  ;;  %v6544_v32 = vld [vmem:[#allocation13_spill] sm:$0xff] }
 0x277   :  { %916 = vmatpush.msrb.mxu0 %v3740_v58  ;;  %966 = vmatpush.msrb.mxu2 %v3913_v40  ;;  %v6547_v40 = vld [vmem:[#allocation49_spill] sm:$0xff] }
 0x278   :  { %943 = vmatpush.msrb.mxu1 %v3908_v39  ;;  %894 = vmatpush.msra.mxu3 %v3617_v21  ;;  %v4476_v21 = vperm.slane %v552_v8, 1  ;;  %v6546_v39 = vld [vmem:[#allocation17_spill] sm:$0xff] }
 0x279   :  { %917 = vmatpush.msrb.mxu0 %v3746_v59  ;;  %967 = vmatpush.msrb.mxu2 %v3937_v44  ;;  %v6548_v44 = vld [vmem:[#allocation50_spill] sm:$0xff] }
 0x27a   :  { %944 = vmatpush.msrb.mxu1 %v3932_v43  ;;  %895 = vmatpush.msra.mxu3 %v3626_v25 }
 0x27b   :  { %918 = vmatpush.msrb.mxu0 %v3752_v60  ;;  %968 = vmatpush.msrb.mxu2 %v3961_v50  ;;  %v6533_v60 = vld [vmem:[#allocation37_spill] sm:$0xff] }
 0x27c   :  { %945 = vmatpush.msrb.mxu1 %v3956_v48  ;;  %896 = vmatpush.msra.mxu3 %v3635_v27  ;;  %v4480_v27 = vperm.slane %v552_v8, 0  ;;  %v6549_v8 = vld [vmem:[#allocation15_spill] sm:$0xff] }
 0x27d   :  { %919 = vmatpush.msrb.mxu0 %v3758_v61  ;;  %969 = vmatpush.msrb.mxu2 %v3985_v7  ;;  %v6534_v61 = vld [vmem:[#allocation38_spill] sm:$0xff] }
 0x27e   :  { %946 = vmatpush.msrb.mxu1 %v3980_v5  ;;  %897 = vmatpush.msra.mxu3 %v3644_v31 }
 0x27f   :  { %920 = vmatpush.msrb.mxu0 %v3764_v62  ;;  %970 = vmatpush.msrb.mxu2 %v4009_v46 }
 0x280   :  { %947 = vmatpush.msrb.mxu1 %v4004_v45  ;;  %898 = vmatpush.msra.mxu3 %v3653_v33 }
 0x281   :  { %921 = vmatpush.msrb.mxu0 %v3770_v63  ;;  %971 = vmatpush.msrb.mxu2 %v4033_v42 }
 0x282   :  { %948 = vmatpush.msrb.mxu1 %v4028_v41  ;;  %899 = vmatpush.msra.mxu3 %v3662_v36 }
 0x283   :  { %922 = vmatpush.msrb.mxu0 %v3776_v0  ;;  %972 = vmatpush.msrb.mxu2 %v4057_v38  ;;  %v6535_v0 = vld [vmem:[#allocation8_spill] sm:$0xff] }
 0x284   :  { %949 = vmatpush.msrb.mxu1 %v4052_v37  ;;  %900 = vmatpush.msra.mxu3 %v3681_v47 }
 0x285   :  { %923 = vmatpush.msrb.mxu0 %v3785_v2  ;;  %973 = vmatpush.msrb.mxu2 %v4081_v35  ;;  %v6536_v2 = vld [vmem:[#allocation11_spill] sm:$0xff] }
 0x286   :  { %950 = vmatpush.msrb.mxu1 %v4076_v29  ;;  %901 = vmatpush.msra.mxu3 %v3690_v49  ;;  %v6539_v49 = vld [vmem:[#allocation9_spill] sm:$0xff] }
 0x287   :  { %924 = vmatpush.msrb.mxu0 %v3791_v3  ;;  %974 = vmatpush.msrb.mxu2 %v6534_v61  ;;  %v6540_v3 = vld [vmem:[#allocation12_spill] sm:$0xff] }
 0x288   :  { %951 = vmatpush.msrb.mxu1 %v6533_v60  ;;  %902 = vmatpush.msra.mxu3 %v6535_v0  ;;  %v6565_v0 = vld [vmem:[#allocation23_spill] sm:$0xff] }
 0x289   :  { %925 = vmatpush.msrb.mxu0 %v6536_v2  ;;  %975 = vmatpush.msrb.mxu2 %v6538_v22  ;;  %v6566_v2 = vld [vmem:[#allocation26_spill] sm:$0xff] }
 0x28a   :  { %952 = vmatpush.msrb.mxu1 %v6537_v18  ;;  %903 = vmatpush.msra.mxu3 %v6539_v49  ;;  %v6568_v49 = vld [vmem:[#allocation72_spill] sm:$0xff] }
 0x28b   :  { %926 = vmatpush.msrb.mxu0 %v6540_v3  ;;  %976 = vmatpush.msrb.mxu2 %v6542_v26  ;;  %v6569_v3 = vld [vmem:[#allocation25_spill] sm:$0xff] }
 0x28c   :  { %953 = vmatpush.msrb.mxu1 %v6541_v23  ;;  %904 = vmatpush.msra.mxu3 %v6543_v28  ;;  %v6570_v28 = vld [vmem:[#allocation28_spill] sm:$0xff] }
 0x28d   :  { %927 = vmatpush.msrb.mxu0 %v6544_v32  ;;  %977 = vmatpush.msrb.mxu2 %v6548_v44  ;;  %v6571_v32 = vld [vmem:[#allocation75_spill] sm:$0xff] }
 0x28e   :  { %954 = vmatpush.msrb.mxu1 %v6547_v40 }
 0x2db   :  { %v727_v31 = vpop.f32.mrf.mxu0 }
 0x2dc   :  { %v668_v9 = vpop.f32.mrf.mxu2  ;;  %v750_v54 = vpop.f32.mrf.mxu1  ;;  %v728_v36 = vadd.f32 %v727_v31, %v4476_v21  ;;  %v6554_v31 = vld [vmem:[#allocation20_spill] sm:$0xff] }
 0x2dd   :  { %v669_v19 = vadd.f32 %v4321_v10, %v668_v9  ;;  %v751_v57 = vadd.f32 %v750_v54, %v4484_v53  ;;  %v6550_v9 = vld [vmem:[#allocation18_spill] sm:$0xff]  ;;  %v6556_v54 = vld [vmem:[#allocation60_spill] sm:$0xff] }
 0x2de   :  { %v780_v47 = vmax.f32 %v728_v36, 0.0  ;;  %v6557_v36 = vld [vmem:[#allocation19_spill] sm:$0xff] }
 0x2df   :  { %v4478_v25 = vadd.f32 %v675_v15, %v669_v19  ;;  %v781_v17 = vmax.f32 %v751_v57, 0.0  ;;  %v6552_v15 = vld [vmem:[#allocation56_spill] sm:$0xff]  ;;  %v6559_v57 = vld [vmem:[#allocation63_spill] sm:$0xff] }
 0x2e0   :  { %v6553_v19 = vld [vmem:[#allocation16_spill] sm:$0xff] }
 0x2e1   :  { %v704_v33 = vpop.f32.mrf.mxu3  ;;  %706 = vmatmul.f32.gmra.mxu3 %v4478_v25  ;;  %729 = vmatmul.f32.gmra.mxu0 %v4478_v25 }
 0x2e2   :  { %752 = vmatmul.f32.gmra.mxu1 %v4478_v25  ;;  %775 = vmatmul.f32.gmra.mxu2 %v4478_v25  ;;  %v705_v56 = vadd.f32 %v704_v33, %v4480_v27  ;;  %v6555_v33 = vld [vmem:[#allocation59_spill] sm:$0xff] }
 0x2e4   :  { %v773_v58 = vpop.f32.mrf.mxu2  ;;  %v779_v62 = vmax.f32 %v705_v56, 0.0  ;;  %v6558_v56 = vld [vmem:[#allocation22_spill] sm:$0xff] }
 0x2e5   :  { %v774_v59 = vadd.f32 %v773_v58, %v4490_v55  ;;  %v6560_v58 = vld [vmem:[#allocation64_spill] sm:$0xff] }
 0x2e7   :  { %v782_v63 = vmax.f32 %v774_v59, 0.0  ;;  %v6561_v59 = vld [vmem:[#allocation21_spill] sm:$0xff] }
 0x2e9   :  { %806 = vmatmul.f32.vlgmr.msrb.gmra.mxu3 %v779_v62  ;;  %829 = vmatmul.f32.vlgmr.msra.gmra.mxu0 %v780_v47  ;;  %v6562_v47 = vld [vmem:[#allocation24_spill] sm:$0xff]  ;;  %v6563_v62 = vld [vmem:[#allocation67_spill] sm:$0xff] }
 0x2ea   :  { %852 = vmatmul.f32.vlgmr.msra.gmra.mxu1 %v781_v17  ;;  %875 = vmatmul.f32.vlgmr.msra.gmra.mxu2 %v782_v63  ;;  %v6564_v63 = vld [vmem:[#allocation68_spill] sm:$0xff]  ;;  %v6567_v17 = vld [vmem:[#allocation71_spill] sm:$0xff] }
 0x2eb   :  { %985 = vmatpush.msrb.mxu3 %v6545_v34  ;;  %1008 = vmatpush.msra.mxu0 %v6546_v39  ;;  %v6572_v34 = vld [vmem:[#allocation27_spill] sm:$0xff]  ;;  %v6573_v39 = vld [vmem:[#allocation30_spill] sm:$0xff] }
 0x2ec   :  { %1039 = vmatpush.msra.mxu1 %v6551_v13  ;;  %1062 = vmatpush.msra.mxu2 %v6552_v15 }
 0x2ed   :  { %986 = vmatpush.msrb.mxu3 %v6549_v8  ;;  %1009 = vmatpush.msra.mxu0 %v6550_v9  ;;  %v6574_v8 = vld [vmem:[#allocation78_spill] sm:$0xff]  ;;  %v6575_v9 = vld [vmem:[#allocation29_spill] sm:$0xff] }
 0x2ee   :  { %1040 = vmatpush.msra.mxu1 %v6555_v33  ;;  %1063 = vmatpush.msra.mxu2 %v6556_v54 }
 0x2ef   :  { %987 = vmatpush.msrb.mxu3 %v6553_v19  ;;  %1010 = vmatpush.msra.mxu0 %v6554_v31  ;;  %v6576_v19 = vld [vmem:[#allocation32_spill] sm:$0xff]  ;;  %v6577_v31 = vld [vmem:[#allocation81_spill] sm:$0xff] }
 0x2f0   :  { %1041 = vmatpush.msra.mxu1 %v6559_v57  ;;  %1064 = vmatpush.msra.mxu2 %v6560_v58 }
 0x2f1   :  { %988 = vmatpush.msrb.mxu3 %v6557_v36  ;;  %1011 = vmatpush.msra.mxu0 %v6558_v56  ;;  %v6578_v36 = vld [vmem:[#allocation82_spill] sm:$0xff]  ;;  %v6579_v56 = vld [vmem:[#allocation31_spill] sm:$0xff] }
 0x2f2   :  { %1042 = vmatpush.msra.mxu1 %v6563_v62  ;;  %1065 = vmatpush.msra.mxu2 %v6564_v63 }
 0x2f3   :  { %989 = vmatpush.msrb.mxu3 %v6561_v59  ;;  %1012 = vmatpush.msra.mxu0 %v6562_v47  ;;  %v6580_v59 = vld [vmem:[#allocation34_spill] sm:$0xff]  ;;  %v6581_v47 = vld [vmem:[#allocation87_spill] sm:$0xff] }
 0x2f4   :  { %1043 = vmatpush.msra.mxu1 %v6567_v17  ;;  %1066 = vmatpush.msra.mxu2 %v6568_v49 }
 0x2f5   :  { %990 = vmatpush.msrb.mxu3 %v6565_v0  ;;  %1013 = vmatpush.msra.mxu0 %v6566_v2  ;;  %v6582_v0 = vld [vmem:[#allocation33_spill] sm:$0xff]  ;;  %v6583_v2 = vld [vmem:[#allocation40_spill] sm:$0xff] }
 0x2f6   :  { %1044 = vmatpush.msra.mxu1 %v6571_v32  ;;  %1067 = vmatpush.msra.mxu2 %v4275_v20 }
 0x2f7   :  { %991 = vmatpush.msrb.mxu3 %v6569_v3  ;;  %1014 = vmatpush.msra.mxu0 %v6570_v28  ;;  %v6584_v3 = vld [vmem:[#allocation90_spill] sm:$0xff]  ;;  %v6585_v28 = vld [vmem:[#allocation91_spill] sm:$0xff] }
 0x2f8   :  { %1045 = vmatpush.msra.mxu1 %v4285_v14  ;;  %1068 = vmatpush.msra.mxu2 %v6574_v8 }
 0x2f9   :  { %992 = vmatpush.msrb.mxu3 %v6572_v34  ;;  %1015 = vmatpush.msra.mxu0 %v6573_v39  ;;  %v6586_v34 = vld [vmem:[#allocation35_spill] sm:$0xff]  ;;  %v6587_v39 = vld [vmem:[#allocation44_spill] sm:$0xff] }
 0x2fa   :  { %1046 = vmatpush.msra.mxu1 %v6577_v31  ;;  %1069 = vmatpush.msra.mxu2 %v6578_v36 }
 0x2fb   :  { %993 = vmatpush.msrb.mxu3 %v6575_v9  ;;  %1016 = vmatpush.msra.mxu0 %v6576_v19  ;;  %v6588_v9 = vld [vmem:[#allocation94_spill] sm:$0xff]  ;;  %v6589_v19 = vld [vmem:[#allocation95_spill] sm:$0xff] }
 0x2fc   :  { %1047 = vmatpush.msra.mxu1 %v4333_v24  ;;  %1070 = vmatpush.msra.mxu2 %v6581_v47  ;;  %v6592_v47 = vld [vmem:[#allocation98_spill] sm:$0xff]  ;;  %v6610_v24 = vld [vmem:[#allocation76_spill] sm:$0xff] }
 0x2fd   :  { %994 = vmatpush.msrb.mxu3 %v6579_v56  ;;  %1017 = vmatpush.msra.mxu0 %v6580_v59  ;;  %v6590_v56 = vld [vmem:[#allocation39_spill] sm:$0xff]  ;;  %v6591_v59 = vld [vmem:[#allocation48_spill] sm:$0xff] }
 0x2fe   :  { %1048 = vmatpush.msra.mxu1 %v6584_v3  ;;  %1071 = vmatpush.msra.mxu2 %v6585_v28  ;;  %v6595_v3 = vld [vmem:[#allocation52_spill] sm:$0xff]  ;;  %v6596_v28 = vld [vmem:[#allocation102_spill] sm:$0xff] }
 0x2ff   :  { %995 = vmatpush.msrb.mxu3 %v6582_v0  ;;  %1018 = vmatpush.msra.mxu0 %v6583_v2  ;;  %v6593_v0 = vld [vmem:[#allocation99_spill] sm:$0xff] }
 0x300   :  { %1049 = vmatpush.msra.mxu1 %v6588_v9  ;;  %1072 = vmatpush.msra.mxu2 %v6589_v19  ;;  %v6594_v2 = vld [vmem:[#allocation43_spill] sm:$0xff]  ;;  %v6599_v9 = vld [vmem:[#allocation53_spill] sm:$0xff]  ;;  %v6600_v19 = vld [vmem:[#allocation106_spill] sm:$0xff] }
 0x301   :  { %996 = vmatpush.msrb.mxu3 %v6586_v34  ;;  %1019 = vmatpush.msra.mxu0 %v6587_v39  ;;  %v6597_v34 = vld [vmem:[#allocation103_spill] sm:$0xff] }
 0x302   :  { %1050 = vmatpush.msra.mxu1 %v6592_v47  ;;  %1073 = vmatpush.msra.mxu2 %v6593_v0  ;;  %v6598_v39 = vld [vmem:[#allocation47_spill] sm:$0xff]  ;;  %v6603_v47 = vld [vmem:[#allocation54_spill] sm:$0xff]  ;;  %v6606_v0 = vld [vmem:[#allocation61_spill] sm:$0xff] }
 0x303   :  { %997 = vmatpush.msrb.mxu3 %v6590_v56  ;;  %1020 = vmatpush.msra.mxu0 %v6591_v59  ;;  %v6601_v56 = vld [vmem:[#allocation107_spill] sm:$0xff] }
 0x304   :  { %1051 = vmatpush.msra.mxu1 %v6596_v28  ;;  %1074 = vmatpush.msra.mxu2 %v6597_v34  ;;  %v6602_v59 = vld [vmem:[#allocation51_spill] sm:$0xff] }
 0x305   :  { %998 = vmatpush.msrb.mxu3 %v6594_v2  ;;  %1021 = vmatpush.msra.mxu0 %v6595_v3 }
 0x306   :  { %1052 = vmatpush.msra.mxu1 %v6600_v19  ;;  %1075 = vmatpush.msra.mxu2 %v6601_v56 }
 0x307   :  { %999 = vmatpush.msrb.mxu3 %v6598_v39  ;;  %1022 = vmatpush.msra.mxu0 %v6599_v9 }
 0x308   :  { %1053 = vmatpush.msra.mxu1 %v4405_v51  ;;  %1076 = vmatpush.msra.mxu2 %v4407_v6 }
 0x309   :  { %1000 = vmatpush.msrb.mxu3 %v6602_v59  ;;  %1023 = vmatpush.msra.mxu0 %v6603_v47 }
 0x30a   :  { %1054 = vmatpush.msra.mxu1 %v4415_v4  ;;  %1077 = vmatpush.msra.mxu2 %v4417_v16 }
 0x35e   :  { %v730_v3 = vpop.f32.mrf.mxu0 }
 0x35f   :  { %v731_v2 = vadd.f32 %v730_v3, %v4476_v21  ;;  %v753_v9 = vpop.f32.mrf.mxu1  ;;  %v4589_v3 = vld [vmem:[%s6254_s6 + $0x4] ss:$0 sm:$0xff] }
 0x360   :  { %v754_v39 = vadd.f32 %v753_v9, %v4484_v53 }
 0x361   :  { %v784_v19 = vmax.f32 %v731_v2, 0.0 }
 0x362   :  { %v785_v56 = vmax.f32 %v754_v39, 0.0  ;;  %v4595_v39 = vld [vmem:[%s6254_s6 + $0x6] ss:$0 sm:$0xff] }
 0x363   :  { %832 = vmatmul.f32.gmra.mxu0 %v784_v19 }
 0x364   :  { %855 = vmatmul.f32.gmra.mxu1 %v785_v56  ;;  %v707_v59 = vpop.f32.mrf.mxu3 }
 0x365   :  { %v708_v47 = vadd.f32 %v707_v59, %v4480_v27  ;;  %v776_v51 = vpop.f32.mrf.mxu2 }
 0x366   :  { %v777_v6 = vadd.f32 %v776_v51, %v4490_v55  ;;  %v830_v19 = vpop.f32.mrf.mxu0 }
 0x367   :  { %v783_v34 = vmax.f32 %v708_v47, 0.0  ;;  %v853_v51 = vpop.f32.mrf.mxu1  ;;  %v6604_v47 = vld [vmem:[#allocation85_spill] sm:$0xff] }
 0x368   :  { %v786_v4 = vmax.f32 %v777_v6, 0.0  ;;  %v885_v16 = vmul.f32 %v4595_v39, %v6604_v47  ;;  %v6618_v47 = vld [vmem:[#allocation108_spill] sm:$0xff] }
 0x369   :  { %809 = vmatmul.f32.gmra.mxu3 %v783_v34 }
 0x36a   :  { %878 = vmatmul.f32.gmra.mxu2 %v786_v4  ;;  %v6605_v4 = vld [vmem:[#allocation57_spill] sm:$0xff] }
 0x36c   :  { %v807_v9 = vpop.f32.mrf.mxu3 }
 0x36d   :  { %v808_v2 = vadd.f32 %v4589_v3, %v807_v9  ;;  %v876_v6 = vpop.f32.mrf.mxu2  ;;  %v6607_v9 = vld [vmem:[#allocation65_spill] sm:$0xff] }
 0x36f   :  { %v831_v56 = vadd.f32 %v830_v19, %v808_v2  ;;  %v6608_v2 = vld [vmem:[#allocation69_spill] sm:$0xff] }
 0x370   :  { %v6609_v19 = vld [vmem:[#allocation73_spill] sm:$0xff] }
 0x371   :  { %v854_v59 = vadd.f32 %v853_v51, %v831_v56  ;;  %v6611_v56 = vld [vmem:[#allocation79_spill] sm:$0xff] }
 0x372   :  { %v6612_v51 = vld [vmem:[#allocation83_spill] sm:$0xff] }
 0x373   :  { %v877_v34 = vadd.f32 %v876_v6, %v854_v59  ;;  %v6613_v59 = vld [vmem:[#allocation88_spill] sm:$0xff] }
 0x374   :  { %v6615_v6 = vld [vmem:[#allocation96_spill] sm:$0xff] }
 0x375   :  { %v887_v28 = vadd.f32 %v885_v16, %v877_v34  ;;  %v6614_v16 = vld [vmem:[#allocation92_spill] sm:$0xff] }
 0x376   :  { %v6616_v34 = vld [vmem:[#allocation100_spill] sm:$0xff] }
 0x377   :  { %905 = vmatmul.f32.vlgmr.msra.gmra.mxu3 %v887_v28 }
 0x378   :  { %1085 = vmatpush.msra.mxu3 %v6605_v4 }
 0x37a   :  { %1086 = vmatpush.msra.mxu3 %v6606_v0  ;;  %v6617_v0 = vld [vmem:[#allocation104_spill] sm:$0xff] }
 0x37c   :  { %1087 = vmatpush.msra.mxu3 %v6607_v9 }
 0x37e   :  { %1088 = vmatpush.msra.mxu3 %v6608_v2 }
 0x380   :  { %1089 = vmatpush.msra.mxu3 %v6609_v19 }
 0x382   :  { %1090 = vmatpush.msra.mxu3 %v6610_v24 }
 0x384   :  { %1091 = vmatpush.msra.mxu3 %v6611_v56 }
 0x386   :  { %1092 = vmatpush.msra.mxu3 %v6612_v51 }
 0x388   :  { %1093 = vmatpush.msra.mxu3 %v6613_v59 }
 0x38a   :  { %1094 = vmatpush.msra.mxu3 %v6614_v16 }
 0x38c   :  { %1095 = vmatpush.msra.mxu3 %v6615_v6 }
 0x38e   :  { %1096 = vmatpush.msra.mxu3 %v6616_v34  ;;  %v886_v34 = vmul.f32 %v4595_v39, %v4478_v25  ;;  %v6626_v25 = vld [vmem:[#allocation80_spill] sm:$0xff] }
 0x390   :  { %1097 = vmatpush.msra.mxu3 %v6617_v0 }
 0x392   :  { %1098 = vmatpush.msra.mxu3 %v6618_v47 }
 0x394   :  { %1099 = vmatpush.msra.mxu3 %v4409_v30  ;;  %v6619_v30 = vld [vmem:[#allocation36_spill] sm:$0xff] }
 0x396   :  { %1100 = vmatpush.msra.mxu3 %v4421_v1  ;;  %v6620_v1 = vld [vmem:[#allocation58_spill] sm:$0xff] }
 0x3e0   :  { %v833_v9 = vpop.f32.mrf.mxu0 }
 0x3e1   :  { %v856_v19 = vpop.f32.mrf.mxu1 }
 0x3ec   :  { %v810_v24 = vpop.f32.mrf.mxu3 }
 0x3ed   :  { %v811_v4 = vadd.f32 %v4589_v3, %v810_v24  ;;  %v879_v51 = vpop.f32.mrf.mxu2  ;;  %v6621_v24 = vld [vmem:[#allocation62_spill] sm:$0xff] }
 0x3ef   :  { %v834_v2 = vadd.f32 %v833_v9, %v811_v4  ;;  %v6622_v4 = vld [vmem:[#allocation66_spill] sm:$0xff] }
 0x3f0   :  { %v6623_v9 = vld [vmem:[#allocation70_spill] sm:$0xff] }
 0x3f1   :  { %v857_v56 = vadd.f32 %v856_v19, %v834_v2  ;;  %v6624_v2 = vld [vmem:[#allocation74_spill] sm:$0xff]  ;;  %v6625_v19 = vld [vmem:[#allocation77_spill] sm:$0xff] }
 0x3f3   :  { %v880_v16 = vadd.f32 %v879_v51, %v857_v56  ;;  %v6632_v56 = vld [vmem:[#allocation105_spill] sm:$0xff] }
 0x3f4   :  { %v6633_v51 = vld [vmem:[#allocation109_spill] sm:$0xff] }
 0x3f5   :  { %v4618_v6 = vadd.f32 %v886_v34, %v880_v16  ;;  %v6627_v16 = vld [vmem:[#allocation84_spill] sm:$0xff]  ;;  %v6628_v34 = vld [vmem:[#allocation89_spill] sm:$0xff] }
 0x3f7   :  { %908 = vmatmul.f32.gmra.mxu3 %v4618_v6 }
 0x3fa   :  { %v906_v47 = vpop.f32.mrf.mxu3 }
 0x3fb   :  { %v907_v0 = vadd.f32 %v6619_v30, %v906_v47  ;;  %v6629_v47 = vld [vmem:[#allocation93_spill] sm:$0xff] }
 0x3fd   :  { %928 = vmatmul.f32.vlgmr.msrb.gmra.mxu0 %v907_v0  ;;  %v6630_v0 = vld [vmem:[#allocation97_spill] sm:$0xff] }
 0x3fe   :  { %1108 = vmatpush.msrb.mxu0 %v6620_v1  ;;  %v6631_v1 = vld [vmem:[#allocation101_spill] sm:$0xff] }
 0x400   :  { %1109 = vmatpush.msrb.mxu0 %v6621_v24 }
 0x402   :  { %1110 = vmatpush.msrb.mxu0 %v6622_v4 }
 0x404   :  { %1111 = vmatpush.msrb.mxu0 %v6623_v9 }
 0x406   :  { %1112 = vmatpush.msrb.mxu0 %v6624_v2 }
 0x408   :  { %1113 = vmatpush.msrb.mxu0 %v6625_v19  ;;  %v935_v19 = vmul.f32 %v4316_v52, %v887_v28  ;;  %v2914_v28 = vld [vmem:[%s6258_s10 + $0x1e0] sm:$0xff] }
 0x40a   :  { %1114 = vmatpush.msrb.mxu0 %v6626_v25 }
 0x40c   :  { %1115 = vmatpush.msrb.mxu0 %v6627_v16  ;;  %v2912_v16 = vld [vmem:[%s6253_s5 + $0x178] sm:$0xff] }
 0x40e   :  { %1116 = vmatpush.msrb.mxu0 %v6628_v34  ;;  %v2915_v34 = vld [vmem:[%s6253_s5 + $0x170] sm:$0xff] }
 0x410   :  { %1117 = vmatpush.msrb.mxu0 %v6629_v47  ;;  %v2916_v47 = vld [vmem:[%s6253_s5 + $0x1f0] sm:$0xff] }
 0x412   :  { %1118 = vmatpush.msrb.mxu0 %v6630_v0 }
 0x414   :  { %1119 = vmatpush.msrb.mxu0 %v6631_v1 }
 0x416   :  { %1120 = vmatpush.msrb.mxu0 %v6632_v56 }
 0x418   :  { %1121 = vmatpush.msrb.mxu0 %v6633_v51 }
 0x41a   :  { %1122 = vmatpush.msrb.mxu0 %v4413_v11 }
 0x41c   :  { %1123 = vmatpush.msrb.mxu0 %v4423_v12 }
 0x47a   :  { %v909_v24 = vpop.f32.mrf.mxu3  ;;  %v929_v4 = vpop.f32.mrf.mxu0 }
 0x47b   :  { %v910_v9 = vadd.f32 %v6619_v30, %v909_v24  ;;  %v930_v2 = vadd.f32 %v4321_v10, %v929_v4  ;;  %v2913_v30 = vld [vmem:[%s6253_s5 + $0x1f8] sm:$0xff]  ;;  %v2917_v24 = vld [vmem:[%s6258_s10 + $0x1c0] sm:$0xff]  ;;  %v2918_v4 = vld [vmem:[%s6253_s5 + $0x168] sm:$0xff] }
 0x47d   :  { %v4641_v25 = vadd.f32 %v935_v19, %v930_v2  ;;  %931 = vmatmul.f32.gmra.mxu0 %v910_v9  ;;  %v2919_v9 = vld [vmem:[%s6253_s5 + $0x1e8] sm:$0xff]  ;;  %v2920_v2 = vld [vmem:[%s6253_s5 + $0x160] sm:$0xff] }
 0x47e   :  { %v2921_v19 = vld [vmem:[%s6258_s10 + $0x1e8] sm:$0xff] }
 0x47f   :  { %955 = vmatmul.f32.vlgmr.msrb.gmra.mxu1 %v4641_v25  ;;  %978 = vmatmul.f32.vlgmr.msrb.gmra.mxu2 %v4641_v25 }
 0x480   :  { %1001 = vmatmul.f32.vlgmr.msrb.gmra.mxu3 %v4641_v25  ;;  %1135 = vmatpush.msrb.mxu1 %v2912_v16  ;;  %v2922_v16 = vld [vmem:[%s6253_s5 + $0x1e0] sm:$0xff] }
 0x481   :  { %1158 = vmatpush.msrb.mxu2 %v2913_v30  ;;  %1185 = vmatpush.msrb.mxu3 %v2914_v28  ;;  %v2923_v30 = vld [vmem:[%s6258_s10 + $0x1a0] sm:$0xff]  ;;  %v2924_v28 = vld [vmem:[%s6253_s5 + $0x158] sm:$0xff] }
 0x482   :  { %1136 = vmatpush.msrb.mxu1 %v2915_v34  ;;  %v2925_v34 = vld [vmem:[%s6258_s10 + $0x1c8] sm:$0xff] }
 0x483   :  { %1159 = vmatpush.msrb.mxu2 %v2916_v47  ;;  %1186 = vmatpush.msrb.mxu3 %v2917_v24  ;;  %v2926_v47 = vld [vmem:[%s6253_s5 + $0x1d8] sm:$0xff]  ;;  %v2927_v24 = vld [vmem:[%s6258_s10 + $0x180] sm:$0xff] }
 0x484   :  { %1137 = vmatpush.msrb.mxu1 %v2918_v4  ;;  %v2928_v4 = vld [vmem:[%s6253_s5 + $0x150] sm:$0xff] }
 0x485   :  { %1024 = vmatmul.f32.vlgmr.msra.gmra.mxu0 %v4641_v25  ;;  %1160 = vmatpush.msrb.mxu2 %v2919_v9  ;;  %v2929_v9 = vld [vmem:[%s6258_s10 + $0x1a8] sm:$0xff] }
 0x486   :  { %1138 = vmatpush.msrb.mxu1 %v2920_v2  ;;  %1208 = vmatpush.msra.mxu0 %v2921_v19  ;;  %v2930_v2 = vld [vmem:[%s6253_s5 + $0x1d0] sm:$0xff]  ;;  %v2931_v19 = vld [vmem:[%s6258_s10 + $0x160] sm:$0xff] }
 0x487   :  { %1161 = vmatpush.msrb.mxu2 %v2922_v16  ;;  %1187 = vmatpush.msrb.mxu3 %v2923_v30  ;;  %v2932_v16 = vld [vmem:[%s6253_s5 + $0x148] sm:$0xff] }
 0x488   :  { %1139 = vmatpush.msrb.mxu1 %v2924_v28  ;;  %1209 = vmatpush.msra.mxu0 %v2925_v34  ;;  %v2933_v30 = vld [vmem:[%s6258_s10 + $0x188] sm:$0xff]  ;;  %v2935_v34 = vld [vmem:[%s6253_s5 + $0x140] sm:$0xff] }
 0x489   :  { %1162 = vmatpush.msrb.mxu2 %v2926_v47  ;;  %1188 = vmatpush.msrb.mxu3 %v2927_v24  ;;  %v2934_v28 = vld [vmem:[%s6253_s5 + $0x1c8] sm:$0xff]  ;;  %v2937_v24 = vld [vmem:[%s6253_s5 + $0x1c0] sm:$0xff] }
 0x48a   :  { %1140 = vmatpush.msrb.mxu1 %v2928_v4  ;;  %1210 = vmatpush.msra.mxu0 %v2929_v9  ;;  %v2936_v47 = vld [vmem:[%s6258_s10 + $0x168] sm:$0xff]  ;;  %v2940_v9 = vld [vmem:[%s6253_s5 + $0x1b8] sm:$0xff] }
 0x48b   :  { %1163 = vmatpush.msrb.mxu2 %v2930_v2  ;;  %1189 = vmatpush.msrb.mxu3 %v2931_v19  ;;  %v2939_v4 = vld [vmem:[%s6258_s10 + $0x148] sm:$0xff]  ;;  %v2942_v2 = vld [vmem:[%s6253_s5 + $0x1b0] sm:$0xff] }
 0x48c   :  { %1141 = vmatpush.msrb.mxu1 %v2932_v16  ;;  %1211 = vmatpush.msra.mxu0 %v2933_v30  ;;  %v2943_v19 = vld [vmem:[%s6253_s5 + $0x128] sm:$0xff] }
 0x48d   :  { %1164 = vmatpush.msrb.mxu2 %v2934_v28  ;;  %1190 = vmatpush.msrb.mxu3 %v3932_v43  ;;  %v2938_v43 = vld [vmem:[%s6253_s5 + $0x138] sm:$0xff] }
 0x48e   :  { %1142 = vmatpush.msrb.mxu1 %v2935_v34  ;;  %1212 = vmatpush.msra.mxu0 %v2936_v47 }
 0x48f   :  { %1165 = vmatpush.msrb.mxu2 %v2937_v24  ;;  %1191 = vmatpush.msrb.mxu3 %v3956_v48  ;;  %v2941_v48 = vld [vmem:[%s6253_s5 + $0x130] sm:$0xff] }
 0x490   :  { %1143 = vmatpush.msrb.mxu1 %v2938_v43  ;;  %1213 = vmatpush.msra.mxu0 %v2939_v4  ;;  %v2955_v24 = vld [vmem:[%s6258_s10 + $0x1f0] sm:$0xff]  ;;  %v2956_v43 = vld [vmem:[%s6258_s10 + $0x1f8] sm:$0xff] }
 0x491   :  { %1166 = vmatpush.msrb.mxu2 %v2940_v9  ;;  %1192 = vmatpush.msrb.mxu3 %v3980_v5  ;;  %v2944_v5 = vld [vmem:[%s6253_s5 + $0x1a8] sm:$0xff]  ;;  %v2957_v4 = vld [vmem:[%s6258_s10 + $0x1d0] sm:$0xff]  ;;  %v2958_v9 = vld [vmem:[%s6258_s10 + $0x1d8] sm:$0xff] }
 0x492   :  { %1144 = vmatpush.msrb.mxu1 %v2941_v48  ;;  %1214 = vmatpush.msra.mxu0 %v3961_v50  ;;  %v2945_v50 = vld [vmem:[%s6253_s5 + $0x120] sm:$0xff]  ;;  %v6634_v48 = vld [vmem:[#allocation86_spill] sm:$0xff] }
 0x493   :  { %1167 = vmatpush.msrb.mxu2 %v2942_v2  ;;  %1193 = vmatpush.msrb.mxu3 %v4004_v45  ;;  %v2946_v45 = vld [vmem:[%s6253_s5 + $0x1a0] sm:$0xff]  ;;  %v6635_v2 = vld [vmem:[#allocation87_spill] sm:$0xff] }
 0x494   :  { %1145 = vmatpush.msrb.mxu1 %v2943_v19  ;;  %1215 = vmatpush.msra.mxu0 %v3985_v7  ;;  %v2947_v7 = vld [vmem:[%s6253_s5 + $0x118] sm:$0xff]  ;;  %v6636_v19 = vld [vmem:[#allocation90_spill] sm:$0xff] }
 0x495   :  { %1168 = vmatpush.msrb.mxu2 %v2944_v5  ;;  %1194 = vmatpush.msrb.mxu3 %v4028_v41  ;;  %v2948_v41 = vld [vmem:[%s6253_s5 + $0x198] sm:$0xff] }
 0x496   :  { %1146 = vmatpush.msrb.mxu1 %v2945_v50  ;;  %1216 = vmatpush.msra.mxu0 %v4009_v46  ;;  %v2949_v46 = vld [vmem:[%s6253_s5 + $0x110] sm:$0xff]  ;;  %v6637_v5 = vld [vmem:[#allocation91_spill] sm:$0xff] }
 0x497   :  { %1169 = vmatpush.msrb.mxu2 %v2946_v45  ;;  %1195 = vmatpush.msrb.mxu3 %v4052_v37  ;;  %v2950_v37 = vld [vmem:[%s6253_s5 + $0x190] sm:$0xff]  ;;  %v2976_v45 = vld [vmem:[%s6258_s10 + $0xb8] sm:$0xff] }
 0x498   :  { %1147 = vmatpush.msrb.mxu1 %v2947_v7  ;;  %1217 = vmatpush.msra.mxu0 %v4033_v42  ;;  %v2951_v42 = vld [vmem:[%s6253_s5 + $0x108] sm:$0xff]  ;;  %v2975_v50 = vld [vmem:[%s6258_s10 + $0xb0] sm:$0xff] }
 0x499   :  { %1170 = vmatpush.msrb.mxu2 %v2948_v41  ;;  %1196 = vmatpush.msrb.mxu3 %v4076_v29  ;;  %v2952_v29 = vld [vmem:[%s6253_s5 + $0x188] sm:$0xff]  ;;  %v6638_v7 = vld [vmem:[#allocation94_spill] sm:$0xff]  ;;  %v6639_v41 = vld [vmem:[#allocation95_spill] sm:$0xff] }
 0x49a   :  { %1148 = vmatpush.msrb.mxu1 %v2949_v46  ;;  %1218 = vmatpush.msra.mxu0 %v4057_v38  ;;  %v2953_v38 = vld [vmem:[%s6253_s5 + $0x100] sm:$0xff]  ;;  %v2977_v46 = vld [vmem:[%s6258_s10 + $0x90] sm:$0xff] }
 0x49b   :  { %1171 = vmatpush.msrb.mxu2 %v2950_v37  ;;  %1197 = vmatpush.msrb.mxu3 %v6533_v60  ;;  %v2954_v60 = vld [vmem:[%s6253_s5 + $0x180] sm:$0xff]  ;;  %v2978_v37 = vld [vmem:[%s6258_s10 + $0x98] sm:$0xff] }
 0x49c   :  { %1149 = vmatpush.msrb.mxu1 %v2951_v42  ;;  %1219 = vmatpush.msra.mxu0 %v4081_v35  ;;  %v6640_v42 = vld [vmem:[#allocation98_spill] sm:$0xff] }
 0x49d   :  { %1172 = vmatpush.msrb.mxu2 %v2952_v29  ;;  %1198 = vmatpush.msrb.mxu3 %v6537_v18  ;;  %v936_v18 = vmul.f32 %v4316_v52, %v4618_v6  ;;  %v6641_v29 = vld [vmem:[#allocation99_spill] sm:$0xff] }
 0x49e   :  { %1150 = vmatpush.msrb.mxu1 %v2953_v38  ;;  %1220 = vmatpush.msra.mxu0 %v6534_v61  ;;  %v2979_v38 = vld [vmem:[%s6258_s10 + $0x70] sm:$0xff] }
 0x49f   :  { %1173 = vmatpush.msrb.mxu2 %v2954_v60  ;;  %1199 = vmatpush.msrb.mxu3 %v6541_v23  ;;  %v2980_v60 = vld [vmem:[%s6258_s10 + $0x78] sm:$0xff] }
 0x4a0   :  { %1221 = vmatpush.msra.mxu0 %v6538_v22 }
 0x4a1   :  { %1200 = vmatpush.msrb.mxu3 %v6547_v40 }
 0x4a2   :  { %1222 = vmatpush.msra.mxu0 %v6542_v26 }
 0x4a4   :  { %1223 = vmatpush.msra.mxu0 %v6548_v44 }
 0x4fa   :  { %v932_v35 = vpop.f32.mrf.mxu0 }
 0x4fb   :  { %v933_v61 = vadd.f32 %v4321_v10, %v932_v35  ;;  %v6642_v35 = vld [vmem:[#allocation102_spill] sm:$0xff] }
 0x4fc   :  { %v956_v30 = vpop.f32.mrf.mxu1 }
 0x4fd   :  { %v4800_v16 = vadd.f32 %v936_v18, %v933_v61  ;;  %v957_v22 = vadd.f32 %v956_v30, %v4480_v27  ;;  %v6643_v18 = vld [vmem:[#allocation103_spill] sm:$0xff]  ;;  %v2981_v61 = vld [vmem:[%s6258_s10 + $0x50] sm:$0xff] }
 0x4fe   :  { %v2982_v30 = vld [vmem:[%s6258_s10 + $0x58] sm:$0xff] }
 0x4ff   :  { %958 = vmatmul.f32.gmra.mxu1 %v4800_v16  ;;  %981 = vmatmul.f32.gmra.mxu2 %v4800_v16  ;;  %v1031_v6 = vmax.f32 %v957_v22, 0.0  ;;  %v6644_v22 = vld [vmem:[#allocation106_spill] sm:$0xff] }
 0x500   :  { %1004 = vmatmul.f32.gmra.mxu3 %v4800_v16  ;;  %1027 = vmatmul.f32.gmra.mxu0 %v4800_v16 }
 0x502   :  { %v979_v23 = vpop.f32.mrf.mxu2  ;;  %v1025_v26 = vpop.f32.mrf.mxu0 }
 0x503   :  { %v980_v40 = vadd.f32 %v979_v23, %v4476_v21  ;;  %v1002_v52 = vpop.f32.mrf.mxu3  ;;  %v1026_v10 = vadd.f32 %v1025_v26, %v4490_v55  ;;  %v6645_v23 = vld [vmem:[#allocation107_spill] sm:$0xff]  ;;  %v2983_v26 = vld [vmem:[%s6258_s10 + $0x30] sm:$0xff] }
 0x504   :  { %v1003_v44 = vadd.f32 %v1002_v52, %v4484_v53  ;;  %v6646_v52 = vld [vmem:[#allocation110_spill] sm:$0xff] }
 0x505   :  { %v1032_v28 = vmax.f32 %v980_v40, 0.0  ;;  %v1034_v34 = vmax.f32 %v1026_v10, 0.0  ;;  %v2984_v40 = vld [vmem:[%s6258_s10 + $0x38] sm:$0xff] }
 0x506   :  { %v1033_v47 = vmax.f32 %v1003_v44, 0.0  ;;  %v6647_v10 = vld [vmem:[#allocation111_spill] sm:$0xff]  ;;  %v2985_v44 = vld [vmem:[%s6258_s10 + $0x10] sm:$0xff] }
 0x507   :  { %1055 = vmatmul.f32.vlgmr.msra.gmra.mxu1 %v1031_v6  ;;  %1078 = vmatmul.f32.vlgmr.msra.gmra.mxu2 %v1032_v28  ;;  %v2986_v6 = vld [vmem:[%s6258_s10 + $0x18] sm:$0xff]  ;;  %v6648_v28 = vld [vmem:[#allocation113_spill] sm:$0xff] }
 0x508   :  { %1101 = vmatmul.f32.vlgmr.msra.gmra.mxu3 %v1033_v47  ;;  %1124 = vmatmul.f32.vlgmr.msrb.gmra.mxu0 %v1034_v34  ;;  %v6649_v34 = vld [vmem:[#allocation114_spill] sm:$0xff] }
 0x509   :  { %1231 = vmatpush.msra.mxu1 %v2955_v24  ;;  %1254 = vmatpush.msra.mxu2 %v2956_v43 }
 0x50a   :  { %1285 = vmatpush.msra.mxu3 %v6551_v13  ;;  %1308 = vmatpush.msrb.mxu0 %v6552_v15  ;;  %v2959_v13 = vld [vmem:[%s6258_s10 + $0x1b0] sm:$0xff]  ;;  %v2960_v15 = vld [vmem:[%s6258_s10 + $0x1b8] sm:$0xff] }
 0x50b   :  { %1232 = vmatpush.msra.mxu1 %v2957_v4  ;;  %1255 = vmatpush.msra.mxu2 %v2958_v9 }
 0x50c   :  { %1286 = vmatpush.msra.mxu3 %v6555_v33  ;;  %1309 = vmatpush.msrb.mxu0 %v6556_v54  ;;  %v2961_v33 = vld [vmem:[%s6258_s10 + $0x190] sm:$0xff]  ;;  %v2962_v54 = vld [vmem:[%s6258_s10 + $0x198] sm:$0xff] }
 0x50d   :  { %1233 = vmatpush.msra.mxu1 %v2959_v13  ;;  %1256 = vmatpush.msra.mxu2 %v2960_v15 }
 0x50e   :  { %1287 = vmatpush.msra.mxu3 %v6559_v57  ;;  %1310 = vmatpush.msrb.mxu0 %v6560_v58  ;;  %v2963_v57 = vld [vmem:[%s6258_s10 + $0x170] sm:$0xff]  ;;  %v2964_v58 = vld [vmem:[%s6258_s10 + $0x178] sm:$0xff] }
 0x50f   :  { %1234 = vmatpush.msra.mxu1 %v2961_v33  ;;  %1257 = vmatpush.msra.mxu2 %v2962_v54 }
 0x510   :  { %1288 = vmatpush.msra.mxu3 %v6563_v62  ;;  %1311 = vmatpush.msrb.mxu0 %v6564_v63  ;;  %v2965_v62 = vld [vmem:[%s6258_s10 + $0x150] sm:$0xff]  ;;  %v2966_v63 = vld [vmem:[%s6258_s10 + $0x158] sm:$0xff] }
 0x511   :  { %1235 = vmatpush.msra.mxu1 %v2963_v57  ;;  %1258 = vmatpush.msra.mxu2 %v2964_v58 }
 0x512   :  { %1289 = vmatpush.msra.mxu3 %v6567_v17  ;;  %1312 = vmatpush.msrb.mxu0 %v6568_v49  ;;  %v2967_v17 = vld [vmem:[%s6258_s10 + $0x130] sm:$0xff]  ;;  %v2968_v49 = vld [vmem:[%s6258_s10 + $0x138] sm:$0xff] }
 0x513   :  { %1236 = vmatpush.msra.mxu1 %v2965_v62  ;;  %1259 = vmatpush.msra.mxu2 %v2966_v63 }
 0x514   :  { %1290 = vmatpush.msra.mxu3 %v6571_v32  ;;  %1313 = vmatpush.msrb.mxu0 %v4275_v20  ;;  %v2969_v32 = vld [vmem:[%s6258_s10 + $0x110] sm:$0xff]  ;;  %v2970_v20 = vld [vmem:[%s6258_s10 + $0x118] sm:$0xff] }
 0x515   :  { %1237 = vmatpush.msra.mxu1 %v2967_v17  ;;  %1260 = vmatpush.msra.mxu2 %v2968_v49 }
 0x516   :  { %1291 = vmatpush.msra.mxu3 %v4285_v14  ;;  %1314 = vmatpush.msrb.mxu0 %v6574_v8  ;;  %v2971_v14 = vld [vmem:[%s6258_s10 + $0xf0] sm:$0xff]  ;;  %v2972_v8 = vld [vmem:[%s6258_s10 + $0xf8] sm:$0xff] }
 0x517   :  { %1238 = vmatpush.msra.mxu1 %v2969_v32  ;;  %1261 = vmatpush.msra.mxu2 %v2970_v20 }
 0x518   :  { %1292 = vmatpush.msra.mxu3 %v6577_v31  ;;  %1315 = vmatpush.msrb.mxu0 %v6578_v36  ;;  %v2973_v31 = vld [vmem:[%s6258_s10 + $0xd0] sm:$0xff]  ;;  %v2974_v36 = vld [vmem:[%s6258_s10 + $0xd8] sm:$0xff] }
 0x519   :  { %1239 = vmatpush.msra.mxu1 %v2971_v14  ;;  %1262 = vmatpush.msra.mxu2 %v2972_v8 }
 0x51a   :  { %1293 = vmatpush.msra.mxu3 %v6634_v48  ;;  %1316 = vmatpush.msrb.mxu0 %v6635_v2  ;;  %v1131_v2 = vmul.f32 %v4595_v39, %v4641_v25  ;;  %v6650_v25 = vld [vmem:[#allocation92_spill] sm:$0xff] }
 0x51b   :  { %1240 = vmatpush.msra.mxu1 %v2973_v31  ;;  %1263 = vmatpush.msra.mxu2 %v2974_v36  ;;  %v2987_v36 = vld [vmem:[#allocation4 + $0x178] sm:$0xff] }
 0x51c   :  { %1294 = vmatpush.msra.mxu3 %v6636_v19  ;;  %1317 = vmatpush.msrb.mxu0 %v6637_v5  ;;  %v2988_v19 = vld [vmem:[#allocation4 + $0x170] sm:$0xff]  ;;  %v2989_v5 = vld [vmem:[#allocation4 + $0x168] sm:$0xff] }
 0x51d   :  { %1241 = vmatpush.msra.mxu1 %v2975_v50  ;;  %1264 = vmatpush.msra.mxu2 %v2976_v45  ;;  %v2990_v50 = vld [vmem:[#allocation4 + $0x160] sm:$0xff]  ;;  %v2991_v45 = vld [vmem:[#allocation4 + $0x158] sm:$0xff] }
 0x51e   :  { %1295 = vmatpush.msra.mxu3 %v6638_v7  ;;  %1318 = vmatpush.msrb.mxu0 %v6639_v41  ;;  %v2992_v7 = vld [vmem:[#allocation4 + $0x150] sm:$0xff]  ;;  %v2993_v41 = vld [vmem:[#allocation4 + $0x148] sm:$0xff] }
 0x51f   :  { %1242 = vmatpush.msra.mxu1 %v2977_v46  ;;  %1265 = vmatpush.msra.mxu2 %v2978_v37  ;;  %v2994_v46 = vld [vmem:[#allocation4 + $0x140] sm:$0xff] }
 0x520   :  { %1296 = vmatpush.msra.mxu3 %v6640_v42  ;;  %1319 = vmatpush.msrb.mxu0 %v6641_v29  ;;  %v6651_v37 = vld [vmem:[#allocation96_spill] sm:$0xff] }
 0x521   :  { %1243 = vmatpush.msra.mxu1 %v2979_v38  ;;  %1266 = vmatpush.msra.mxu2 %v2980_v60  ;;  %v6652_v42 = vld [vmem:[#allocation100_spill] sm:$0xff] }
 0x522   :  { %1297 = vmatpush.msra.mxu3 %v6642_v35  ;;  %1320 = vmatpush.msrb.mxu0 %v6643_v18  ;;  %v6653_v29 = vld [vmem:[#allocation104_spill] sm:$0xff]  ;;  %v6656_v35 = vld [vmem:[#allocation115_spill] sm:$0xff] }
 0x523   :  { %1244 = vmatpush.msra.mxu1 %v2981_v61  ;;  %1267 = vmatpush.msra.mxu2 %v2982_v30  ;;  %v6654_v38 = vld [vmem:[#allocation108_spill] sm:$0xff] }
 0x524   :  { %1298 = vmatpush.msra.mxu3 %v6644_v22  ;;  %1321 = vmatpush.msrb.mxu0 %v6645_v23  ;;  %v6655_v60 = vld [vmem:[#allocation112_spill] sm:$0xff] }
 0x525   :  { %1245 = vmatpush.msra.mxu1 %v2983_v26  ;;  %1268 = vmatpush.msra.mxu2 %v2984_v40 }
 0x526   :  { %1299 = vmatpush.msra.mxu3 %v6646_v52  ;;  %1322 = vmatpush.msrb.mxu0 %v6647_v10  ;;  %v1132_v52 = vmul.f32 %v4595_v39, %v4800_v16  ;;  %v3001_v16 = vld [vmem:[#allocation4 + $0x1d0] sm:$0xff] }
 0x527   :  { %1246 = vmatpush.msra.mxu1 %v2985_v44  ;;  %1269 = vmatpush.msra.mxu2 %v2986_v6  ;;  %v2995_v44 = vld [vmem:[%s6254_s6 + $0x2] ss:$0 sm:$0xff] }
 0x528   :  { %1300 = vmatpush.msra.mxu3 %v6648_v28  ;;  %1323 = vmatpush.msrb.mxu0 %v6649_v34  ;;  %v2996_v34 = vld [vmem:[#allocation4 + $0x1f8] sm:$0xff] }
 0x57c   :  { %v959_v47 = vpop.f32.mrf.mxu1 }
 0x57d   :  { %v960_v24 = vadd.f32 %v959_v47, %v4480_v27  ;;  %v1028_v43 = vpop.f32.mrf.mxu0  ;;  %v2997_v47 = vld [vmem:[#allocation4 + $0x1f0] sm:$0xff] }
 0x57e   :  { %v1029_v4 = vadd.f32 %v1028_v43, %v4490_v55  ;;  %v2999_v43 = vld [vmem:[#allocation4 + $0x1e0] sm:$0xff] }
 0x57f   :  { %v1035_v9 = vmax.f32 %v960_v24, 0.0  ;;  %v2998_v24 = vld [vmem:[#allocation4 + $0x1e8] sm:$0xff] }
 0x580   :  { %v1038_v13 = vmax.f32 %v1029_v4, 0.0  ;;  %v3000_v4 = vld [vmem:[#allocation4 + $0x1d8] sm:$0xff] }
 0x581   :  { %1058 = vmatmul.f32.gmra.mxu1 %v1035_v9  ;;  %v3002_v9 = vld [vmem:[#allocation4 + $0x1c8] sm:$0xff] }
 0x582   :  { %1127 = vmatmul.f32.gmra.mxu0 %v1038_v13  ;;  %v982_v15 = vpop.f32.mrf.mxu2  ;;  %v3003_v13 = vld [vmem:[#allocation4 + $0x1c0] sm:$0xff] }
 0x583   :  { %v983_v33 = vadd.f32 %v982_v15, %v4476_v21  ;;  %v1005_v54 = vpop.f32.mrf.mxu3  ;;  %v3004_v15 = vld [vmem:[#allocation4 + $0x1b8] sm:$0xff] }
 0x584   :  { %v1006_v57 = vadd.f32 %v1005_v54, %v4484_v53  ;;  %v1056_v63 = vpop.f32.mrf.mxu1 }
 0x585   :  { %v1036_v58 = vmax.f32 %v983_v33, 0.0  ;;  %v1057_v17 = vadd.f32 %v4589_v3, %v1056_v63  ;;  %v1125_v8 = vpop.f32.mrf.mxu0  ;;  %v3005_v33 = vld [vmem:[#allocation4 + $0x1b0] sm:$0xff] }
 0x586   :  { %v1037_v62 = vmax.f32 %v1006_v57, 0.0 }
 0x587   :  { %1081 = vmatmul.f32.gmra.mxu2 %v1036_v58 }
 0x588   :  { %1104 = vmatmul.f32.gmra.mxu3 %v1037_v62  ;;  %v3006_v62 = vld [vmem:[%s6254_s6 + $0x3] ss:$0 sm:$0xff] }
 0x58a   :  { %v1079_v49 = vpop.f32.mrf.mxu2 }
 0x58b   :  { %v1080_v32 = vadd.f32 %v1079_v49, %v1057_v17  ;;  %v1102_v20 = vpop.f32.mrf.mxu3 }
 0x58d   :  { %v1103_v14 = vadd.f32 %v1102_v20, %v1080_v32 }
 0x58f   :  { %v1126_v48 = vadd.f32 %v1125_v8, %v1103_v14 }
 0x591   :  { %v4945_v31 = vadd.f32 %v1131_v2, %v1126_v48 }
 0x593   :  { %1151 = vmatmul.f32.vlgmr.msrb.gmra.mxu1 %v4945_v31 }
 0x594   :  { %1331 = vmatpush.msrb.mxu1 %v2987_v36 }
 0x596   :  { %1332 = vmatpush.msrb.mxu1 %v2988_v19 }
 0x598   :  { %1333 = vmatpush.msrb.mxu1 %v2989_v5 }
 0x59a   :  { %1334 = vmatpush.msrb.mxu1 %v2990_v50 }
 0x59c   :  { %1335 = vmatpush.msrb.mxu1 %v2991_v45 }
 0x59e   :  { %1336 = vmatpush.msrb.mxu1 %v2992_v7 }
 0x5a0   :  { %1337 = vmatpush.msrb.mxu1 %v2993_v41 }
 0x5a2   :  { %1338 = vmatpush.msrb.mxu1 %v2994_v46  ;;  %v2593_v46 = vld [vmem:[%s6253_s5 + $0x2e0] sm:$0xff] }
 0x5a4   :  { %1339 = vmatpush.msrb.mxu1 %v6613_v59 }
 0x5a6   :  { %1340 = vmatpush.msrb.mxu1 %v6650_v25  ;;  %v2592_v25 = vld [vmem:[%s6253_s5 + $0x2d8] sm:$0xff] }
 0x5a8   :  { %1341 = vmatpush.msrb.mxu1 %v6651_v37  ;;  %v2591_v37 = vld [vmem:[%s6253_s5 + $0x2d0] sm:$0xff] }
 0x5aa   :  { %1342 = vmatpush.msrb.mxu1 %v6652_v42  ;;  %v2590_v42 = vld [vmem:[%s6253_s5 + $0x2c8] sm:$0xff] }
 0x5ac   :  { %1343 = vmatpush.msrb.mxu1 %v6653_v29  ;;  %v2589_v29 = vld [vmem:[%s6253_s5 + $0x2c0] sm:$0xff] }
 0x5ae   :  { %1344 = vmatpush.msrb.mxu1 %v6654_v38  ;;  %v2588_v38 = vld [vmem:[%s6253_s5 + $0x2b8] sm:$0xff] }
 0x5b0   :  { %1345 = vmatpush.msrb.mxu1 %v6655_v60  ;;  %v2587_v60 = vld [vmem:[%s6253_s5 + $0x2b0] sm:$0xff] }
 0x5b2   :  { %1346 = vmatpush.msrb.mxu1 %v6656_v35  ;;  %v2586_v35 = vld [vmem:[%s6253_s5 + $0x2a8] sm:$0xff] }
 0x5fe   :  { %v1059_v18 = vpop.f32.mrf.mxu1 }
 0x5ff   :  { %v1060_v61 = vadd.f32 %v4589_v3, %v1059_v18  ;;  %v1128_v26 = vpop.f32.mrf.mxu0  ;;  %v2585_v18 = vld [vmem:[%s6253_s5 + $0x2a0] sm:$0xff] }
 0x60a   :  { %v1082_v30 = vpop.f32.mrf.mxu2 }
 0x60b   :  { %v1083_v22 = vadd.f32 %v1082_v30, %v1060_v61  ;;  %v1105_v59 = vpop.f32.mrf.mxu3  ;;  %v2584_v61 = vld [vmem:[%s6253_s5 + $0x298] sm:$0xff]  ;;  %v2583_v30 = vld [vmem:[%s6253_s5 + $0x290] sm:$0xff] }
 0x60d   :  { %v1106_v23 = vadd.f32 %v1105_v59, %v1083_v22  ;;  %v2582_v22 = vld [vmem:[%s6253_s5 + $0x288] sm:$0xff]  ;;  %v2581_v59 = vld [vmem:[%s6253_s5 + $0x280] sm:$0xff] }
 0x60f   :  { %v1129_v40 = vadd.f32 %v1128_v26, %v1106_v23  ;;  %v2628_v23 = vld [vmem:[%s6255_s7 + $0x1f0] sm:$0xff]  ;;  %v2629_v26 = vld [vmem:[%s6255_s7 + $0x1f8] sm:$0xff] }
 0x610   :  { %v1152_v10 = vpop.f32.mrf.mxu1 }
 0x611   :  { %v1153_v6 = vadd.f32 %v2995_v44, %v1152_v10  ;;  %v1134_v28 = vadd.f32 %v1132_v52, %v1129_v40  ;;  %v2626_v40 = vld [vmem:[%s6255_s7 + $0x1e0] sm:$0xff]  ;;  %v2627_v52 = vld [vmem:[%s6255_s7 + $0x1e8] sm:$0xff]  ;;  %v2624_v10 = vld [vmem:[%s6255_s7 + $0x1d0] sm:$0xff] }
 0x613   :  { %1154 = vmatmul.f32.gmra.mxu1 %v1134_v28  ;;  %1174 = vmatmul.f32.vlgmr.msrb.gmra.mxu2 %v1153_v6  ;;  %v2622_v6 = vld [vmem:[%s6255_s7 + $0x1c0] sm:$0xff] }
 0x614   :  { %1354 = vmatpush.msrb.mxu2 %v2996_v34  ;;  %v2620_v34 = vld [vmem:[%s6255_s7 + $0x1b0] sm:$0xff] }
 0x616   :  { %1355 = vmatpush.msrb.mxu2 %v2997_v47  ;;  %v2621_v47 = vld [vmem:[%s6255_s7 + $0x1b8] sm:$0xff] }
 0x618   :  { %1356 = vmatpush.msrb.mxu2 %v2998_v24 }
 0x61a   :  { %1357 = vmatpush.msrb.mxu2 %v2999_v43 }
 0x61c   :  { %1358 = vmatpush.msrb.mxu2 %v3000_v4 }
 0x61e   :  { %1359 = vmatpush.msrb.mxu2 %v3001_v16  ;;  %v2618_v16 = vld [vmem:[%s6255_s7 + $0x1a0] sm:$0xff] }
 0x620   :  { %1360 = vmatpush.msrb.mxu2 %v3002_v9  ;;  %v2619_v9 = vld [vmem:[%s6255_s7 + $0x1a8] sm:$0xff] }
 0x622   :  { %1361 = vmatpush.msrb.mxu2 %v3003_v13 }
 0x624   :  { %1362 = vmatpush.msrb.mxu2 %v3004_v15 }
 0x626   :  { %1363 = vmatpush.msrb.mxu2 %v3005_v33  ;;  %v2617_v33 = vld [vmem:[%s6255_s7 + $0x198] sm:$0xff] }
 0x628   :  { %1364 = vmatpush.msrb.mxu2 %v6630_v0  ;;  %v3007_v0 = vld [vmem:[%s6254_s6 + $0x5] ss:$0 sm:$0xff] }
 0x629   :  { %v1182_v49 = vmul.f32 %v3007_v0, %v1134_v28  ;;  %v2623_v28 = vld [vmem:[%s6255_s7 + $0x1c8] sm:$0xff] }
 0x62a   :  { %1365 = vmatpush.msrb.mxu2 %v6631_v1  ;;  %v1181_v1 = vmul.f32 %v3007_v0, %v4945_v31 }
 0x62c   :  { %1366 = vmatpush.msrb.mxu2 %v6632_v56 }
 0x62e   :  { %1367 = vmatpush.msrb.mxu2 %v6633_v51  ;;  %v2594_v51 = vld [vmem:[%s6253_s5 + $0x2e8] sm:$0xff] }
 0x630   :  { %1368 = vmatpush.msrb.mxu2 %v4413_v11  ;;  %v2596_v11 = vld [vmem:[%s6253_s5 + $0x2f8] sm:$0xff] }
 0x632   :  { %1369 = vmatpush.msrb.mxu2 %v4423_v12  ;;  %v2595_v12 = vld [vmem:[%s6253_s5 + $0x2f0] sm:$0xff] }
 0x690   :  { %v1155_v54 = vpop.f32.mrf.mxu1 }
 0x691   :  { %v1156_v57 = vadd.f32 %v2995_v44, %v1155_v54  ;;  %v2625_v44 = vld [vmem:[%s6255_s7 + $0x1d8] sm:$0xff] }
 0x693   :  { %1177 = vmatmul.f32.gmra.mxu2 %v1156_v57  ;;  %v2580_v57 = vld [vmem:[%s6253_s5 + $0x278] sm:$0xff] }
 0x696   :  { %v1175_v58 = vpop.f32.mrf.mxu2 }
 0x697   :  { %v1176_v63 = vadd.f32 %v3006_v62, %v1175_v58 }
 0x699   :  { %v4975_v56 = vadd.f32 %v1181_v1, %v1176_v63  ;;  %v2579_v63 = vld [vmem:[%s6253_s5 + $0x270] sm:$0xff] }
 0x69b   :  { %1201 = vmatmul.f32.vlgmr.msrb.gmra.mxu3 %v4975_v56  ;;  %1224 = vmatmul.f32.vlgmr.msra.gmra.mxu0 %v4975_v56 }
 0x69c   :  { %1247 = vmatmul.f32.vlgmr.msra.gmra.mxu1 %v4975_v56  ;;  %1270 = vmatmul.f32.vlgmr.msra.gmra.mxu2 %v4975_v56 }
 0x69d   :  { %1415 = vmatpush.msrb.mxu3 %v2596_v11  ;;  %1526 = vmatpush.msra.mxu1 %v2628_v23  ;;  %v2613_v11 = vld [vmem:[%s6255_s7 + $0x178] sm:$0xff] }
 0x69e   :  { %1546 = vmatpush.msra.mxu2 %v2629_v26  ;;  %1435 = vmatpush.msra.mxu0 %v2580_v57  ;;  %v2657_v23 = vld [vmem:[%s6255_s7 + $0x2d8] sm:$0xff]  ;;  %v2654_v26 = vld [vmem:[%s6255_s7 + $0x2c0] sm:$0xff]  ;;  %v2643_v57 = vld [vmem:[%s6255_s7 + $0x268] sm:$0xff] }
 0x69f   :  { %1416 = vmatpush.msrb.mxu3 %v2595_v12  ;;  %1527 = vmatpush.msra.mxu1 %v2626_v40  ;;  %v2655_v40 = vld [vmem:[%s6255_s7 + $0x2c8] sm:$0xff] }
 0x6a0   :  { %1547 = vmatpush.msra.mxu2 %v2627_v52  ;;  %1436 = vmatpush.msra.mxu0 %v2579_v63  ;;  %v2576_v52 = vld [vmem:[%s6253_s5 + $0x258] sm:$0xff]  ;;  %v2569_v63 = vld [vmem:[%s6253_s5 + $0x220] sm:$0xff] }
 0x6a1   :  { %1417 = vmatpush.msrb.mxu3 %v2594_v51  ;;  %1528 = vmatpush.msra.mxu1 %v2624_v10  ;;  %v2612_v51 = vld [vmem:[%s6255_s7 + $0x170] sm:$0xff] }
 0x6a2   :  { %1548 = vmatpush.msra.mxu2 %v2625_v44  ;;  %v2652_v10 = vld [vmem:[%s6255_s7 + $0x2b0] sm:$0xff]  ;;  %v2653_v44 = vld [vmem:[%s6255_s7 + $0x2b8] sm:$0xff] }
 0x6a3   :  { %1418 = vmatpush.msrb.mxu3 %v2593_v46  ;;  %1529 = vmatpush.msra.mxu1 %v2622_v6  ;;  %v2602_v46 = vld [vmem:[%s6255_s7 + $0x120] sm:$0xff]  ;;  %v2575_v6 = vld [vmem:[%s6253_s5 + $0x250] sm:$0xff] }
 0x6a4   :  { %1549 = vmatpush.msra.mxu2 %v2623_v28  ;;  %v2650_v28 = vld [vmem:[%s6255_s7 + $0x2a0] sm:$0xff] }
 0x6a5   :  { %1419 = vmatpush.msrb.mxu3 %v2592_v25  ;;  %1530 = vmatpush.msra.mxu1 %v2620_v34  ;;  %v2651_v34 = vld [vmem:[%s6255_s7 + $0x2a8] sm:$0xff] }
 0x6a6   :  { %1550 = vmatpush.msra.mxu2 %v2621_v47  ;;  %v2574_v47 = vld [vmem:[%s6253_s5 + $0x248] sm:$0xff] }
 0x6a7   :  { %1420 = vmatpush.msrb.mxu3 %v2591_v37  ;;  %1531 = vmatpush.msra.mxu1 %v2618_v16  ;;  %v2646_v16 = vld [vmem:[%s6255_s7 + $0x280] sm:$0xff] }
 0x6a8   :  { %1551 = vmatpush.msra.mxu2 %v2619_v9  ;;  %v2647_v9 = vld [vmem:[%s6255_s7 + $0x288] sm:$0xff] }
 0x6a9   :  { %1421 = vmatpush.msrb.mxu3 %v2590_v42  ;;  %v2600_v42 = vld [vmem:[%s6255_s7 + $0x110] sm:$0xff] }
 0x6aa   :  { %1552 = vmatpush.msra.mxu2 %v2617_v33  ;;  %v2645_v33 = vld [vmem:[%s6255_s7 + $0x278] sm:$0xff] }
 0x6ab   :  { %1422 = vmatpush.msrb.mxu3 %v2589_v29  ;;  %v2601_v29 = vld [vmem:[%s6255_s7 + $0x118] sm:$0xff] }
 0x6ad   :  { %1423 = vmatpush.msrb.mxu3 %v2588_v38 }
 0x6af   :  { %1424 = vmatpush.msrb.mxu3 %v2587_v60  ;;  %v1377_v60 = vmul.f32 %v4595_v39, %v4975_v56  ;;  %v2661_v39 = vld [vmem:[%s6255_s7 + $0x2f8] sm:$0xff]  ;;  %v2658_v56 = vld [vmem:[%s6255_s7 + $0x2e0] sm:$0xff] }
 0x6b1   :  { %1425 = vmatpush.msrb.mxu3 %v2586_v35  ;;  %v2598_v35 = vld [vmem:[%s6255_s7 + $0x100] sm:$0xff] }
 0x6b3   :  { %1426 = vmatpush.msrb.mxu3 %v2585_v18 }
 0x6b5   :  { %1427 = vmatpush.msrb.mxu3 %v2584_v61  ;;  %v2599_v61 = vld [vmem:[%s6255_s7 + $0x108] sm:$0xff] }
 0x6b7   :  { %1428 = vmatpush.msrb.mxu3 %v2583_v30  ;;  %v2660_v30 = vld [vmem:[%s6255_s7 + $0x2f0] sm:$0xff] }
 0x6b9   :  { %1429 = vmatpush.msrb.mxu3 %v2582_v22  ;;  %v2659_v22 = vld [vmem:[%s6255_s7 + $0x2e8] sm:$0xff] }
 0x6bb   :  { %1430 = vmatpush.msrb.mxu3 %v2581_v59  ;;  %v2656_v59 = vld [vmem:[%s6255_s7 + $0x2d0] sm:$0xff] }
 0x716   :  { %v1178_v17 = vpop.f32.mrf.mxu2 }
 0x717   :  { %v1179_v32 = vadd.f32 %v3006_v62, %v1178_v17  ;;  %v2614_v62 = vld [vmem:[%s6255_s7 + $0x180] sm:$0xff] }
 0x718   :  { %v1225_v14 = vpop.f32.mrf.mxu0 }
 0x719   :  { %v4990_v20 = vadd.f32 %v1182_v49, %v1179_v32  ;;  %v1248_v8 = vpop.f32.mrf.mxu1  ;;  %v1226_v48 = vadd.f32 %v1225_v14, %v4476_v21  ;;  %v2610_v32 = vld [vmem:[%s6255_s7 + $0x160] sm:$0xff] }
 0x71a   :  { %v1249_v2 = vadd.f32 %v1248_v8, %v4484_v53  ;;  %v2577_v14 = vld [vmem:[%s6253_s5 + $0x260] sm:$0xff]  ;;  %v2608_v8 = vld [vmem:[%s6255_s7 + $0x150] sm:$0xff] }
 0x71b   :  { %1204 = vmatmul.f32.gmra.mxu3 %v4990_v20  ;;  %1227 = vmatmul.f32.gmra.mxu0 %v4990_v20  ;;  %v1278_v50 = vmax.f32 %v1226_v48, 0.0  ;;  %v2609_v48 = vld [vmem:[%s6255_s7 + $0x158] sm:$0xff] }
 0x71c   :  { %1250 = vmatmul.f32.gmra.mxu1 %v4990_v20  ;;  %1273 = vmatmul.f32.gmra.mxu2 %v4990_v20  ;;  %v1279_v7 = vmax.f32 %v1249_v2, 0.0 }
 0x71e   :  { %v1202_v31 = vpop.f32.mrf.mxu3 }
 0x71f   :  { %v1203_v36 = vadd.f32 %v1202_v31, %v4480_v27  ;;  %v1271_v19 = vpop.f32.mrf.mxu2  ;;  %v2606_v31 = vld [vmem:[%s6255_s7 + $0x140] sm:$0xff] }
 0x720   :  { %v1272_v5 = vadd.f32 %v1271_v19, %v4490_v55 }
 0x721   :  { %v1277_v45 = vmax.f32 %v1203_v36, 0.0  ;;  %v2607_v36 = vld [vmem:[%s6255_s7 + $0x148] sm:$0xff] }
 0x722   :  { %v1280_v41 = vmax.f32 %v1272_v5, 0.0 }
 0x723   :  { %1301 = vmatmul.f32.vlgmr.msra.gmra.mxu3 %v1277_v45  ;;  %1324 = vmatmul.f32.vlgmr.msrb.gmra.mxu0 %v1278_v50  ;;  %v2604_v50 = vld [vmem:[%s6255_s7 + $0x130] sm:$0xff]  ;;  %v2605_v45 = vld [vmem:[%s6255_s7 + $0x138] sm:$0xff] }
 0x724   :  { %1347 = vmatmul.f32.vlgmr.msrb.gmra.mxu1 %v1279_v7  ;;  %1370 = vmatmul.f32.vlgmr.msrb.gmra.mxu2 %v1280_v41 }
 0x798   :  { %v1228_v24 = vpop.f32.mrf.mxu0 }
 0x799   :  { %v1229_v43 = vadd.f32 %v1228_v24, %v4476_v21  ;;  %v1251_v4 = vpop.f32.mrf.mxu1  ;;  %v2616_v21 = vld [vmem:[%s6255_s7 + $0x190] sm:$0xff] }
 0x79a   :  { %v1252_v13 = vadd.f32 %v1251_v4, %v4484_v53  ;;  %v2615_v53 = vld [vmem:[%s6255_s7 + $0x188] sm:$0xff]  ;;  %1532 = vmatpush.msra.mxu1 %v2616_v21  ;;  %v2648_v24 = vld [vmem:[%s6255_s7 + $0x290] sm:$0xff]  ;;  %v2573_v4 = vld [vmem:[%s6253_s5 + $0x240] sm:$0xff] }
 0x79b   :  { %v1282_v15 = vmax.f32 %v1229_v43, 0.0  ;;  %1553 = vmatpush.msra.mxu2 %v2615_v53  ;;  %v2649_v43 = vld [vmem:[%s6255_s7 + $0x298] sm:$0xff]  ;;  %v2642_v21 = vld [vmem:[%s6255_s7 + $0x260] sm:$0xff]  ;;  %v2570_v53 = vld [vmem:[%s6253_s5 + $0x228] sm:$0xff] }
 0x79c   :  { %v1283_v54 = vmax.f32 %v1252_v13, 0.0  ;;  %1533 = vmatpush.msra.mxu1 %v2614_v62  ;;  %v2572_v13 = vld [vmem:[%s6253_s5 + $0x238] sm:$0xff] }
 0x79d   :  { %1327 = vmatmul.f32.gmra.mxu0 %v1282_v15  ;;  %1554 = vmatpush.msra.mxu2 %v2613_v11  ;;  %v2644_v15 = vld [vmem:[%s6255_s7 + $0x270] sm:$0xff]  ;;  %v2641_v62 = vld [vmem:[%s6255_s7 + $0x258] sm:$0xff] }
 0x79e   :  { %1350 = vmatmul.f32.gmra.mxu1 %v1283_v54  ;;  %v1205_v58 = vpop.f32.mrf.mxu3  ;;  %v2571_v54 = vld [vmem:[%s6253_s5 + $0x230] sm:$0xff]  ;;  %v2568_v11 = vld [vmem:[%s6253_s5 + $0x218] sm:$0xff] }
 0x79f   :  { %v1206_v0 = vadd.f32 %v1205_v58, %v4480_v27  ;;  %v1274_v1 = vpop.f32.mrf.mxu2  ;;  %v2578_v27 = vld [vmem:[%s6253_s5 + $0x268] sm:$0xff]  ;;  %1534 = vmatpush.msra.mxu1 %v2612_v51  ;;  %v2640_v58 = vld [vmem:[%s6255_s7 + $0x250] sm:$0xff]  ;;  %v2637_v51 = vld [vmem:[%s6255_s7 + $0x238] sm:$0xff] }
 0x7a0   :  { %v1275_v12 = vadd.f32 %v1274_v1, %v4490_v55  ;;  %v2611_v55 = vld [vmem:[%s6255_s7 + $0x168] sm:$0xff]  ;;  %1437 = vmatpush.msra.mxu0 %v2578_v27  ;;  %v1325_v5 = vpop.f32.mrf.mxu0  ;;  %v2634_v27 = vld [vmem:[%s6255_s7 + $0x220] sm:$0xff] }
 0x7a1   :  { %v1281_v17 = vmax.f32 %v1206_v0, 0.0  ;;  %1535 = vmatpush.msra.mxu1 %v2610_v32  ;;  %1555 = vmatpush.msra.mxu2 %v2611_v55  ;;  %v1348_v41 = vpop.f32.mrf.mxu1  ;;  %v2638_v0 = vld [vmem:[%s6255_s7 + $0x240] sm:$0xff]  ;;  %v2639_v1 = vld [vmem:[%s6255_s7 + $0x248] sm:$0xff]  ;;  %v2632_v55 = vld [vmem:[%s6255_s7 + $0x210] sm:$0xff] }
 0x7a2   :  { %v1284_v49 = vmax.f32 %v1275_v12, 0.0  ;;  %1438 = vmatpush.msra.mxu0 %v2577_v14  ;;  %v2636_v12 = vld [vmem:[%s6255_s7 + $0x230] sm:$0xff]  ;;  %v2566_v32 = vld [vmem:[%s6253_s5 + $0x208] sm:$0xff]  ;;  %v2633_v14 = vld [vmem:[%s6255_s7 + $0x218] sm:$0xff] }
 0x7a3   :  { %1304 = vmatmul.f32.gmra.mxu3 %v1281_v17  ;;  %1536 = vmatpush.msra.mxu1 %v2608_v8  ;;  %v2567_v17 = vld [vmem:[%s6253_s5 + $0x210] sm:$0xff]  ;;  %v2565_v8 = vld [vmem:[%s6253_s5 + $0x200] sm:$0xff] }
 0x7a4   :  { %1373 = vmatmul.f32.gmra.mxu2 %v1284_v49  ;;  %1439 = vmatpush.msra.mxu0 %v2576_v52  ;;  %v2635_v49 = vld [vmem:[%s6255_s7 + $0x228] sm:$0xff]  ;;  %v2674_v52 = vld [vmem:[%s6253_s5 + $0x358] sm:$0xff] }
 0x7a5   :  { %1556 = vmatpush.msra.mxu2 %v2609_v48  ;;  %1537 = vmatpush.msra.mxu1 %v2606_v31  ;;  %v2630_v48 = vld [vmem:[%s6255_s7 + $0x200] sm:$0xff] }
 0x7a6   :  { %v1302_v2 = vpop.f32.mrf.mxu3  ;;  %1440 = vmatpush.msra.mxu0 %v2575_v6  ;;  %v1486_v6 = vld [vmem:[%s6255_s7 + $0xc8] sm:$0xff] }
 0x7a7   :  { %v1303_v19 = vadd.f32 %v4589_v3, %v1302_v2  ;;  %1557 = vmatpush.msra.mxu2 %v2607_v36  ;;  %v2603_v3 = vld [vmem:[%s6255_s7 + $0x128] sm:$0xff]  ;;  %1538 = vmatpush.msra.mxu1 %v2604_v50  ;;  %v1371_v37 = vpop.f32.mrf.mxu2  ;;  %v3008_v36 = vld [vmem:[%s6254_s6 + $0x4] ss:$0 sm:$0xff] }
 0x7a8   :  { %1441 = vmatpush.msra.mxu0 %v2574_v47  ;;  %v2631_v2 = vld [vmem:[%s6255_s7 + $0x208] sm:$0xff] }
 0x7a9   :  { %v1326_v7 = vadd.f32 %v1325_v5, %v1303_v19  ;;  %1558 = vmatpush.msra.mxu2 %v2605_v45  ;;  %1539 = vmatpush.msra.mxu1 %v2602_v46  ;;  %v2688_v47 = vld [vmem:[%s6253_s5 + $0x3c8] sm:$0xff] }
 0x7aa   :  { %1442 = vmatpush.msra.mxu0 %v2573_v4  ;;  %v1481_v4 = vld [vmem:[%s6255_s7 + $0xa0] sm:$0xff] }
 0x7ab   :  { %v1349_v25 = vadd.f32 %v1348_v41, %v1326_v7  ;;  %1559 = vmatpush.msra.mxu2 %v2603_v3  ;;  %1540 = vmatpush.msra.mxu1 %v2600_v42  ;;  %v3009_v3 = vld [vmem:[%s6254_s6 + $0x6] ss:$0 sm:$0xff]  ;;  %v2694_v42 = vld [vmem:[%s6253_s5 + $0x3f8] sm:$0xff] }
 0x7ac   :  { %1443 = vmatpush.msra.mxu0 %v2572_v13  ;;  %v2671_v13 = vld [vmem:[%s6253_s5 + $0x340] sm:$0xff] }
 0x7ad   :  { %v1372_v38 = vadd.f32 %v1371_v37, %v1349_v25  ;;  %1560 = vmatpush.msra.mxu2 %v2601_v29  ;;  %1541 = vmatpush.msra.mxu1 %v2598_v35  ;;  %v1378_v25 = vmul.f32 %v3009_v3, %v4990_v20  ;;  %v2678_v29 = vld [vmem:[%s6253_s5 + $0x378] sm:$0xff]  ;;  %v2677_v20 = vld [vmem:[%s6253_s5 + $0x370] sm:$0xff] }
 0x7ae   :  { %1444 = vmatpush.msra.mxu0 %v2571_v54  ;;  %v1492_v35 = vld [vmem:[%s6255_s7 + $0xf8] sm:$0xff]  ;;  %v1463_v3 = vld [vmem:[%s6255_s7 + $0x10] sm:$0xff] }
 0x7af   :  { %v5151_v18 = vadd.f32 %v1377_v60, %v1372_v38  ;;  %1561 = vmatpush.msra.mxu2 %v2599_v61  ;;  %1639 = vmatpush.msrb.mxu1 %v2660_v30  ;;  %v2693_v38 = vld [vmem:[%s6253_s5 + $0x3f0] sm:$0xff]  ;;  %v1489_v61 = vld [vmem:[%s6255_s7 + $0xe0] sm:$0xff]  ;;  %v2692_v30 = vld [vmem:[%s6253_s5 + $0x3e8] sm:$0xff] }
 0x7b0   :  { %1445 = vmatpush.msra.mxu0 %v2570_v53  ;;  %v1491_v60 = vld [vmem:[%s6255_s7 + $0xf0] sm:$0xff]  ;;  %v1480_v54 = vld [vmem:[%s6255_s7 + $0x98] sm:$0xff] }
 0x7b1   :  { %1431 = vmatmul.f32.vlgmr.msrb.gmra.mxu3 %v5151_v18  ;;  %1659 = vmatpush.msrb.mxu2 %v2661_v39  ;;  %v1490_v39 = vld [vmem:[%s6255_s7 + $0xe8] sm:$0xff]  ;;  %v2685_v53 = vld [vmem:[%s6253_s5 + $0x3b0] sm:$0xff] }
 0x7b2   :  { %1640 = vmatpush.msrb.mxu1 %v2658_v56  ;;  %1446 = vmatpush.msra.mxu0 %v2569_v63  ;;  %v2676_v56 = vld [vmem:[%s6253_s5 + $0x368] sm:$0xff]  ;;  %v1475_v63 = vld [vmem:[%s6255_s7 + $0x70] sm:$0xff] }
 0x7b3   :  { %1660 = vmatpush.msrb.mxu2 %v2659_v22  ;;  %1566 = vmatpush.msra.mxu3 %v1491_v60  ;;  %v1487_v22 = vld [vmem:[%s6255_s7 + $0xd0] sm:$0xff] }
 0x7b4   :  { %1641 = vmatpush.msrb.mxu1 %v2656_v59  ;;  %1447 = vmatpush.msra.mxu0 %v2568_v11  ;;  %v2691_v59 = vld [vmem:[%s6253_s5 + $0x3e0] sm:$0xff]  ;;  %v2668_v11 = vld [vmem:[%s6253_s5 + $0x328] sm:$0xff] }
 0x7b5   :  { %1661 = vmatpush.msrb.mxu2 %v2657_v23  ;;  %1567 = vmatpush.msra.mxu3 %v1489_v61  ;;  %v1488_v23 = vld [vmem:[%s6255_s7 + $0xd8] sm:$0xff]  ;;  %v1721_v61 = vld [vmem:[#allocation2 + $0xf0] sm:$0xff] }
 0x7b6   :  { %1642 = vmatpush.msrb.mxu1 %v2654_v26  ;;  %1448 = vmatpush.msra.mxu0 %v2567_v17  ;;  %v2675_v26 = vld [vmem:[%s6253_s5 + $0x360] sm:$0xff]  ;;  %v1474_v17 = vld [vmem:[%s6255_s7 + $0x68] sm:$0xff] }
 0x7b7   :  { %1662 = vmatpush.msrb.mxu2 %v2655_v40  ;;  %v2690_v40 = vld [vmem:[%s6253_s5 + $0x3d8] sm:$0xff]  ;;  %1568 = vmatpush.msra.mxu3 %v1487_v22  ;;  %v1704_v22 = vld [vmem:[#allocation2 + $0x68] sm:$0xff] }
 0x7b8   :  { %1643 = vmatpush.msrb.mxu1 %v2652_v10  ;;  %1449 = vmatpush.msra.mxu0 %v2566_v32  ;;  %v1485_v10 = vld [vmem:[%s6255_s7 + $0xc0] sm:$0xff]  ;;  %v2682_v32 = vld [vmem:[%s6253_s5 + $0x398] sm:$0xff] }
 0x7b9   :  { %1663 = vmatpush.msrb.mxu2 %v2653_v44  ;;  %v2689_v44 = vld [vmem:[%s6253_s5 + $0x3d0] sm:$0xff]  ;;  %1569 = vmatpush.msra.mxu3 %v1485_v10 }
 0x7ba   :  { %1644 = vmatpush.msrb.mxu1 %v2650_v28  ;;  %1450 = vmatpush.msra.mxu0 %v2565_v8  ;;  %v2673_v28 = vld [vmem:[%s6253_s5 + $0x350] sm:$0xff]  ;;  %v1469_v8 = vld [vmem:[%s6255_s7 + $0x40] sm:$0xff] }
 0x7bb   :  { %1664 = vmatpush.msrb.mxu2 %v2651_v34  ;;  %v1483_v34 = vld [vmem:[%s6255_s7 + $0xb0] sm:$0xff] }
 0x7bc   :  { %1645 = vmatpush.msrb.mxu1 %v2648_v24  ;;  %1586 = vmatpush.msrb.mxu0 %v1492_v35  ;;  %v1484_v24 = vld [vmem:[%s6255_s7 + $0xb8] sm:$0xff]  ;;  %v1701_v10 = vld [vmem:[#allocation2 + $0x50] sm:$0xff] }
 0x7bd   :  { %1665 = vmatpush.msrb.mxu2 %v2649_v43  ;;  %v2672_v43 = vld [vmem:[%s6253_s5 + $0x348] sm:$0xff]  ;;  %1570 = vmatpush.msra.mxu3 %v1483_v34  ;;  %v1722_v35 = vld [vmem:[#allocation2 + $0xf8] sm:$0xff]  ;;  %v1699_v34 = vld [vmem:[#allocation2 + $0x40] sm:$0xff] }
 0x7be   :  { %1646 = vmatpush.msrb.mxu1 %v2646_v16  ;;  %1587 = vmatpush.msrb.mxu0 %v1490_v39  ;;  %v2687_v16 = vld [vmem:[%s6253_s5 + $0x3c0] sm:$0xff]  ;;  %v1705_v39 = vld [vmem:[#allocation2 + $0x70] sm:$0xff] }
 0x7bf   :  { %1666 = vmatpush.msrb.mxu2 %v2647_v9  ;;  %v1482_v9 = vld [vmem:[%s6255_s7 + $0xa8] sm:$0xff]  ;;  %1571 = vmatpush.msra.mxu3 %v1481_v4  ;;  %v1698_v4 = vld [vmem:[#allocation2 + $0x38] sm:$0xff] }
 0x7c0   :  { %1647 = vmatpush.msrb.mxu1 %v2644_v15  ;;  %1588 = vmatpush.msrb.mxu0 %v1488_v23  ;;  %v1479_v15 = vld [vmem:[%s6255_s7 + $0x90] sm:$0xff]  ;;  %v1703_v23 = vld [vmem:[#allocation2 + $0x60] sm:$0xff] }
 0x7c1   :  { %1667 = vmatpush.msrb.mxu2 %v2645_v33  ;;  %v2686_v33 = vld [vmem:[%s6253_s5 + $0x3b8] sm:$0xff]  ;;  %1572 = vmatpush.msra.mxu3 %v1479_v15  ;;  %v1696_v15 = vld [vmem:[#allocation2 + $0x28] sm:$0xff] }
 0x7c2   :  { %1648 = vmatpush.msrb.mxu1 %v2642_v21  ;;  %1589 = vmatpush.msrb.mxu0 %v1486_v6  ;;  %v2670_v21 = vld [vmem:[%s6253_s5 + $0x338] sm:$0xff]  ;;  %v1700_v6 = vld [vmem:[#allocation2 + $0x48] sm:$0xff] }
 0x7c3   :  { %1668 = vmatpush.msrb.mxu2 %v2643_v57  ;;  %v1477_v57 = vld [vmem:[%s6255_s7 + $0x80] sm:$0xff] }
 0x7c4   :  { %1649 = vmatpush.msrb.mxu1 %v2640_v58  ;;  %1590 = vmatpush.msrb.mxu0 %v1484_v24  ;;  %v1478_v58 = vld [vmem:[%s6255_s7 + $0x88] sm:$0xff]  ;;  %v1713_v24 = vld [vmem:[#allocation2 + $0xb0] sm:$0xff] }
 0x7c5   :  { %1669 = vmatpush.msrb.mxu2 %v2641_v62  ;;  %v2669_v62 = vld [vmem:[%s6253_s5 + $0x330] sm:$0xff]  ;;  %1573 = vmatpush.msra.mxu3 %v1477_v57  ;;  %v1694_v57 = vld [vmem:[#allocation2 + $0x18] sm:$0xff] }
 0x7c6   :  { %1650 = vmatpush.msrb.mxu1 %v2638_v0  ;;  %1591 = vmatpush.msrb.mxu0 %v1482_v9  ;;  %v2684_v0 = vld [vmem:[%s6253_s5 + $0x3a8] sm:$0xff]  ;;  %v1697_v9 = vld [vmem:[#allocation2 + $0x30] sm:$0xff] }
 0x7c7   :  { %1670 = vmatpush.msrb.mxu2 %v2639_v1  ;;  %v1476_v1 = vld [vmem:[%s6255_s7 + $0x78] sm:$0xff]  ;;  %1574 = vmatpush.msra.mxu3 %v1475_v63  ;;  %v1691_v63 = vld [vmem:[#allocation2] sm:$0xff] }
 0x7c8   :  { %1651 = vmatpush.msrb.mxu1 %v2636_v12  ;;  %1592 = vmatpush.msrb.mxu0 %v1480_v54  ;;  %v1473_v12 = vld [vmem:[%s6255_s7 + $0x60] sm:$0xff] }
 0x7c9   :  { %1671 = vmatpush.msrb.mxu2 %v2637_v51  ;;  %v2683_v51 = vld [vmem:[%s6253_s5 + $0x3a0] sm:$0xff]  ;;  %1575 = vmatpush.msra.mxu3 %v1473_v12  ;;  %v2739_v12 = vld [vmem:[%s6261_s13 + $0x2d8] sm:$0xff] }
 0x7ca   :  { %1652 = vmatpush.msrb.mxu1 %v2634_v27  ;;  %1593 = vmatpush.msrb.mxu0 %v1478_v58  ;;  %v2667_v27 = vld [vmem:[%s6253_s5 + $0x320] sm:$0xff]  ;;  %v1693_v58 = vld [vmem:[#allocation2 + $0x10] sm:$0xff] }
 0x7cb   :  { %1672 = vmatpush.msrb.mxu2 %v2635_v49  ;;  %v1471_v49 = vld [vmem:[%s6255_s7 + $0x50] sm:$0xff]  ;;  %v1695_v54 = vld [vmem:[#allocation2 + $0x20] sm:$0xff] }
 0x7cc   :  { %1653 = vmatpush.msrb.mxu1 %v2632_v55  ;;  %1594 = vmatpush.msrb.mxu0 %v1476_v1  ;;  %v1472_v55 = vld [vmem:[%s6255_s7 + $0x58] sm:$0xff]  ;;  %v2742_v1 = vld [vmem:[%s6261_s13 + $0x2f0] sm:$0xff] }
 0x7cd   :  { %1673 = vmatpush.msrb.mxu2 %v2633_v14  ;;  %v2666_v14 = vld [vmem:[%s6253_s5 + $0x318] sm:$0xff]  ;;  %1576 = vmatpush.msra.mxu3 %v1471_v49  ;;  %v1896_v49 = vld [vmem:[%s6261_s13 + $0x168] sm:$0xff] }
 0x7ce   :  { %1654 = vmatpush.msrb.mxu1 %v2630_v48  ;;  %1595 = vmatpush.msrb.mxu0 %v1474_v17  ;;  %v2681_v48 = vld [vmem:[%s6253_s5 + $0x390] sm:$0xff]  ;;  %v2735_v17 = vld [vmem:[%s6261_s13 + $0x2b8] sm:$0xff] }
 0x7cf   :  { %1674 = vmatpush.msrb.mxu2 %v2631_v2  ;;  %v1470_v2 = vld [vmem:[%s6255_s7 + $0x48] sm:$0xff]  ;;  %1577 = vmatpush.msra.mxu3 %v1469_v8  ;;  %v1893_v8 = vld [vmem:[%s6261_s13 + $0x150] sm:$0xff] }
 0x7d0   :  { %1596 = vmatpush.msrb.mxu0 %v1472_v55  ;;  %v2740_v55 = vld [vmem:[%s6261_s13 + $0x2e0] sm:$0xff] }
 0x7d2   :  { %1597 = vmatpush.msrb.mxu0 %v1470_v2  ;;  %v2737_v2 = vld [vmem:[%s6261_s13 + $0x2c8] sm:$0xff] }
 0x81a   :  { %v1328_v5 = vpop.f32.mrf.mxu0 }
 0x81b   :  { %v1351_v45 = vpop.f32.mrf.mxu1 }
 0x826   :  { %v1305_v31 = vpop.f32.mrf.mxu3 }
 0x827   :  { %v1306_v19 = vadd.f32 %v3008_v36, %v1305_v31  ;;  %v1374_v41 = vpop.f32.mrf.mxu2  ;;  %v2665_v31 = vld [vmem:[%s6253_s5 + $0x310] sm:$0xff] }
 0x828   :  { %v1467_v36 = vld [vmem:[%s6255_s7 + $0x30] sm:$0xff] }
 0x829   :  { %v1329_v50 = vadd.f32 %v1328_v5, %v1306_v19  ;;  %v2680_v19 = vld [vmem:[%s6253_s5 + $0x388] sm:$0xff]  ;;  %v1468_v5 = vld [vmem:[%s6255_s7 + $0x38] sm:$0xff]  ;;  %1578 = vmatpush.msra.mxu3 %v1467_v36 }
 0x82a   :  { %1598 = vmatpush.msrb.mxu0 %v1468_v5  ;;  %v2729_v36 = vld [vmem:[%s6261_s13 + $0x288] sm:$0xff]  ;;  %v2727_v5 = vld [vmem:[%s6261_s13 + $0x278] sm:$0xff] }
 0x82b   :  { %v1352_v7 = vadd.f32 %v1351_v45, %v1329_v50  ;;  %v2664_v50 = vld [vmem:[%s6253_s5 + $0x308] sm:$0xff]  ;;  %v2679_v45 = vld [vmem:[%s6253_s5 + $0x380] sm:$0xff] }
 0x82d   :  { %v1375_v46 = vadd.f32 %v1374_v41, %v1352_v7  ;;  %v2663_v7 = vld [vmem:[%s6253_s5 + $0x300] sm:$0xff] }
 0x82e   :  { %v1465_v41 = vld [vmem:[%s6255_s7 + $0x20] sm:$0xff] }
 0x82f   :  { %v5296_v37 = vadd.f32 %v1378_v25, %v1375_v46  ;;  %v1466_v46 = vld [vmem:[%s6255_s7 + $0x28] sm:$0xff]  ;;  %1579 = vmatpush.msra.mxu3 %v1465_v41  ;;  %v1461_v25 = vld [vmem:[%s6255_s7] sm:$0xff]  ;;  %v2731_v41 = vld [vmem:[%s6261_s13 + $0x298] sm:$0xff] }
 0x830   :  { %1599 = vmatpush.msrb.mxu0 %v1466_v46  ;;  %v2724_v46 = vld [vmem:[%s6261_s13 + $0x260] sm:$0xff] }
 0x831   :  { %1451 = vmatmul.f32.vlgmr.msra.gmra.mxu0 %v5296_v37  ;;  %1542 = vmatmul.f32.vlgmr.msra.gmra.mxu1 %v5296_v37 }
 0x832   :  { %1562 = vmatmul.f32.vlgmr.msra.gmra.mxu2 %v5296_v37  ;;  %1802 = vmatpush.msra.mxu1 %v2694_v42  ;;  %v2892_v42 = vld [vmem:[%s6254_s6 + $0x7] ss:$0 sm:$0xff] }
 0x833   :  { %1822 = vmatpush.msra.mxu2 %v2678_v29  ;;  %1580 = vmatpush.msra.mxu3 %v1463_v3  ;;  %v1884_v3 = vld [vmem:[%s6261_s13 + $0x108] sm:$0xff] }
 0x834   :  { %1803 = vmatpush.msra.mxu1 %v2693_v38  ;;  %v1432_v29 = vpop.f32.mrf.mxu3 }
 0x835   :  { %1823 = vmatpush.msra.mxu2 %v2677_v20  ;;  %1581 = vmatpush.msra.mxu3 %v1461_v25  ;;  %v2728_v25 = vld [vmem:[%s6261_s13 + $0x280] sm:$0xff] }
 0x836   :  { %1804 = vmatpush.msra.mxu1 %v2692_v30  ;;  %v1706_v30 = vld [vmem:[#allocation2 + $0x78] sm:$0xff] }
 0x837   :  { %1824 = vmatpush.msra.mxu2 %v2676_v56  ;;  %v1720_v56 = vld [vmem:[#allocation2 + $0xe8] sm:$0xff]  ;;  %1728 = vmatpush.msrb.mxu3 %v1706_v30 }
 0x838   :  { %1805 = vmatpush.msra.mxu1 %v2691_v59  ;;  %v1719_v59 = vld [vmem:[#allocation2 + $0xe0] sm:$0xff]  ;;  %v2717_v30 = vld [vmem:[%s6261_s13 + $0x228] sm:$0xff] }
 0x839   :  { %1825 = vmatpush.msra.mxu2 %v2675_v26  ;;  %1655 = vmatmul.f32.vlgmr.msrb.gmra.mxu1 %v5151_v18  ;;  %v1718_v26 = vld [vmem:[#allocation2 + $0xd8] sm:$0xff] }
 0x83a   :  { %1675 = vmatmul.f32.vlgmr.msrb.gmra.mxu2 %v5151_v18  ;;  %1806 = vmatpush.msra.mxu1 %v2690_v40  ;;  %v1702_v40 = vld [vmem:[#allocation2 + $0x58] sm:$0xff] }
 0x83b   :  { %1826 = vmatpush.msra.mxu2 %v2674_v52  ;;  %1729 = vmatpush.msrb.mxu3 %v1705_v39  ;;  %v1717_v52 = vld [vmem:[#allocation2 + $0xd0] sm:$0xff] }
 0x83c   :  { %1807 = vmatpush.msra.mxu1 %v2689_v44  ;;  %v1716_v44 = vld [vmem:[#allocation2 + $0xc8] sm:$0xff]  ;;  %v2722_v39 = vld [vmem:[%s6261_s13 + $0x250] sm:$0xff] }
 0x83d   :  { %1827 = vmatpush.msra.mxu2 %v2673_v28  ;;  %1730 = vmatpush.msrb.mxu3 %v1704_v22  ;;  %v1715_v28 = vld [vmem:[#allocation2 + $0xc0] sm:$0xff] }
 0x83e   :  { %1808 = vmatpush.msra.mxu1 %v2688_v47  ;;  %v1714_v47 = vld [vmem:[#allocation2 + $0xb8] sm:$0xff]  ;;  %v1875_v22 = vld [vmem:[%s6261_s13 + $0xc0] sm:$0xff] }
 0x83f   :  { %1828 = vmatpush.msra.mxu2 %v2672_v43  ;;  %1731 = vmatpush.msrb.mxu3 %v1703_v23  ;;  %v1712_v43 = vld [vmem:[#allocation2 + $0xa8] sm:$0xff]  ;;  %v2714_v23 = vld [vmem:[%s6261_s13 + $0x210] sm:$0xff] }
 0x840   :  { %1809 = vmatpush.msra.mxu1 %v2687_v16  ;;  %v1711_v16 = vld [vmem:[#allocation2 + $0xa0] sm:$0xff] }
 0x841   :  { %1829 = vmatpush.msra.mxu2 %v2671_v13  ;;  %1732 = vmatpush.msrb.mxu3 %v1702_v40  ;;  %v1710_v13 = vld [vmem:[#allocation2 + $0x98] sm:$0xff] }
 0x842   :  { %1810 = vmatpush.msra.mxu1 %v2686_v33  ;;  %v1709_v33 = vld [vmem:[#allocation2 + $0x90] sm:$0xff] }
 0x843   :  { %1830 = vmatpush.msra.mxu2 %v2670_v21  ;;  %1733 = vmatpush.msrb.mxu3 %v1701_v10  ;;  %v1708_v21 = vld [vmem:[#allocation2 + $0x88] sm:$0xff]  ;;  %v2712_v10 = vld [vmem:[%s6261_s13 + $0x200] sm:$0xff] }
 0x844   :  { %1811 = vmatpush.msra.mxu1 %v2685_v53  ;;  %v1707_v53 = vld [vmem:[#allocation2 + $0x80] sm:$0xff] }
 0x845   :  { %1831 = vmatpush.msra.mxu2 %v2669_v62  ;;  %1734 = vmatpush.msrb.mxu3 %v1700_v6  ;;  %v1692_v62 = vld [vmem:[#allocation2 + $0x8] sm:$0xff] }
 0x846   :  { %1812 = vmatpush.msra.mxu1 %v2684_v0  ;;  %v2741_v0 = vld [vmem:[%s6261_s13 + $0x2e8] sm:$0xff] }
 0x847   :  { %1832 = vmatpush.msra.mxu2 %v2668_v11  ;;  %1735 = vmatpush.msrb.mxu3 %v1699_v34  ;;  %v2738_v11 = vld [vmem:[%s6261_s13 + $0x2d0] sm:$0xff]  ;;  %v2716_v34 = vld [vmem:[%s6261_s13 + $0x220] sm:$0xff] }
 0x848   :  { %1813 = vmatpush.msra.mxu1 %v2683_v51  ;;  %v2736_v51 = vld [vmem:[%s6261_s13 + $0x2c0] sm:$0xff] }
 0x849   :  { %1833 = vmatpush.msra.mxu2 %v2667_v27  ;;  %1736 = vmatpush.msrb.mxu3 %v1698_v4  ;;  %v2743_v27 = vld [vmem:[%s6261_s13 + $0x2f8] sm:$0xff]  ;;  %v2708_v4 = vld [vmem:[%s6261_s13 + $0x1e0] sm:$0xff] }
 0x84a   :  { %1814 = vmatpush.msra.mxu1 %v2682_v32  ;;  %v2733_v32 = vld [vmem:[%s6261_s13 + $0x2a8] sm:$0xff] }
 0x84b   :  { %1834 = vmatpush.msra.mxu2 %v2666_v14  ;;  %1737 = vmatpush.msrb.mxu3 %v1697_v9  ;;  %v2732_v14 = vld [vmem:[%s6261_s13 + $0x2a0] sm:$0xff] }
 0x84c   :  { %1815 = vmatpush.msra.mxu1 %v2681_v48  ;;  %v2730_v48 = vld [vmem:[%s6261_s13 + $0x290] sm:$0xff] }
 0x84d   :  { %1835 = vmatpush.msra.mxu2 %v2665_v31  ;;  %1738 = vmatpush.msrb.mxu3 %v1696_v15  ;;  %v1890_v31 = vld [vmem:[%s6261_s13 + $0x138] sm:$0xff] }
 0x84e   :  { %1816 = vmatpush.msra.mxu1 %v2680_v19  ;;  %v2734_v19 = vld [vmem:[%s6261_s13 + $0x2b0] sm:$0xff]  ;;  %v1866_v15 = vld [vmem:[%s6261_s13 + $0x78] sm:$0xff] }
 0x84f   :  { %1836 = vmatpush.msra.mxu2 %v2664_v50  ;;  %1739 = vmatpush.msrb.mxu3 %v1695_v54  ;;  %v1887_v50 = vld [vmem:[%s6261_s13 + $0x120] sm:$0xff]  ;;  %v2705_v54 = vld [vmem:[%s6261_s13 + $0x1c8] sm:$0xff] }
 0x850   :  { %1817 = vmatpush.msra.mxu1 %v2679_v45 }
 0x851   :  { %1837 = vmatpush.msra.mxu2 %v2663_v7  ;;  %1818 = vmatmul.f32.vlgmr.msra.gmra.mxu1 %v5151_v18  ;;  %v1464_v18 = vld [vmem:[%s6255_s7 + $0x18] sm:$0xff]  ;;  %v2726_v7 = vld [vmem:[%s6261_s13 + $0x270] sm:$0xff] }
 0x852   :  { %1838 = vmatmul.f32.vlgmr.msra.gmra.mxu2 %v5296_v37  ;;  %1600 = vmatpush.msrb.mxu0 %v1464_v18  ;;  %v1462_v37 = vld [vmem:[%s6255_s7 + $0x8] sm:$0xff]  ;;  %v2723_v18 = vld [vmem:[%s6261_s13 + $0x258] sm:$0xff] }
 0x853   :  { %1740 = vmatpush.msrb.mxu3 %v1694_v57  ;;  %1989 = vmatpush.msrb.mxu1 %v2743_v27  ;;  %v1860_v27 = vld [vmem:[%s6261_s13 + $0x48] sm:$0xff] }
 0x854   :  { %1601 = vmatpush.msrb.mxu0 %v1462_v37  ;;  %2009 = vmatpush.msrb.mxu2 %v1896_v49  ;;  %v2721_v37 = vld [vmem:[%s6261_s13 + $0x248] sm:$0xff] }
 0x855   :  { %1741 = vmatpush.msrb.mxu3 %v1693_v58  ;;  %1990 = vmatpush.msrb.mxu1 %v2740_v55  ;;  %v2703_v58 = vld [vmem:[%s6261_s13 + $0x1b8] sm:$0xff]  ;;  %v2704_v55 = vld [vmem:[%s6261_s13 + $0x1c0] sm:$0xff] }
 0x856   :  { %1748 = vmatpush.msra.mxu0 %v1722_v35  ;;  %2010 = vmatpush.msrb.mxu2 %v1893_v8 }
 0x857   :  { %1742 = vmatpush.msrb.mxu3 %v1692_v62  ;;  %1991 = vmatpush.msrb.mxu1 %v2737_v2  ;;  %v2710_v62 = vld [vmem:[%s6261_s13 + $0x1f0] sm:$0xff] }
 0x858   :  { %1749 = vmatpush.msra.mxu0 %v1721_v61  ;;  %2011 = vmatpush.msrb.mxu2 %v1890_v31  ;;  %v5596_v61 = vld [vmem:[%s6256_s8] sm:$0x3]  ;;  %v1857_v2 = vld [vmem:[%s6261_s13 + $0x30] sm:$0xff] }
 0x859   :  { %1743 = vmatpush.msrb.mxu3 %v1691_v63  ;;  %1992 = vmatpush.msrb.mxu1 %v2734_v19  ;;  %v1897_v31 = vld [vmem:[%s6261_s13 + $0x170] sm:$0xff]  ;;  %v2701_v19 = vld [vmem:[%s6261_s13 + $0x1a8] sm:$0xff] }
 0x85a   :  { %1750 = vmatpush.msra.mxu0 %v1720_v56  ;;  %2012 = vmatpush.msrb.mxu2 %v1887_v50  ;;  %v2715_v56 = vld [vmem:[%s6261_s13 + $0x218] sm:$0xff] }
 0x85b   :  { %1993 = vmatpush.msrb.mxu1 %v2731_v41  ;;  %v1894_v50 = vld [vmem:[%s6261_s13 + $0x158] sm:$0xff]  ;;  %v1851_v41 = vld [vmem:[%s6261_s13] sm:$0xff] }
 0x85c   :  { %1751 = vmatpush.msra.mxu0 %v1719_v59  ;;  %2013 = vmatpush.msrb.mxu2 %v1884_v3  ;;  %v1889_v3 = vld [vmem:[%s6261_s13 + $0x130] sm:$0xff] }
 0x85d   :  { %1994 = vmatpush.msrb.mxu1 %v2728_v25  ;;  %v2790_v25 = vld [vmem:[%s6261_s13 + $0x470] sm:$0xff] }
 0x85e   :  { %1752 = vmatpush.msra.mxu0 %v1718_v26  ;;  %v2719_v26 = vld [vmem:[%s6261_s13 + $0x238] sm:$0xff] }
 0x860   :  { %1753 = vmatpush.msra.mxu0 %v1717_v52  ;;  %v1684_v52 = vperm.slane %v5596_v61, 1 }
 0x862   :  { %1754 = vmatpush.msra.mxu0 %v1716_v44  ;;  %v1872_v44 = vld [vmem:[%s6261_s13 + $0xa8] sm:$0xff] }
 0x864   :  { %1755 = vmatpush.msra.mxu0 %v1715_v28  ;;  %v2711_v28 = vld [vmem:[%s6261_s13 + $0x1f8] sm:$0xff] }
 0x866   :  { %1756 = vmatpush.msra.mxu0 %v1714_v47 }
 0x868   :  { %1757 = vmatpush.msra.mxu0 %v1713_v24  ;;  %v2709_v24 = vld [vmem:[%s6261_s13 + $0x1e8] sm:$0xff] }
 0x86a   :  { %1758 = vmatpush.msra.mxu0 %v1712_v43  ;;  %v1869_v43 = vld [vmem:[%s6261_s13 + $0x90] sm:$0xff] }
 0x86c   :  { %1759 = vmatpush.msra.mxu0 %v1711_v16  ;;  %v2713_v16 = vld [vmem:[%s6261_s13 + $0x208] sm:$0xff] }
 0x86e   :  { %1760 = vmatpush.msra.mxu0 %v1710_v13  ;;  %v2706_v13 = vld [vmem:[%s6261_s13 + $0x1d0] sm:$0xff] }
 0x870   :  { %1761 = vmatpush.msra.mxu0 %v1709_v33 }
 0x872   :  { %1762 = vmatpush.msra.mxu0 %v1708_v21 }
 0x874   :  { %1763 = vmatpush.msra.mxu0 %v1707_v53  ;;  %v1683_v53 = vperm.slane %v5596_v61, 0  ;;  %v1879_v61 = vld [vmem:[%s6261_s13 + $0xe0] sm:$0xff] }
 0x8ae   :  { %v1452_v38 = vpop.f32.mrf.mxu0  ;;  %v1543_v35 = vpop.f32.mrf.mxu1 }
 0x8af   :  { %v1453_v20 = vadd.f32 %v1452_v38, %v1432_v29  ;;  %v2720_v29 = vld [vmem:[%s6261_s13 + $0x240] sm:$0xff]  ;;  %v2725_v38 = vld [vmem:[%s6261_s13 + $0x268] sm:$0xff] }
 0x8b0   :  { %1995 = vmatpush.msrb.mxu1 %v2725_v38  ;;  %v1882_v38 = vld [vmem:[%s6261_s13 + $0xf8] sm:$0xff] }
 0x8b1   :  { %v1460_v60 = vadd.f32 %v2892_v42, %v1453_v20  ;;  %v1881_v42 = vld [vmem:[%s6261_s13 + $0xf0] sm:$0xff] }
 0x8b2   :  { %v2718_v20 = vld [vmem:[%s6261_s13 + $0x230] sm:$0xff]  ;;  %2014 = vmatpush.msrb.mxu2 %v1881_v42  ;;  %1996 = vmatpush.msrb.mxu1 %v2722_v39  ;;  %v1886_v42 = vld [vmem:[%s6261_s13 + $0x118] sm:$0xff] }
 0x8b3   :  { %1582 = vmatmul.f32.vlgmr.msra.gmra.mxu3 %v1460_v60  ;;  %1602 = vmatmul.f32.vlgmr.msrb.gmra.mxu0 %v1460_v60  ;;  %v1878_v60 = vld [vmem:[%s6261_s13 + $0xd8] sm:$0xff] }
 0x8b4   :  { %1969 = vmatpush.msrb.mxu0 %v2742_v1  ;;  %1949 = vmatpush.msra.mxu3 %v2741_v0  ;;  %v2702_v0 = vld [vmem:[%s6261_s13 + $0x1b0] sm:$0xff]  ;;  %v1863_v1 = vld [vmem:[%s6261_s13 + $0x60] sm:$0xff]  ;;  %v2783_v39 = vld [vmem:[%s6261_s13 + $0x438] sm:$0xff] }
 0x8b5   :  { %v1563_v45 = vpop.f32.mrf.mxu2  ;;  %2015 = vmatpush.msrb.mxu2 %v1878_v60  ;;  %1997 = vmatpush.msrb.mxu1 %v2719_v26  ;;  %v2786_v60 = vld [vmem:[%s6261_s13 + $0x450] sm:$0xff]  ;;  %v2781_v26 = vld [vmem:[%s6261_s13 + $0x428] sm:$0xff] }
 0x8b6   :  { %1970 = vmatpush.msrb.mxu0 %v2739_v12  ;;  %1950 = vmatpush.msra.mxu3 %v2738_v11  ;;  %v1656_v63 = vpop.f32.mrf.mxu1  ;;  %v2700_v12 = vld [vmem:[%s6261_s13 + $0x1a0] sm:$0xff] }
 0x8b7   :  { %2016 = vmatpush.msrb.mxu2 %v1875_v22  ;;  %1998 = vmatpush.msrb.mxu1 %v2716_v34  ;;  %v1876_v22 = vld [vmem:[%s6261_s13 + $0xc8] sm:$0xff]  ;;  %v2774_v34 = vld [vmem:[%s6261_s13 + $0x3f0] sm:$0xff] }
 0x8b8   :  { %1971 = vmatpush.msrb.mxu0 %v2736_v51  ;;  %1951 = vmatpush.msra.mxu3 %v2735_v17  ;;  %v2707_v51 = vld [vmem:[%s6261_s13 + $0x1d8] sm:$0xff] }
 0x8b9   :  { %2017 = vmatpush.msrb.mxu2 %v1872_v44  ;;  %1999 = vmatpush.msrb.mxu1 %v2713_v16  ;;  %v2699_v17 = vld [vmem:[%s6261_s13 + $0x198] sm:$0xff]  ;;  %v2778_v44 = vld [vmem:[%s6261_s13 + $0x410] sm:$0xff]  ;;  %v2772_v16 = vld [vmem:[%s6261_s13 + $0x3e0] sm:$0xff] }
 0x8ba   :  { %1972 = vmatpush.msrb.mxu0 %v2733_v32  ;;  %1952 = vmatpush.msra.mxu3 %v2732_v14  ;;  %v2697_v32 = vld [vmem:[%s6261_s13 + $0x188] sm:$0xff]  ;;  %v1898_v14 = vld [vmem:[%s6261_s13 + $0x178] sm:$0xff] }
 0x8bb   :  { %2018 = vmatpush.msrb.mxu2 %v1869_v43  ;;  %2000 = vmatpush.msrb.mxu1 %v2710_v62  ;;  %v1868_v43 = vld [vmem:[%s6261_s13 + $0x88] sm:$0xff]  ;;  %v1858_v62 = vld [vmem:[%s6261_s13 + $0x38] sm:$0xff] }
 0x8bc   :  { %1973 = vmatpush.msrb.mxu0 %v2730_v48  ;;  %1953 = vmatpush.msra.mxu3 %v2729_v36  ;;  %v2696_v48 = vld [vmem:[%s6261_s13 + $0x180] sm:$0xff] }
 0x8bd   :  { %v1676_v6 = vpop.f32.mrf.mxu2  ;;  %2019 = vmatpush.msrb.mxu2 %v1866_v15  ;;  %2001 = vmatpush.msrb.mxu1 %v2707_v51  ;;  %v1895_v36 = vld [vmem:[%s6261_s13 + $0x160] sm:$0xff]  ;;  %v2759_v51 = vld [vmem:[%s6261_s13 + $0x378] sm:$0xff] }
 0x8be   :  { %1974 = vmatpush.msrb.mxu0 %v2727_v5  ;;  %1954 = vmatpush.msra.mxu3 %v2726_v7  ;;  %v1854_v5 = vld [vmem:[%s6261_s13 + $0x18] sm:$0xff]  ;;  %v2698_v7 = vld [vmem:[%s6261_s13 + $0x190] sm:$0xff]  ;;  %v2768_v15 = vld [vmem:[%s6261_s13 + $0x3c0] sm:$0xff] }
 0x8bf   :  { %2020 = vmatpush.msrb.mxu2 %v1863_v1  ;;  %2002 = vmatpush.msrb.mxu1 %v2704_v55  ;;  %v2763_v1 = vld [vmem:[%s6261_s13 + $0x398] sm:$0xff]  ;;  %v2757_v55 = vld [vmem:[%s6261_s13 + $0x368] sm:$0xff] }
 0x8c0   :  { %1975 = vmatpush.msrb.mxu0 %v2724_v46  ;;  %1955 = vmatpush.msra.mxu3 %v2723_v18  ;;  %v1891_v46 = vld [vmem:[%s6261_s13 + $0x140] sm:$0xff]  ;;  %v2789_v18 = vld [vmem:[%s6261_s13 + $0x468] sm:$0xff] }
 0x8c1   :  { %2021 = vmatpush.msrb.mxu2 %v1860_v27  ;;  %2003 = vmatpush.msrb.mxu1 %v2701_v19  ;;  %v1852_v27 = vld [vmem:[%s6261_s13 + $0x8] sm:$0xff] }
 0x8c2   :  { %1976 = vmatpush.msrb.mxu0 %v2721_v37  ;;  %1956 = vmatpush.msra.mxu3 %v2720_v29  ;;  %v1888_v37 = vld [vmem:[%s6261_s13 + $0x128] sm:$0xff]  ;;  %v1885_v29 = vld [vmem:[%s6261_s13 + $0x110] sm:$0xff] }
 0x8c3   :  { %2022 = vmatpush.msrb.mxu2 %v1857_v2  ;;  %2004 = vmatpush.msrb.mxu1 %v2698_v7  ;;  %v2788_v2 = vld [vmem:[%s6261_s13 + $0x460] sm:$0xff]  ;;  %v2785_v19 = vld [vmem:[%s6261_s13 + $0x448] sm:$0xff] }
 0x8c4   :  { %1977 = vmatpush.msrb.mxu0 %v2718_v20  ;;  %1957 = vmatpush.msra.mxu3 %v2717_v30  ;;  %v1883_v20 = vld [vmem:[%s6261_s13 + $0x100] sm:$0xff]  ;;  %v1880_v30 = vld [vmem:[%s6261_s13 + $0xe8] sm:$0xff] }
 0x8c5   :  { %2023 = vmatpush.msrb.mxu2 %v1854_v5  ;;  %2138 = vmatpush.msra.mxu1 %v2789_v18  ;;  %v2747_v5 = vld [vmem:[%s6261_s13 + $0x318] sm:$0xff]  ;;  %v2745_v7 = vld [vmem:[%s6261_s13 + $0x308] sm:$0xff]  ;;  %v2776_v18 = vld [vmem:[%s6261_s13 + $0x400] sm:$0xff] }
 0x8c6   :  { %1978 = vmatpush.msrb.mxu0 %v2715_v56  ;;  %1958 = vmatpush.msra.mxu3 %v2714_v23  ;;  %v2784_v56 = vld [vmem:[%s6261_s13 + $0x440] sm:$0xff] }
 0x8c7   :  { %2024 = vmatpush.msrb.mxu2 %v1851_v41  ;;  %2139 = vmatpush.msra.mxu1 %v2786_v60  ;;  %v2780_v23 = vld [vmem:[%s6261_s13 + $0x420] sm:$0xff]  ;;  %v2782_v41 = vld [vmem:[%s6261_s13 + $0x430] sm:$0xff] }
 0x8c8   :  { %1979 = vmatpush.msrb.mxu0 %v2712_v10  ;;  %1959 = vmatpush.msra.mxu3 %v2711_v28  ;;  %v2777_v10 = vld [vmem:[%s6261_s13 + $0x408] sm:$0xff]  ;;  %v1871_v28 = vld [vmem:[%s6261_s13 + $0xa0] sm:$0xff] }
 0x8c9   :  { %2158 = vmatpush.msra.mxu2 %v2790_v25  ;;  %2140 = vmatpush.msra.mxu1 %v2783_v39  ;;  %v2773_v25 = vld [vmem:[%s6261_s13 + $0x3e8] sm:$0xff] }
 0x8ca   :  { %1980 = vmatpush.msrb.mxu0 %v2709_v24  ;;  %1960 = vmatpush.msra.mxu3 %v2708_v4  ;;  %v1867_v24 = vld [vmem:[%s6261_s13 + $0x80] sm:$0xff]  ;;  %v2771_v4 = vld [vmem:[%s6261_s13 + $0x3d8] sm:$0xff] }
 0x8cb   :  { %2141 = vmatpush.msra.mxu1 %v2780_v23  ;;  %v2755_v23 = vld [vmem:[%s6261_s13 + $0x358] sm:$0xff] }
 0x8cc   :  { %1981 = vmatpush.msrb.mxu0 %v2706_v13  ;;  %1961 = vmatpush.msra.mxu3 %v2705_v54  ;;  %v1865_v13 = vld [vmem:[%s6261_s13 + $0x70] sm:$0xff]  ;;  %v1899_v54 = vld [vmem:[%s6250_s2] sm:$0xff] }
 0x8cd   :  { %2142 = vmatpush.msra.mxu1 %v2777_v10 }
 0x8ce   :  { %1982 = vmatpush.msrb.mxu0 %v2703_v58  ;;  %1962 = vmatpush.msra.mxu3 %v2702_v0  ;;  %v2766_v58 = vld [vmem:[%s6261_s13 + $0x3b0] sm:$0xff]  ;;  %v1819_v60 = vpop.f32.mrf.mxu1 }
 0x8cf   :  { %2143 = vmatpush.msra.mxu1 %v2774_v34  ;;  %v2762_v0 = vld [vmem:[%s6261_s13 + $0x390] sm:$0xff] }
 0x8d0   :  { %1983 = vmatpush.msrb.mxu0 %v2700_v12  ;;  %1963 = vmatpush.msra.mxu3 %v2699_v17  ;;  %v1856_v12 = vld [vmem:[%s6261_s13 + $0x28] sm:$0xff]  ;;  %v2760_v17 = vld [vmem:[%s6261_s13 + $0x380] sm:$0xff] }
 0x8d1   :  { %2144 = vmatpush.msra.mxu1 %v2771_v4  ;;  %v5967_v4 = vld [vmem:[%s6262_s14 + $0x3] sm:$0x7] }
 0x8d2   :  { %1984 = vmatpush.msrb.mxu0 %v2697_v32  ;;  %1964 = vmatpush.msra.mxu3 %v2696_v48  ;;  %v2756_v32 = vld [vmem:[%s6261_s13 + $0x360] sm:$0xff]  ;;  %v2791_v48 = vld [vmem:[%s6261_s13 + $0x478] sm:$0xff] }
 0x8d3   :  { %2145 = vmatpush.msra.mxu1 %v2768_v15  ;;  %v5979_v15 = vld [vmem:[%s6262_s14] sm:$0x7] }
 0x8d4   :  { %2005 = vmatmul.f32.vlgmr.msrb.gmra.mxu1 %v1899_v54 }
 0x930   :  { %v1603_v59 = vpop.f32.mrf.mxu0 }
 0x931   :  { %v1604_v40 = vadd.f32 %v1603_v59, %v1563_v45  ;;  %v1892_v45 = vld [vmem:[%s6261_s13 + $0x148] sm:$0xff]  ;;  %v1877_v59 = vld [vmem:[%s6261_s13 + $0xd0] sm:$0xff] }
 0x933   :  { %v1680_v47 = vadd.f32 %v1676_v6, %v1604_v40  ;;  %v1873_v40 = vld [vmem:[%s6261_s13 + $0xb0] sm:$0xff]  ;;  %v1870_v6 = vld [vmem:[%s6261_s13 + $0x98] sm:$0xff] }
 0x935   :  { %v1688_v9 = vadd.f32 %v1684_v52, %v1680_v47  ;;  %v1874_v52 = vld [vmem:[%s6261_s13 + $0xb8] sm:$0xff] }
 0x936   :  { %v1583_v33 = vpop.f32.mrf.mxu3  ;;  %v2775_v47 = vld [vmem:[%s6261_s13 + $0x3f8] sm:$0xff] }
 0x937   :  { %v1690_v21 = vmax.f32 %v1688_v9, 0.0  ;;  %v1584_v57 = vadd.f32 %v1583_v33, %v1543_v35  ;;  %v2787_v35 = vld [vmem:[%s6261_s13 + $0x458] sm:$0xff]  ;;  %v1864_v9 = vld [vmem:[%s6261_s13 + $0x68] sm:$0xff] }
 0x938   :  { %2159 = vmatpush.msra.mxu2 %v2787_v35  ;;  %v2769_v33 = vld [vmem:[%s6261_s13 + $0x3c8] sm:$0xff] }
 0x939   :  { %v1679_v11 = vadd.f32 %v1656_v63, %v1584_v57  ;;  %1764 = vmatmul.f32.vlgmr.msra.gmra.mxu0 %v1690_v21  ;;  %v1861_v21 = vld [vmem:[%s6261_s13 + $0x50] sm:$0xff]  ;;  %v1862_v57 = vld [vmem:[%s6261_s13 + $0x58] sm:$0xff]  ;;  %v1859_v63 = vld [vmem:[%s6261_s13 + $0x40] sm:$0xff] }
 0x93a   :  { %2049 = vmatpush.msra.mxu0 %v1898_v14  ;;  %2160 = vmatpush.msra.mxu2 %v2784_v56  ;;  %v2753_v14 = vld [vmem:[%s6261_s13 + $0x348] sm:$0xff]  ;;  %v2758_v56 = vld [vmem:[%s6261_s13 + $0x370] sm:$0xff] }
 0x93b   :  { %v1687_v49 = vadd.f32 %v1683_v53, %v1679_v11  ;;  %v2765_v53 = vld [vmem:[%s6261_s13 + $0x3a8] sm:$0xff]  ;;  %v1855_v11 = vld [vmem:[%s6261_s13 + $0x20] sm:$0xff] }
 0x93c   :  { %2050 = vmatpush.msra.mxu0 %v1895_v36  ;;  %2161 = vmatpush.msra.mxu2 %v2781_v26  ;;  %v2751_v36 = vld [vmem:[%s6261_s13 + $0x338] sm:$0xff]  ;;  %v2761_v35 = vld [vmem:[%s6261_s13 + $0x388] sm:$0xff] }
 0x93d   :  { %v1689_v8 = vmax.f32 %v1687_v49, 0.0  ;;  %2146 = vmatpush.msra.mxu1 %v2765_v53  ;;  %v1853_v49 = vld [vmem:[%s6261_s13 + $0x10] sm:$0xff] }
 0x93e   :  { %2051 = vmatpush.msra.mxu0 %v1892_v45  ;;  %2162 = vmatpush.msra.mxu2 %v2778_v44  ;;  %v2744_v45 = vld [vmem:[%s6261_s13 + $0x300] sm:$0xff]  ;;  %v2803_v53 = vld [vmem:[%s6253_s5 + $0x450] sm:$0xff] }
 0x93f   :  { %1744 = vmatmul.f32.vlgmr.msrb.gmra.mxu3 %v1689_v8  ;;  %2147 = vmatpush.msra.mxu1 %v2762_v0  ;;  %v2754_v8 = vld [vmem:[%s6261_s13 + $0x350] sm:$0xff]  ;;  %v2802_v0 = vld [vmem:[%s6253_s5 + $0x448] sm:$0xff] }
 0x940   :  { %2029 = vmatpush.msrb.mxu3 %v1897_v31  ;;  %2052 = vmatpush.msra.mxu0 %v1889_v3  ;;  %v2750_v31 = vld [vmem:[%s6261_s13 + $0x330] sm:$0xff]  ;;  %v2779_v3 = vld [vmem:[%s6261_s13 + $0x418] sm:$0xff] }
 0x941   :  { %2163 = vmatpush.msra.mxu2 %v2775_v47  ;;  %1985 = vmatmul.f32.vlgmr.msrb.gmra.mxu0 %v1899_v54  ;;  %v2808_v47 = vld [vmem:[%s6253_s5 + $0x478] sm:$0xff] }
 0x942   :  { %2030 = vmatpush.msrb.mxu3 %v1894_v50  ;;  %2053 = vmatpush.msra.mxu0 %v1886_v42  ;;  %v2748_v50 = vld [vmem:[%s6261_s13 + $0x320] sm:$0xff]  ;;  %v2767_v42 = vld [vmem:[%s6261_s13 + $0x3b8] sm:$0xff] }
 0x943   :  { %2164 = vmatpush.msra.mxu2 %v2772_v16  ;;  %2148 = vmatpush.msra.mxu1 %v2759_v51  ;;  %v2806_v16 = vld [vmem:[%s6253_s5 + $0x468] sm:$0xff] }
 0x944   :  { %2031 = vmatpush.msrb.mxu3 %v1891_v46  ;;  %2054 = vmatpush.msra.mxu0 %v1883_v20  ;;  %v5909_v46 = vld [vmem:[%s6251_s3] sm:$0xff]  ;;  %v2894_v20 = vld [vmem:[%s6254_s6 + $0x8] ss:$0 sm:$0xff] }
 0x945   :  { %2165 = vmatpush.msra.mxu2 %v2769_v33  ;;  %2149 = vmatpush.msra.mxu1 %v2756_v32  ;;  %v2800_v32 = vld [vmem:[%s6253_s5 + $0x438] sm:$0xff] }
 0x946   :  { %2032 = vmatpush.msrb.mxu3 %v1888_v37  ;;  %2055 = vmatpush.msra.mxu0 %v1880_v30  ;;  %v2770_v37 = vld [vmem:[%s6261_s13 + $0x3d0] sm:$0xff]  ;;  %v2893_v30 = vld [vmem:[%s6254_s6 + $0x9] ss:$0 sm:$0xff] }
 0x947   :  { %1965 = vmatmul.f32.vlgmr.msra.gmra.mxu3 %v1899_v54  ;;  %2166 = vmatpush.msra.mxu2 %v2766_v58  ;;  %v2804_v54 = vld [vmem:[%s6253_s5 + $0x458] sm:$0xff] }
 0x948   :  { %2033 = vmatpush.msrb.mxu3 %v1885_v29  ;;  %2056 = vmatpush.msra.mxu0 %v1877_v59  ;;  %v1839_v29 = vpop.f32.mrf.mxu2 }
 0x949   :  { %2167 = vmatpush.msra.mxu2 %v2763_v1  ;;  %2150 = vmatpush.msra.mxu1 %v2753_v14 }
 0x94a   :  { %2034 = vmatpush.msrb.mxu3 %v1882_v38  ;;  %2057 = vmatpush.msra.mxu0 %v1874_v52  ;;  %v2764_v38 = vld [vmem:[%s6261_s13 + $0x3a0] sm:$0xff] }
 0x94b   :  { %2168 = vmatpush.msra.mxu2 %v2760_v17  ;;  %2151 = vmatpush.msra.mxu1 %v2750_v31  ;;  %v2752_v52 = vld [vmem:[%s6261_s13 + $0x340] sm:$0xff]  ;;  %v2072_v17 = vperm.slane %v5979_v15, 1 }
 0x94c   :  { %2035 = vmatpush.msrb.mxu3 %v1879_v61  ;;  %2058 = vmatpush.msra.mxu0 %v1871_v28  ;;  %v1840_v61 = vadd.f32 %v1839_v29, %v1819_v60  ;;  %v2746_v28 = vld [vmem:[%s6261_s13 + $0x310] sm:$0xff]  ;;  %v2859_v29 = vld [vmem:[%s6253_s5 + $0x5f8] sm:$0xff]  ;;  %v2823_v60 = vld [vmem:[%s6253_s5 + $0x4e8] sm:$0xff] }
 0x94d   :  { %2169 = vmatpush.msra.mxu2 %v2757_v55  ;;  %2152 = vmatpush.msra.mxu1 %v2747_v5 }
 0x94e   :  { %2036 = vmatpush.msrb.mxu3 %v1876_v22  ;;  %2059 = vmatpush.msra.mxu0 %v1868_v43  ;;  %v1847_v26 = vadd.f32 %v2893_v30, %v1840_v61  ;;  %v2807_v43 = vld [vmem:[%s6253_s5 + $0x470] sm:$0xff]  ;;  %v2857_v61 = vld [vmem:[%s6253_s5 + $0x5e8] sm:$0xff] }
 0x94f   :  { %2170 = vmatpush.msra.mxu2 %v2754_v8  ;;  %2153 = vmatpush.msra.mxu1 %v2744_v45  ;;  %v2799_v8 = vld [vmem:[%s6253_s5 + $0x430] sm:$0xff] }
 0x950   :  { %2037 = vmatpush.msrb.mxu3 %v1873_v40  ;;  %2060 = vmatpush.msra.mxu0 %v1865_v13  ;;  %v2132_v13 = vperm.slane %v5967_v4, 0 }
 0x951   :  { %2171 = vmatpush.msra.mxu2 %v2751_v36  ;;  %2154 = vmatmul.f32.vlgmr.msra.gmra.mxu1 %v5909_v46  ;;  %v5956_v34 = vpop.f32.mrf.mxu1  ;;  %v2798_v36 = vld [vmem:[%s6253_s5 + $0x428] sm:$0xff] }
 0x952   :  { %2038 = vmatpush.msrb.mxu3 %v1870_v6  ;;  %2061 = vmatpush.msra.mxu0 %v1862_v57  ;;  %v2749_v6 = vld [vmem:[%s6261_s13 + $0x328] sm:$0xff] }
 0x953   :  { %2172 = vmatpush.msra.mxu2 %v2748_v50  ;;  %v2796_v50 = vld [vmem:[%s6253_s5 + $0x418] sm:$0xff] }
 0x954   :  { %2039 = vmatpush.msrb.mxu3 %v1867_v24  ;;  %2062 = vmatpush.msra.mxu0 %v1859_v63 }
 0x955   :  { %2173 = vmatpush.msra.mxu2 %v2745_v7  ;;  %v2795_v7 = vld [vmem:[%s6253_s5 + $0x410] sm:$0xff] }
 0x956   :  { %2040 = vmatpush.msrb.mxu3 %v1864_v9  ;;  %2063 = vmatpush.msra.mxu0 %v1856_v12  ;;  %v2805_v9 = vld [vmem:[%s6253_s5 + $0x460] sm:$0xff] }
 0x957   :  { %v2801_v12 = vld [vmem:[%s6253_s5 + $0x440] sm:$0xff] }
 0x958   :  { %2041 = vmatpush.msrb.mxu3 %v1861_v21  ;;  %2064 = vmatpush.msra.mxu0 %v1853_v49  ;;  %v2071_v21 = vperm.slane %v5979_v15, 0  ;;  %v2133_v49 = vperm.slane %v5967_v4, 1 }
 0x95a   :  { %2042 = vmatpush.msrb.mxu3 %v1858_v62  ;;  %2268 = vmatpush.msrb.mxu0 %v2808_v47 }
 0x95c   :  { %2043 = vmatpush.msrb.mxu3 %v1855_v11  ;;  %2269 = vmatpush.msrb.mxu0 %v2807_v43 }
 0x95e   :  { %2044 = vmatpush.msrb.mxu3 %v1852_v27  ;;  %2270 = vmatpush.msrb.mxu0 %v2806_v16 }
 0x960   :  { %2178 = vmatpush.msra.mxu3 %v2791_v48  ;;  %2271 = vmatpush.msrb.mxu0 %v2805_v9 }
 0x962   :  { %2179 = vmatpush.msra.mxu3 %v2788_v2  ;;  %2272 = vmatpush.msrb.mxu0 %v2804_v54  ;;  %v2818_v54 = vld [vmem:[%s6253_s5 + $0x4c0] sm:$0xff] }
 0x964   :  { %2180 = vmatpush.msra.mxu3 %v2785_v19  ;;  %2273 = vmatpush.msrb.mxu0 %v2803_v53  ;;  %v2797_v19 = vld [vmem:[%s6253_s5 + $0x420] sm:$0xff] }
 0x966   :  { %2181 = vmatpush.msra.mxu3 %v2782_v41  ;;  %2274 = vmatpush.msrb.mxu0 %v2802_v0  ;;  %v2851_v0 = vld [vmem:[%s6253_s5 + $0x5b8] sm:$0xff] }
 0x968   :  { %2182 = vmatpush.msra.mxu3 %v2779_v3  ;;  %2275 = vmatpush.msrb.mxu0 %v2801_v12  ;;  %v2794_v3 = vld [vmem:[%s6253_s5 + $0x408] sm:$0xff]  ;;  %v2816_v12 = vld [vmem:[%s6253_s5 + $0x4b0] sm:$0xff] }
 0x96a   :  { %2183 = vmatpush.msra.mxu3 %v2776_v18  ;;  %2276 = vmatpush.msrb.mxu0 %v2800_v32 }
 0x96c   :  { %2184 = vmatpush.msra.mxu3 %v2773_v25  ;;  %2277 = vmatpush.msrb.mxu0 %v2799_v8 }
 0x96e   :  { %2185 = vmatpush.msra.mxu3 %v2770_v37  ;;  %2278 = vmatpush.msrb.mxu0 %v2798_v36  ;;  %v2793_v37 = vld [vmem:[%s6253_s5 + $0x400] sm:$0xff] }
 0x970   :  { %2186 = vmatpush.msra.mxu3 %v2767_v42  ;;  %2279 = vmatpush.msrb.mxu0 %v2797_v19  ;;  %v2825_v42 = vld [vmem:[%s6253_s5 + $0x4f8] sm:$0xff]  ;;  %v2848_v19 = vld [vmem:[%s6253_s5 + $0x5a0] sm:$0xff] }
 0x971   :  { %2311 = vmatpush.msrb.mxu1 %v2825_v42  ;;  %v2846_v42 = vld [vmem:[%s6253_s5 + $0x590] sm:$0xff] }
 0x972   :  { %2187 = vmatpush.msra.mxu3 %v2764_v38  ;;  %2280 = vmatpush.msrb.mxu0 %v2796_v50  ;;  %v2824_v38 = vld [vmem:[%s6253_s5 + $0x4f0] sm:$0xff] }
 0x973   :  { %2312 = vmatpush.msrb.mxu1 %v2824_v38  ;;  %v2810_v38 = vld [vmem:[%s6253_s5 + $0x480] sm:$0xff] }
 0x974   :  { %2188 = vmatpush.msra.mxu3 %v2761_v35  ;;  %2281 = vmatpush.msrb.mxu0 %v2795_v7 }
 0x975   :  { %2313 = vmatpush.msrb.mxu1 %v2823_v60  ;;  %v2842_v60 = vld [vmem:[%s6253_s5 + $0x578] sm:$0xff] }
 0x976   :  { %2189 = vmatpush.msra.mxu3 %v2758_v56  ;;  %2282 = vmatpush.msrb.mxu0 %v2794_v3  ;;  %v2856_v56 = vld [vmem:[%s6253_s5 + $0x5e0] sm:$0xff] }
 0x978   :  { %2190 = vmatpush.msra.mxu3 %v2755_v23  ;;  %2283 = vmatpush.msrb.mxu0 %v2793_v37  ;;  %v2812_v37 = vld [vmem:[%s6253_s5 + $0x490] sm:$0xff] }
 0x97a   :  { %2191 = vmatpush.msra.mxu3 %v2752_v52 }
 0x97c   :  { %2192 = vmatpush.msra.mxu3 %v2749_v6  ;;  %v2854_v6 = vld [vmem:[%s6253_s5 + $0x5d0] sm:$0xff] }
 0x97e   :  { %2193 = vmatpush.msra.mxu3 %v2746_v28 }
 0x9b6   :  { %v1765_v59 = vpop.f32.mrf.mxu0 }
 0x9be   :  { %v1986_v11 = vpop.f32.mrf.mxu0 }
 0x9c2   :  { %v1745_v39 = vpop.f32.mrf.mxu3 }
 0x9c3   :  { %v1746_v22 = vadd.f32 %v2894_v20, %v1745_v39  ;;  %v2858_v20 = vld [vmem:[%s6253_s5 + $0x5f0] sm:$0xff]  ;;  %v2822_v39 = vld [vmem:[%s6253_s5 + $0x4e0] sm:$0xff] }
 0x9c4   :  { %2314 = vmatpush.msrb.mxu1 %v2822_v39  ;;  %v2840_v39 = vld [vmem:[%s6253_s5 + $0x568] sm:$0xff] }
 0x9c5   :  { %v1766_v40 = vadd.f32 %v1765_v59, %v1746_v22  ;;  %v2821_v59 = vld [vmem:[%s6253_s5 + $0x4d8] sm:$0xff] }
 0x9c6   :  { %2315 = vmatpush.msrb.mxu1 %v2821_v59  ;;  %v2873_v59 = vld [vmem:[%s6253_s5 + $0x660] sm:$0xff] }
 0x9c7   :  { %v1848_v10 = vadd.f32 %v1847_v26, %v1766_v40  ;;  %v2855_v26 = vld [vmem:[%s6253_s5 + $0x5d8] sm:$0xff]  ;;  %v2820_v40 = vld [vmem:[%s6253_s5 + $0x4d0] sm:$0xff] }
 0x9c8   :  { %2316 = vmatpush.msrb.mxu1 %v2820_v40  ;;  %v2837_v40 = vld [vmem:[%s6253_s5 + $0x550] sm:$0xff] }
 0x9c9   :  { %v1849_v44 = vmax.f32 %v1848_v10, 0.0  ;;  %v2134_v10 = vperm.slane %v5967_v4, 2  ;;  %v2853_v4 = vld [vmem:[%s6253_s5 + $0x5c8] sm:$0xff] }
 0x9ca   :  { %v1966_v24 = vpop.f32.mrf.mxu3 }
 0x9cb   :  { %2025 = vmatmul.f32.vlgmr.msrb.gmra.mxu2 %v1849_v44  ;;  %2045 = vmatmul.f32.vlgmr.msrb.gmra.mxu3 %v1849_v44 }
 0x9cc   :  { %2065 = vmatmul.f32.vlgmr.msra.gmra.mxu0 %v1849_v44  ;;  %2398 = vmatpush.msrb.mxu3 %v2859_v29  ;;  %v2845_v29 = vld [vmem:[%s6253_s5 + $0x588] sm:$0xff] }
 0x9cd   :  { %2354 = vmatpush.msrb.mxu2 %v2842_v60 }
 0x9ce   :  { %v2155_v33 = vpop.f32.mrf.mxu1  ;;  %2399 = vmatpush.msrb.mxu3 %v2858_v20  ;;  %v2844_v20 = vld [vmem:[%s6253_s5 + $0x580] sm:$0xff] }
 0x9cf   :  { %v2156_v62 = vadd.f32 %v2155_v33, %v2132_v13  ;;  %v2073_v33 = vperm.slane %v5979_v15, 2  ;;  %v2817_v15 = vld [vmem:[%s6253_s5 + $0x4b8] sm:$0xff] }
 0x9d0   :  { %2400 = vmatpush.msrb.mxu3 %v2857_v61  ;;  %v2876_v61 = vld [vmem:[%s6253_s5 + $0x678] sm:$0xff] }
 0x9d1   :  { %2441 = vmatpush.msra.mxu0 %v2876_v61 }
 0x9d2   :  { %2401 = vmatpush.msrb.mxu3 %v2856_v56  ;;  %v2874_v56 = vld [vmem:[%s6253_s5 + $0x668] sm:$0xff] }
 0x9d3   :  { %2174 = vmatmul.f32.vlgmr.msra.gmra.mxu2 %v5909_v46  ;;  %2194 = vmatmul.f32.vlgmr.msra.gmra.mxu3 %v5909_v46 }
 0x9d4   :  { %2402 = vmatpush.msrb.mxu3 %v2855_v26  ;;  %v2872_v26 = vld [vmem:[%s6253_s5 + $0x658] sm:$0xff] }
 0x9d6   :  { %2403 = vmatpush.msrb.mxu3 %v2854_v6  ;;  %v2835_v6 = vld [vmem:[%s6253_s5 + $0x540] sm:$0xff] }
 0x9d8   :  { %2404 = vmatpush.msrb.mxu3 %v2853_v4  ;;  %v2832_v4 = vld [vmem:[%s6253_s5 + $0x528] sm:$0xff] }
 0xa49   :  { %v2066_v52 = vpop.f32.mrf.mxu0 }
 0xa4a   :  { %v2067_v13 = vadd.f32 %v2066_v52, %v5956_v34  ;;  %v2871_v52 = vld [vmem:[%s6253_s5 + $0x650] sm:$0xff] }
 0xa4e   :  { %v2026_v57 = vpop.f32.mrf.mxu2  ;;  %v2046_v63 = vpop.f32.mrf.mxu3 }
 0xa4f   :  { %v2027_v58 = vadd.f32 %v2026_v57, %v1966_v24  ;;  %v2047_v51 = vadd.f32 %v2046_v63, %v1986_v11  ;;  %v2819_v24 = vld [vmem:[%s6253_s5 + $0x4c8] sm:$0xff] }
 0xa50   :  { %2317 = vmatpush.msrb.mxu1 %v2819_v24  ;;  %v2868_v24 = vld [vmem:[%s6253_s5 + $0x638] sm:$0xff] }
 0xa51   :  { %v2077_v1 = vadd.f32 %v2071_v21, %v2027_v58  ;;  %v2078_v48 = vadd.f32 %v2072_v17, %v2047_v51  ;;  %v2852_v58 = vld [vmem:[%s6253_s5 + $0x5c0] sm:$0xff] }
 0xa52   :  { %2318 = vmatpush.msrb.mxu1 %v2818_v54  ;;  %2405 = vmatpush.msrb.mxu3 %v2852_v58  ;;  %v2866_v58 = vld [vmem:[%s6253_s5 + $0x628] sm:$0xff] }
 0xa53   :  { %v2198_v27 = vadd.f32 %v2156_v62, %v2077_v1  ;;  %v2079_v1 = vadd.f32 %v2073_v33, %v2067_v13  ;;  %v2830_v13 = vld [vmem:[%s6253_s5 + $0x518] sm:$0xff]  ;;  %v2895_v33 = vld [vmem:[%s6254_s6 + $0xa] ss:$0 sm:$0xff] }
 0xa54   :  { %2319 = vmatpush.msrb.mxu1 %v2817_v15  ;;  %2406 = vmatpush.msrb.mxu3 %v2851_v0  ;;  %v2865_v15 = vld [vmem:[%s6253_s5 + $0x620] sm:$0xff]  ;;  %v2863_v0 = vld [vmem:[%s6253_s5 + $0x610] sm:$0xff] }
 0xa55   :  { %v2199_v55 = vsub.f32 0.0, %v2198_v27 }
 0xa56   :  { %v2175_v14 = vpop.f32.mrf.mxu2  ;;  %v2195_v28 = vpop.f32.mrf.mxu3  ;;  %2320 = vmatpush.msrb.mxu1 %v2816_v12  ;;  %v2896_v12 = vld [vmem:[%s6254_s6 + $0xb] ss:$0 sm:$0xff] }
 0xa57   :  { %v2200_v2 = vmul.f32 1.442695, %v2199_v55  ;;  %v2176_v31 = vadd.f32 %v2175_v14, %v2133_v49  ;;  %v2196_v57 = vadd.f32 %v2195_v28, %v2134_v10  ;;  %v2850_v49 = vld [vmem:[%s6253_s5 + $0x5b0] sm:$0xff]  ;;  %v2815_v55 = vld [vmem:[%s6253_s5 + $0x4a8] sm:$0xff]  ;;  %v2869_v28 = vld [vmem:[%s6253_s5 + $0x640] sm:$0xff] }
 0xa58   :  { %2407 = vmatpush.msrb.mxu3 %v2850_v49  ;;  %2321 = vmatpush.msrb.mxu1 %v2815_v55  ;;  %v2836_v10 = vld [vmem:[%s6253_s5 + $0x548] sm:$0xff] }
 0xa59   :  { %2900 = vpow2.f32 %v2200_v2  ;;  %v2218_v5 = vadd.f32 %v2176_v31, %v2078_v48  ;;  %v2849_v48 = vld [vmem:[%s6253_s5 + $0x5a8] sm:$0xff]  ;;  %v2814_v2 = vld [vmem:[%s6253_s5 + $0x4a0] sm:$0xff] }
 0xa5a   :  { %2408 = vmatpush.msrb.mxu3 %v2849_v48  ;;  %2322 = vmatpush.msrb.mxu1 %v2814_v2  ;;  %v2897_v49 = vld [vmem:[%s6254_s6 + $0xd] ss:$0 sm:$0xff]  ;;  %v2899_v48 = vld [vmem:[%s6254_s6 + $0xe] ss:$0 sm:$0xff] }
 0xa5b   :  { %v2219_v45 = vsub.f32 0.0, %v2218_v5  ;;  %v2813_v5 = vld [vmem:[%s6253_s5 + $0x498] sm:$0xff] }
 0xa5c   :  { %2409 = vmatpush.msrb.mxu3 %v2848_v19  ;;  %2323 = vmatpush.msrb.mxu1 %v2813_v5 }
 0xa5d   :  { %v2220_v41 = vmul.f32 1.442695, %v2219_v45  ;;  %v2847_v45 = vld [vmem:[%s6253_s5 + $0x598] sm:$0xff] }
 0xa5e   :  { %2410 = vmatpush.msrb.mxu3 %v2847_v45  ;;  %2324 = vmatpush.msrb.mxu1 %v2812_v37 }
 0xa5f   :  { %v2901_v18 = vpop.eup %2900  ;;  %2902 = vpow2.f32 %v2220_v41 }
 0xa60   :  { %v2202_v25 = vadd.f32 1.0, %v2901_v18  ;;  %2411 = vmatpush.msrb.mxu3 %v2846_v42 }
 0xa62   :  { %2904 = vrcp.f32 %v2202_v25  ;;  %v2214_v47 = vand.u32 2147483648, %v2202_v25  ;;  %v2212_v16 = vand.u32 2147483647, %v2202_v25  ;;  %vm2208_vm1 = vweird.f32 %v2202_v25  ;;  %2412 = vmatpush.msrb.mxu3 %v2845_v29 }
 0xa64   :  { %v2215_v34 = vor.u32 1.1754944e-38, %v2214_v47  ;;  %vm2213_vm3 = vcmp.eq.f32.partialorder %v2212_v16, 8.507059e+37  ;;  %2413 = vmatpush.msrb.mxu3 %v2844_v20  ;;  %v2834_v47 = vld [vmem:[%s6253_s5 + $0x538] sm:$0xff]  ;;  %v2867_v16 = vld [vmem:[%s6253_s5 + $0x630] sm:$0xff] }
 0xa65   :  { %v2903_v35 = vpop.eup %2902 }
 0xa66   :  { %v6038_v30 = vadd.f32 1.0, %v2903_v35  ;;  %v2841_v35 = vld [vmem:[%s6253_s5 + $0x570] sm:$0xff] }
 0xa67   :  { %2355 = vmatpush.msrb.mxu2 %v2841_v35 }
 0xa68   :  { %v2905_v22 = vpop.eup %2904  ;;  %2906 = vrcp.f32 %v6038_v30  ;;  %v2234_v27 = vand.u32 2147483648, %v6038_v30  ;;  %v2232_v32 = vand.u32 2147483647, %v6038_v30  ;;  %vm2228_vm5 = vweird.f32 %v6038_v30 }
 0xa69   :  { %v2204_v23 = vmul.f32 %v2905_v22, %v2202_v25  ;;  %vm2209_vm0 = vweird.f32 %v2905_v22  ;;  %2356 = vmatpush.msrb.mxu2 %v2840_v39 }
 0xa6a   :  { %vm2210_vm2 = vmor %vm2208_vm1, %vm2209_vm0  ;;  %v2235_v36 = vor.u32 1.1754944e-38, %v2234_v27  ;;  %vm2233_vm7 = vcmp.eq.f32.partialorder %v2232_v32, 8.507059e+37 }
 0xa6b   :  { %v2205_v44 = vsub.f32 1.0, %v2204_v23  ;;  %v2838_v23 = vld [vmem:[%s6253_s5 + $0x558] sm:$0xff] }
 0xa6d   :  { %v2206_v43 = vmul.f32 %v2905_v22, %v2205_v44  ;;  %v2870_v44 = vld [vmem:[%s6253_s5 + $0x648] sm:$0xff] }
 0xa6e   :  { %v2907_v9 = vpop.eup %2906 }
 0xa6f   :  { %v2224_v21 = vmul.f32 %v2907_v9, %v6038_v30  ;;  %v2207_v53 = vadd.f32 %v2905_v22, %v2206_v43  ;;  %vm2229_vm4 = vweird.f32 %v2907_v9  ;;  %v2875_v30 = vld [vmem:[%s6253_s5 + $0x670] sm:$0xff] }
 0xa70   :  { %vm2230_vm6 = vmor %vm2228_vm5, %vm2229_vm4  ;;  %2442 = vmatpush.msra.mxu0 %v2875_v30  ;;  %v2833_v43 = vld [vmem:[%s6253_s5 + $0x530] sm:$0xff] }
 0xa71   :  { %v2225_v62 = vsub.f32 1.0, %v2224_v21  ;;  %v2211_v63 = vsel %vm2210_vm2, %v2905_v22, %v2207_v53  ;;  %v2839_v22 = vld [vmem:[%s6253_s5 + $0x560] sm:$0xff]  ;;  %v2829_v53 = vld [vmem:[%s6253_s5 + $0x510] sm:$0xff] }
 0xa72   :  { %v2216_v11 = vsel %vm2213_vm3, %v2215_v34, %v2211_v63  ;;  %2443 = vmatpush.msra.mxu0 %v2874_v56  ;;  %2357 = vmatpush.msrb.mxu2 %v2839_v22  ;;  %v2828_v34 = vld [vmem:[%s6253_s5 + $0x508] sm:$0xff]  ;;  %v2864_v63 = vld [vmem:[%s6253_s5 + $0x618] sm:$0xff] }
 0xa73   :  { %v2238_v51 = vmul.f32 %v2216_v11, %v2196_v57  ;;  %v2226_v17 = vmul.f32 %v2907_v9, %v2225_v62  ;;  %v2827_v62 = vld [vmem:[%s6253_s5 + $0x500] sm:$0xff] }
 0xa74   :  { %2444 = vmatpush.msra.mxu0 %v2873_v59  ;;  %2358 = vmatpush.msrb.mxu2 %v2838_v23  ;;  %v2861_v11 = vld [vmem:[%s6253_s5 + $0x600] sm:$0xff] }
 0xa75   :  { %v2239_v14 = vadd.f32 %v2238_v51, %v2079_v1  ;;  %v2227_v8 = vadd.f32 %v2907_v9, %v2226_v17  ;;  %v2862_v1 = vld [vmem:[%s6253_s5 + $0x608] sm:$0xff] }
 0xa76   :  { %2445 = vmatpush.msra.mxu0 %v2872_v26  ;;  %2359 = vmatpush.msrb.mxu2 %v2837_v40 }
 0xa77   :  { %2908 = vtanh.f32 %v2239_v14  ;;  %v2231_v31 = vsel %vm2230_vm6, %v2907_v9, %v2227_v8  ;;  %v2831_v9 = vld [vmem:[%s6253_s5 + $0x520] sm:$0xff]  ;;  %v2898_v8 = vld [vmem:[%s6254_s6 + $0xc] ss:$0 sm:$0xff] }
 0xa78   :  { %v2236_v50 = vsel %vm2233_vm7, %v2235_v36, %v2231_v31  ;;  %2446 = vmatpush.msra.mxu0 %v2871_v52  ;;  %2360 = vmatpush.msrb.mxu2 %v2836_v10 }
 0xa79   :  { %v2241_v7 = vsub.f32 1.0, %v2236_v50  ;;  %v2243_v18 = vmul.f32 %v2236_v50, %v5909_v46  ;;  %v2811_v46 = vld [vmem:[%s6253_s5 + $0x488] sm:$0xff] }
 0xa7a   :  { %2325 = vmatpush.msrb.mxu1 %v2811_v46  ;;  %2447 = vmatpush.msra.mxu0 %v2870_v44 }
 0xa7b   :  { %2361 = vmatpush.msrb.mxu2 %v2835_v6 }
 0xa7c   :  { %2326 = vmatpush.msrb.mxu1 %v2810_v38  ;;  %2448 = vmatpush.msra.mxu0 %v2869_v28 }
 0xa7d   :  { %v2909_v41 = vpop.eup %2908  ;;  %2362 = vmatpush.msrb.mxu2 %v2834_v47 }
 0xa7e   :  { %v2242_v3 = vmul.f32 %v2909_v41, %v2241_v7  ;;  %2449 = vmatpush.msra.mxu0 %v2868_v24 }
 0xa7f   :  { %2363 = vmatpush.msrb.mxu2 %v2833_v43 }
 0xa80   :  { %v2244_v25 = vadd.f32 %v2243_v18, %v2242_v3  ;;  %2450 = vmatpush.msra.mxu0 %v2867_v16 }
 0xa81   :  { %2364 = vmatpush.msrb.mxu2 %v2832_v4 }
 0xa82   :  { %2245 = vst [vmem:[%s6265_s17] sm:$0xff] %v2244_v25  ;;  %2284 = vmatmul.f32.vlgmr.msrb.gmra.mxu0 %v2244_v25 }
 0xa83   :  { %2365 = vmatpush.msrb.mxu2 %v2831_v9  ;;  %2451 = vmatpush.msra.mxu0 %v2866_v58 }
 0xa85   :  { %2366 = vmatpush.msrb.mxu2 %v2830_v13  ;;  %2452 = vmatpush.msra.mxu0 %v2865_v15 }
 0xa87   :  { %2367 = vmatpush.msrb.mxu2 %v2829_v53  ;;  %2453 = vmatpush.msra.mxu0 %v2864_v63 }
 0xa89   :  { %2368 = vmatpush.msrb.mxu2 %v2828_v34  ;;  %2454 = vmatpush.msra.mxu0 %v2863_v0 }
 0xa8b   :  { %2369 = vmatpush.msrb.mxu2 %v2827_v62  ;;  %2455 = vmatpush.msra.mxu0 %v2862_v1 }
 0xa8d   :  { %2456 = vmatpush.msra.mxu0 %v2861_v11 }
 0xaff   :  { %v2285_v54 = vpop.f32.mrf.mxu0 }
 0xb00   :  { %v2286_v21 = vadd.f32 %v2895_v33, %v2285_v54 }
 0xb02   :  { %v2288_v57 = vmax.f32 %v2286_v21, 0.0 }
 0xb04   :  { %2327 = vmatmul.f32.vlgmr.msrb.gmra.mxu1 %v2288_v57  ;;  %2414 = vmatmul.f32.vlgmr.msrb.gmra.mxu3 %v2288_v57 }
 0xb81   :  { %v2328_v51 = vpop.f32.mrf.mxu1 }
 0xb82   :  { %v2329_v17 = vadd.f32 %v2896_v12, %v2328_v51 }
 0xb84   :  { %v2331_v27 = vmax.f32 %v2329_v17, 0.0 }
 0xb86   :  { %2370 = vmatmul.f32.vlgmr.msrb.gmra.mxu2 %v2331_v27 }
 0xb87   :  { %v2415_v32 = vpop.f32.mrf.mxu3 }
 0xb88   :  { %v2416_v55 = vadd.f32 %v2897_v49, %v2415_v32 }
 0xb8a   :  { %v2418_v14 = vmax.f32 %v2416_v55, 0.0 }
 0xb8c   :  { %2457 = vmatmul.f32.vlgmr.msra.gmra.mxu0 %v2418_v14 }
 0xc09   :  { %v2371_v2 = vpop.f32.mrf.mxu2  ;;  %v2458_v31 = vpop.f32.mrf.mxu0 }
 0xc0a   :  { %v2372_v36 = vadd.f32 %v2898_v8, %v2371_v2  ;;  %v2459_v19 = vadd.f32 %v2899_v48, %v2458_v31 }
 0xc0c   :  { %2910 = vtanh.f32 %v2372_v36  ;;  %2461 = vst [vmem:[%s6264_s16] sm:$0xff] %v2459_v19 }
 0xc12   :  { %v2911_v5 = vpop.eup %2910 }
 0xc13   :  { %2375 = vst [vmem:[%s6263_s15] sm:$0xff] %v2911_v5 }
 0xc14   :  { %2474 = vsyncpa [#allocation3], 1 }
 0xc15   :  { %2475 = vsyncpa [#allocation5], 1 }

</bundles_post_ra>
